<compile_context>
chip_gen: v6e
topology: v6e:2x2x1
jax: 0.10.0
libtpu: 0.0.40
codegen_flags: <defaults>
</compile_context>

<pallas_src>
import math
from functools import partial

import numpy as np
import jax
import jax.numpy as jnp
from jax.experimental import pallas as pl
from jax.experimental.pallas import tpu as pltpu

SQRT2 = math.sqrt(2.0)
INV_SQRT2 = 1.0 / SQRT2
LRELU_SLOPE = 0.2


def _lrelu(x):
    # EqualizedLR LeakyReLU(0.2) with the sqrt(2) gain folded in.
    return jnp.where(x >= 0.0, x, LRELU_SLOPE * x) * jnp.float32(SQRT2)


# ---------------------------------------------------------------------------
# In-kernel helpers (values in the lane-dense (G*H, W*C) layout).
# ---------------------------------------------------------------------------
def _tap3(x, H):
    """Vertical (ky) taps of a 'same'-padded 3x3 conv.

    x: (G*H, W*C) f32 -> (G*H, 3*W*C) bf16 = [x[h-1] | x[h] | x[h+1]] with
    zero rows at the top/bottom of every sample (groups never leak).  The kx
    taps + 'same' padding in w live in the banded RHS built at pack time.
    """
    R, L = x.shape
    h = jax.lax.broadcasted_iota(jnp.int32, (R, L), 0) % H
    up = jnp.where(h > 0, pltpu.roll(x, 1, axis=0), 0.0)          # x[h-1]
    dn = jnp.where(h < H - 1, pltpu.roll(x, R - 1, axis=0), 0.0)  # x[h+1]
    bf = jnp.bfloat16
    return jnp.concatenate([up.astype(bf), x.astype(bf), dn.astype(bf)],
                           axis=-1)


def _rowpool(t, G, Ho, Lc):
    """Sum vertical pixel pairs: (G*2Ho, Lc) -> (G*Ho, Lc). Lane slices are
    aligned (Lc is a multiple of 128 for this config)."""
    t2 = t.reshape(G * Ho, 2 * Lc)
    return t2[:, :Lc] + t2[:, Lc:]


# ---------------------------------------------------------------------------
# Fused forward kernel: one grid step == one minibatch-stddev group.
# ---------------------------------------------------------------------------
def _fused_disc_kernel(*refs, plan):
    in_refs, o_ref = refs[:-1], refs[-1]
    it = iter(in_refs)
    img_ref = next(it)
    w_rgb, b_rgb = next(it), next(it)
    blk_refs = [(next(it), next(it), next(it), next(it)) for _ in plan['blocks']]
    w_oc, b_oc = next(it), next(it)
    mb_map = next(it) if plan['use_mbstd'] else None
    w_fc1, b_fc1 = next(it), next(it)
    w_fc2, b_fc2 = next(it), next(it)

    G = plan['G']

    # ---- FromRGB: 1x1 conv as a block-diagonal lane matmul + bias + lrelu --
    x = jnp.dot(img_ref[0], w_rgb[...], preferred_element_type=jnp.float32)
    x = _lrelu(x + b_rgb[...])                    # (G*H0, W0*C0) f32, lane-dense

    # ---- Residual blocks ---------------------------------------------------
    # conv path: conv3x3(+b)+lrelu -> conv3x3 -> avgpool2 -> +b -> lrelu
    # skip path: conv1x1 -> avgpool2 (rides extra columns of the first matmul,
    # already width-pooled inside the RHS).
    for bi, blk in enumerate(plan['blocks']):
        H, W, Cin, Cout = blk['H'], blk['W'], blk['Cin'], blk['Cout']
        Wc1, b1, Wc2, b2 = blk_refs[bi]
        L = W * Cin
        Ho, Lo = H // 2, (W // 2) * Cout

        xt = _tap3(x, H)                                           # (G*H, 3L)
        h_ext = jnp.dot(xt, Wc1[...], preferred_element_type=jnp.float32)
        y1 = _lrelu(h_ext[:, :L] + b1[...])                        # conv1 out
        s_cp = h_ext[:, L:]                                        # skip (col-pooled)

        yt = _tap3(y1, H)
        y2_cp = jnp.dot(yt, Wc2[...], preferred_element_type=jnp.float32)

        y2 = _lrelu(_rowpool(y2_cp, G, Ho, Lo) * 0.25 + b2[...])
        s = _rowpool(s_cp, G, Ho, Lo) * 0.25
        x = (y2 + s) * jnp.float32(INV_SQRT2)                      # (G*Ho, Lo)

    Hf, Lf = plan['Hf'], plan['Wf'] * plan['Cf']

    # ---- Minibatch stddev: one scalar feature for this group ---------------
    if plan['use_mbstd']:
        xg = x.reshape(G, Hf * Lf)
        mu = jnp.mean(xg, axis=0, keepdims=True)
        var = jnp.mean((xg - mu) ** 2, axis=0, keepdims=True)
        feat = jnp.mean(jnp.sqrt(var + 1e-8), axis=1, keepdims=True)  # (1, 1)

    # ---- Output 3x3 conv + bias + lrelu; mbstd channel folded in -----------
    xt = _tap3(x, Hf)
    oc = jnp.dot(xt, w_oc[...], preferred_element_type=jnp.float32) + b_oc[...]
    if plan['use_mbstd']:
        oc = oc + feat * mb_map[...]       # constant mbstd channel through conv
    oc = _lrelu(oc)                                                 # (G*Hf, Lf)

    # ---- FC head (fc1 rows pre-permuted for the torch NCHW flatten order) --
    flat = oc.reshape(G, Hf * Lf).astype(jnp.bfloat16)
    h1 = _lrelu(jnp.dot(flat, w_fc1[...], preferred_element_type=jnp.float32)
                + b_fc1[...])
    out = jnp.dot(h1.astype(jnp.bfloat16), w_fc2[...],
                  preferred_element_type=jnp.float32) + b_fc2[...]
    o_ref[...] = out.reshape(1, G, plan['NC'])


# ---------------------------------------------------------------------------
# Parameter construction (equalized-LR scaling folded into the weights).
# ---------------------------------------------------------------------------
def _nf(stage, fmap_base, fmap_decay, fmap_min, fmap_max):
    fmaps = fmap_base / 2.0 ** (stage * fmap_decay)
    return int(min(max(fmaps, fmap_min), fmap_max))


def _eq_conv(key, cin, cout, k, bias=True):
    kw, kb = jax.random.split(key)
    w = jax.random.normal(kw, (cout, cin, k, k), jnp.float32)
    w = jnp.transpose(w, (2, 3, 1, 0)) * (1.0 / math.sqrt(cin * k * k))
    b = (jax.random.normal(kb, (cout,), jnp.float32) * 0.1) if bias else None
    return w, b


def _eq_linear(key, fin, fout):
    kw, kb = jax.random.split(key)
    w = jnp.transpose(jax.random.normal(kw, (fout, fin), jnp.float32))
    w = w * (1.0 / math.sqrt(fin))
    b = jax.random.normal(kb, (fout,), jnp.float32) * 0.1
    return w, b


def init_discriminator_params(key, *, img_res, img_channels, num_classes,
                              fmap_base, fmap_decay, fmap_min, fmap_max,
                              mbstd_group_size, mbstd_num_features):
    res_log2 = int(math.log2(img_res))
    assert img_res == 2 ** res_log2 and img_res > 4
    nfn = lambda s: _nf(s, fmap_base, fmap_decay, fmap_min, fmap_max)
    n_blocks = res_log2 - 2
    keys = iter(jax.random.split(key, 8 + 4 * n_blocks))

    params = {'config': dict(img_res=img_res, img_channels=img_channels,
                             num_classes=num_classes,
                             mbstd_group_size=mbstd_group_size,
                             mbstd_num_features=mbstd_num_features)}
    w, b = _eq_conv(next(keys), img_channels, nfn(res_log2 - 1), 1, True)
    params['from_rgb'] = {'w': w, 'b': b}

    blocks = []
    for res in range(res_log2, 2, -1):
        cin, cout = nfn(res - 1), nfn(res - 2)
        c1w, c1b = _eq_conv(next(keys), cin, cin, 3, True)
        c2w, _ = _eq_conv(next(keys), cin, cout, 3, False)
        c2b = jax.random.normal(next(keys), (cout,), jnp.float32) * 0.1  # AddBias
        skw, _ = _eq_conv(next(keys), cin, cout, 1, False)
        blocks.append({'cin': cin, 'cout': cout, 'conv1_w': c1w, 'conv1_b': c1b,
                       'conv2_w': c2w, 'conv2_b': c2b, 'skip_w': skw})
    params['blocks'] = blocks

    mbstd_ch = mbstd_num_features * int(mbstd_group_size > 1)
    params['out_conv_w'], params['out_conv_b'] = _eq_conv(
        next(keys), nfn(1) + mbstd_ch, nfn(1), 3, True)
    params['fc1_w'], params['fc1_b'] = _eq_linear(next(keys), nfn(1) * 4 * 4, nfn(0))
    params['fc2_w'], params['fc2_b'] = _eq_linear(next(keys), nfn(0),
                                                  max(num_classes, 1))
    return params


# ---------------------------------------------------------------------------
# Host-side weight packing: banded / block-diagonal RHS for the lane layout.
# ---------------------------------------------------------------------------
def _banded3x3(w, W):
    """w: (3,3,Cin,Cout) -> (3, W*Cin, W*Cout) 'same'-padded banded matrices."""
    Cin, Cout = w.shape[2], w.shape[3]
    B = np.zeros((3, W * Cin, W * Cout), np.float32)
    for ky in range(3):
        for wo in range(W):
            for kx in range(3):
                wi = wo + kx - 1
                if 0 <= wi < W:
                    B[ky, wi * Cin:(wi + 1) * Cin,
                      wo * Cout:(wo + 1) * Cout] = w[ky, kx]
    return B


def _block_diag(w, W):
    """w: (Cin, Cout) -> (W*Cin, W*Cout) block-diagonal (1x1 conv in lanes)."""
    Cin, Cout = w.shape
    D = np.zeros((W * Cin, W * Cout), np.float32)
    for i in range(W):
        D[i * Cin:(i + 1) * Cin, i * Cout:(i + 1) * Cout] = w
    return D


def _colpool_mat(W, C):
    """Width-pair sum of AvgPool2d(2) as a (W*C, (W//2)*C) linear map."""
    Wo = W // 2
    P = np.zeros((W * C, Wo * C), np.float32)
    eye = np.eye(C, dtype=np.float32)
    for w in range(W):
        P[w * C:(w + 1) * C, (w // 2) * C:(w // 2 + 1) * C] = eye
    return P


def _round_up(n, m):
    return (n + m - 1) // m * m


def _pack_operands(params, batch_size):
    cfg = params['config']
    img_res = cfg['img_res']
    Hf = Wf = 4
    use_mbstd = cfg['mbstd_group_size'] > 1
    if use_mbstd:
        assert cfg['mbstd_num_features'] == 1  # TODO(synk): >1 mbstd features
        G = min(cfg['mbstd_group_size'], batch_size)
    else:
        G = batch_size
    assert batch_size % G == 0, "batch must be divisible by mbstd group size"
    M = batch_size // G

    Cimg = cfg['img_channels']
    C0 = params['from_rgb']['w'].shape[-1]
    NC = max(cfg['num_classes'], 1)
    bf16, f32 = jnp.bfloat16, jnp.float32

    # FromRGB 1x1 conv as a block-diagonal (W0*Cimg, W0*C0) lane matmul.
    w_rgb = np.asarray(params['from_rgb']['w'], np.float32).reshape(Cimg, C0)
    operands = [
        jnp.asarray(_block_diag(w_rgb, img_res), bf16),
        jnp.asarray(np.tile(np.asarray(params['from_rgb']['b'], np.float32),
                            img_res).reshape(1, img_res * C0), f32),
    ]

    plan_blocks = []
    H = W = img_res
    for blk in params['blocks']:
        Cin, Cout = blk['cin'], blk['cout']
        Wo = W // 2
        w1 = np.asarray(blk['conv1_w'], np.float32)            # (3,3,Cin,Cin)
        w2 = np.asarray(blk['conv2_w'], np.float32)            # (3,3,Cin,Cout)
        skw = np.asarray(blk['skip_w'], np.float32).reshape(Cin, Cout)
        P = _colpool_mat(W, Cout)

        B1 = _banded3x3(w1, W)                                 # conv1, full res
        Bs = np.zeros((3, W * Cin, Wo * Cout), np.float32)
        Bs[1] = _block_diag(skw, W) @ P                        # skip 1x1 + col pool
        Wc1 = np.concatenate([B1, Bs], axis=2).reshape(
            3 * W * Cin, W * Cin + Wo * Cout)
        Wc2 = (_banded3x3(w2, W) @ P).reshape(3 * W * Cin, Wo * Cout)

        operands += [
            jnp.asarray(Wc1, bf16),
            jnp.asarray(np.tile(np.asarray(blk['conv1_b'], np.float32), W)
                        .reshape(1, W * Cin), f32),
            jnp.asarray(Wc2, bf16),
            jnp.asarray(np.tile(np.asarray(blk['conv2_b'], np.float32), Wo)
                        .reshape(1, Wo * Cout), f32),
        ]
        plan_blocks.append(dict(H=H, W=W, Cin=Cin, Cout=Cout))
        H, W = H // 2, W // 2
    assert H == Hf and W == Wf

    Cf = params['out_conv_w'].shape[-1]
    w_oc = np.asarray(params['out_conv_w'], np.float32)        # (3,3,Cf(+1),Cf)
    operands += [
        jnp.asarray(_banded3x3(w_oc[:, :, :Cf, :], Wf)
                    .reshape(3 * Wf * Cf, Wf * Cf), bf16),
        jnp.asarray(np.tile(np.asarray(params['out_conv_b'], np.float32), Wf)
                    .reshape(1, Wf * Cf), f32),
    ]
    if use_mbstd:
        # mbstd channel is spatially constant (== feat per group); through the
        # 'same'-padded 3x3 conv it contributes feat * (valid-tap sum of the
        # mbstd weight slice) per output position.
        w_mb = w_oc[:, :, Cf, :]                               # (3,3,Cf)
        mbm = np.zeros((Hf, Wf, Cf), np.float32)
        for y in range(Hf):
            for xx in range(Wf):
                for ky in range(3):
                    for kx in range(3):
                        if 0 <= y + ky - 1 < Hf and 0 <= xx + kx - 1 < Wf:
                            mbm[y, xx] += w_mb[ky, kx]
        operands.append(jnp.asarray(
            np.tile(mbm.reshape(Hf, Wf * Cf), (G, 1)), f32))   # (G*Hf, Wf*Cf)

    # FC head: fold the torch NCHW Flatten order into fc1's rows; pad fc1's
    # output (and fc2's input) to a 128-lane multiple with zeros.
    nf0 = params['fc1_w'].shape[1]
    nf0p = _round_up(nf0, 128)
    perm = np.zeros(Hf * Wf * Cf, np.int64)
    for h in range(Hf):
        for w in range(Wf):
            for c in range(Cf):
                perm[h * Wf * Cf + w * Cf + c] = c * Hf * Wf + h * Wf + w
    fc1_w = np.asarray(params['fc1_w'], np.float32)[perm, :]
    fc1_wp = np.zeros((Hf * Wf * Cf, nf0p), np.float32)
    fc1_wp[:, :nf0] = fc1_w
    fc1_bp = np.zeros((1, nf0p), np.float32)
    fc1_bp[0, :nf0] = np.asarray(params['fc1_b'], np.float32)
    fc2_wp = np.zeros((nf0p, NC), np.float32)
    fc2_wp[:nf0, :] = np.asarray(params['fc2_w'], np.float32)
    operands += [
        jnp.asarray(fc1_wp, bf16), jnp.asarray(fc1_bp, f32),
        jnp.asarray(fc2_wp, bf16),
        jnp.asarray(np.asarray(params['fc2_b'], np.float32).reshape(1, NC), f32),
    ]

    plan = dict(G=G, M=M, H0=img_res, W0=img_res, Cimg=Cimg, C0=C0,
                blocks=plan_blocks, Hf=Hf, Wf=Wf, Cf=Cf, NC=NC,
                use_mbstd=use_mbstd)
    return operands, plan


def _build_fused_call(plan, operands):
    G = plan['G']
    R0, L0 = G * plan['H0'], plan['W0'] * plan['Cimg']

    in_specs = [pl.BlockSpec((1, R0, L0), lambda m: (m, 0, 0))]
    in_specs += [pl.BlockSpec(op.shape, lambda m: (0, 0)) for op in operands]
    # TODO(synk): for production-sized fmap_max/img_res on v7x (64 MiB VMEM),
    # single-buffer the constant weight specs (pipeline_mode=pl.Buffered(1))
    # and add a spatial row-tile grid axis over the first blocks.

    op_bytes = sum(int(np.prod(o.shape)) * o.dtype.itemsize for o in operands)
    img_bytes = R0 * L0 * 2
    vmem_limit = int(min(48 << 20, max(16 << 20, 6 * (op_bytes + img_bytes))))

    return pl.pallas_call(
        partial(_fused_disc_kernel, plan=plan),
        out_shape=jax.ShapeDtypeStruct((plan['M'], G, plan['NC']), jnp.float32),
        grid=(plan['M'],),
        in_specs=in_specs,
        out_specs=pl.BlockSpec((1, G, plan['NC']), lambda m: (m, 0, 0)),
        compiler_params=pltpu.CompilerParams(
            dimension_semantics=("parallel",),
            vmem_limit_bytes=vmem_limit),
    )


# ---------------------------------------------------------------------------
# Public forward (NCHW images, PyTorch convention).
# ---------------------------------------------------------------------------
def make_discriminator_forward(params, batch_size):
    operands, plan = _pack_operands(params, batch_size)
    call = _build_fused_call(plan, operands)
    G, M, NC = plan['G'], plan['M'], plan['NC']
    H0, W0, Cimg = plan['H0'], plan['W0'], plan['Cimg']

    def forward(image_nchw, label=None):
        N = image_nchw.shape[0]
        assert N == G * M
        # One fused XLA pass: NCHW -> lane-dense (M, G*H0, W0*Cimg) in bf16,
        # with the mbstd group reorder (sample g*M+m -> group g, slot m) folded
        # into the same transpose.
        x = image_nchw.astype(jnp.bfloat16).reshape(G, M, Cimg, H0, W0)
        x = jnp.transpose(x, (1, 0, 3, 4, 2)).reshape(M, G * H0, W0 * Cimg)
        out = call(x, *operands)                              # (M, G, NC)
        out = jnp.transpose(out, (1, 0, 2)).reshape(N, NC)
        if label is not None:
            # TODO(synk): projection-style label conditioning (one_hot * sum);
            # not exercised since num_classes=0 in this configuration.
            pass
        return out

    return jax.jit(forward)


if __name__ == "__main__":
    key = jax.random.PRNGKey(0)
    kp, kx = jax.random.split(key)

    img_res, img_channels, batch = 16, 3, 8
    params = init_discriminator_params(
        kp, img_res=img_res, img_channels=img_channels, num_classes=0,
        fmap_base=64, fmap_decay=1.0, fmap_min=1, fmap_max=32,
        mbstd_group_size=4, mbstd_num_features=1)

    forward = make_discriminator_forward(params, batch)
    image = jax.random.normal(kx, (batch, img_channels, img_res, img_res),
                              jnp.float32)
    out = jax.block_until_ready(forward(image))
    assert out.shape == (batch, 1) and out.dtype == jnp.float32
    print("KERNEL_OK")
</pallas_src>

<mosaic_0001>
module attributes {stable_mosaic.version = 11 : i64} {
  func.func @_fused_disc_kernel(%arg0: i32, %arg1: memref<1x64x48xbf16, #tpu.memory_space<vmem>>, %arg2: memref<48x128xbf16, #tpu.memory_space<vmem>>, %arg3: memref<1x128xf32, #tpu.memory_space<vmem>>, %arg4: memref<384x256xbf16, #tpu.memory_space<vmem>>, %arg5: memref<1x128xf32, #tpu.memory_space<vmem>>, %arg6: memref<384x128xbf16, #tpu.memory_space<vmem>>, %arg7: memref<1x128xf32, #tpu.memory_space<vmem>>, %arg8: memref<384x256xbf16, #tpu.memory_space<vmem>>, %arg9: memref<1x128xf32, #tpu.memory_space<vmem>>, %arg10: memref<384x128xbf16, #tpu.memory_space<vmem>>, %arg11: memref<1x128xf32, #tpu.memory_space<vmem>>, %arg12: memref<384x128xbf16, #tpu.memory_space<vmem>>, %arg13: memref<1x128xf32, #tpu.memory_space<vmem>>, %arg14: memref<16x128xf32, #tpu.memory_space<vmem>>, %arg15: memref<512x128xbf16, #tpu.memory_space<vmem>>, %arg16: memref<1x128xf32, #tpu.memory_space<vmem>>, %arg17: memref<128x1xbf16, #tpu.memory_space<vmem>>, %arg18: memref<1x1xf32, #tpu.memory_space<vmem>>, %arg19: memref<1x4x1xf32, #tpu.memory_space<vmem>>) attributes {dimension_semantics = [#tpu.dimension_semantics<parallel>], iteration_bounds = array<i64: 2>, scalar_prefetch = 0 : i64, scratch_operands = 0 : i64, tpu.core_type = #tpu.core_type<tc>, window_params = [{transform_indices = @transform_0, window_bounds = array<i64: 1, 64, 48>}, {pipeline_mode = #tpu.pipeline_mode<synchronous>, transform_indices = @transform_1, window_bounds = array<i64: 48, 128>}, {pipeline_mode = #tpu.pipeline_mode<synchronous>, transform_indices = @transform_2, window_bounds = array<i64: 1, 128>}, {pipeline_mode = #tpu.pipeline_mode<synchronous>, transform_indices = @transform_3, window_bounds = array<i64: 384, 256>}, {pipeline_mode = #tpu.pipeline_mode<synchronous>, transform_indices = @transform_4, window_bounds = array<i64: 1, 128>}, {pipeline_mode = #tpu.pipeline_mode<synchronous>, transform_indices = @transform_5, window_bounds = array<i64: 384, 128>}, {pipeline_mode = #tpu.pipeline_mode<synchronous>, transform_indices = @transform_6, window_bounds = array<i64: 1, 128>}, {pipeline_mode = #tpu.pipeline_mode<synchronous>, transform_indices = @transform_7, window_bounds = array<i64: 384, 256>}, {pipeline_mode = #tpu.pipeline_mode<synchronous>, transform_indices = @transform_8, window_bounds = array<i64: 1, 128>}, {pipeline_mode = #tpu.pipeline_mode<synchronous>, transform_indices = @transform_9, window_bounds = array<i64: 384, 128>}, {pipeline_mode = #tpu.pipeline_mode<synchronous>, transform_indices = @transform_10, window_bounds = array<i64: 1, 128>}, {pipeline_mode = #tpu.pipeline_mode<synchronous>, transform_indices = @transform_11, window_bounds = array<i64: 384, 128>}, {pipeline_mode = #tpu.pipeline_mode<synchronous>, transform_indices = @transform_12, window_bounds = array<i64: 1, 128>}, {pipeline_mode = #tpu.pipeline_mode<synchronous>, transform_indices = @transform_13, window_bounds = array<i64: 16, 128>}, {pipeline_mode = #tpu.pipeline_mode<synchronous>, transform_indices = @transform_14, window_bounds = array<i64: 512, 128>}, {pipeline_mode = #tpu.pipeline_mode<synchronous>, transform_indices = @transform_15, window_bounds = array<i64: 1, 128>}, {pipeline_mode = #tpu.pipeline_mode<synchronous>, transform_indices = @transform_16, window_bounds = array<i64: 128, 1>}, {pipeline_mode = #tpu.pipeline_mode<synchronous>, transform_indices = @transform_17, window_bounds = array<i64: 1, 1>}, {transform_indices = @transform_18, window_bounds = array<i64: 1, 4, 1>}]} {
    %c0 = arith.constant 0 : index
    %c0_0 = arith.constant 0 : index
    %c0_1 = arith.constant 0 : index
    %0 = vector.load %arg1[%c0, %c0_0, %c0_1] : memref<1x64x48xbf16, #tpu.memory_space<vmem>>, vector<1x64x48xbf16>
    %1 = vector.shape_cast %0 : vector<1x64x48xbf16> to vector<64x48xbf16>
    %c0_2 = arith.constant 0 : index
    %c0_3 = arith.constant 0 : index
    %2 = vector.load %arg2[%c0_2, %c0_3] : memref<48x128xbf16, #tpu.memory_space<vmem>>, vector<48x128xbf16>
    %cst = arith.constant dense<0.000000e+00> : vector<64x128xf32>
    %3 = tpu.matmul %1, %2, %cst {dimension_numbers = #tpu.dot_dimension_numbers<[1], [0], [0], [1], [0, 0, 1, 1], [], []>} : vector<64x48xbf16>, vector<48x128xbf16>, vector<64x128xf32> -> vector<64x128xf32>
    %c0_4 = arith.constant 0 : index
    %c0_5 = arith.constant 0 : index
    %4 = vector.load %arg3[%c0_4, %c0_5] : memref<1x128xf32, #tpu.memory_space<vmem>>, vector<1x128xf32>
    %5 = vector.broadcast %4 : vector<1x128xf32> to vector<64x128xf32>
    %6 = arith.addf %3, %5 : vector<64x128xf32>
    %cst_6 = arith.constant 0.000000e+00 : f32
    %7 = vector.broadcast %cst_6 : f32 to vector<64x128xf32>
    %8 = arith.cmpf oge, %6, %7 : vector<64x128xf32>
    %cst_7 = arith.constant 2.000000e-01 : f32
    %9 = vector.broadcast %cst_7 : f32 to vector<64x128xf32>
    %10 = arith.mulf %9, %6 : vector<64x128xf32>
    %11 = arith.select %8, %6, %10 : vector<64x128xi1>, vector<64x128xf32>
    %cst_8 = arith.constant 1.41421354 : f32
    %12 = vector.broadcast %cst_8 : f32 to vector<64x128xf32>
    %13 = arith.mulf %11, %12 : vector<64x128xf32>
    %14 = tpu.iota {dimensions = array<i32: 0>} : vector<64x128xi32>
    %c16_i32 = arith.constant 16 : i32
    %c0_i32 = arith.constant 0 : i32
    %15 = arith.cmpi eq, %c16_i32, %c0_i32 : i32
    %c1_i32 = arith.constant 1 : i32
    %16 = arith.select %15, %c1_i32, %c16_i32 : i32
    %17 = vector.broadcast %16 : i32 to vector<64x128xi32>
    %18 = arith.remsi %14, %17 : vector<64x128xi32>
    %c0_i32_9 = arith.constant 0 : i32
    %19 = vector.broadcast %c0_i32_9 : i32 to vector<64x128xi32>
    %20 = arith.cmpi ne, %18, %19 : vector<64x128xi32>
    %c0_i32_10 = arith.constant 0 : i32
    %21 = vector.broadcast %c0_i32_10 : i32 to vector<64x128xi32>
    %22 = arith.cmpi slt, %18, %21 : vector<64x128xi32>
    %c0_i32_11 = arith.constant 0 : i32
    %23 = arith.cmpi slt, %16, %c0_i32_11 : i32
    %24 = vector.broadcast %23 : i1 to vector<64x128xi1>
    %25 = vector.broadcast %24 : vector<64x128xi1> to vector<64x128xi1>
    %26 = arith.xori %22, %25 : vector<64x128xi1>
    %27 = arith.andi %26, %20 : vector<64x128xi1>
    %28 = vector.broadcast %16 : i32 to vector<64x128xi32>
    %29 = arith.addi %18, %28 : vector<64x128xi32>
    %30 = arith.select %27, %29, %18 : vector<64x128xi1>, vector<64x128xi32>
    %c0_i32_12 = arith.constant 0 : i32
    %31 = vector.broadcast %c0_i32_12 : i32 to vector<64x128xi32>
    %32 = arith.cmpi sgt, %30, %31 : vector<64x128xi32>
    %c1_i32_13 = arith.constant 1 : i32
    %33 = tpu.dynamic_rotate %13 by %c1_i32_13 dim 0 : vector<64x128xf32>, i32 -> vector<64x128xf32>
    %cst_14 = arith.constant 0.000000e+00 : f32
    %34 = vector.broadcast %cst_14 : f32 to vector<64x128xf32>
    %35 = arith.select %32, %33, %34 : vector<64x128xi1>, vector<64x128xf32>
    %c15_i32 = arith.constant 15 : i32
    %36 = vector.broadcast %c15_i32 : i32 to vector<64x128xi32>
    %37 = arith.cmpi slt, %30, %36 : vector<64x128xi32>
    %c63_i32 = arith.constant 63 : i32
    %38 = tpu.dynamic_rotate %13 by %c63_i32 dim 0 : vector<64x128xf32>, i32 -> vector<64x128xf32>
    %cst_15 = arith.constant 0.000000e+00 : f32
    %39 = vector.broadcast %cst_15 : f32 to vector<64x128xf32>
    %40 = arith.select %37, %38, %39 : vector<64x128xi1>, vector<64x128xf32>
    %41 = arith.truncf %35 : vector<64x128xf32> to vector<64x128xbf16>
    %42 = arith.truncf %13 : vector<64x128xf32> to vector<64x128xbf16>
    %43 = arith.truncf %40 : vector<64x128xf32> to vector<64x128xbf16>
    %44 = tpu.concatenate %41, %42, %43 in 1 : vector<64x128xbf16>, vector<64x128xbf16>, vector<64x128xbf16> -> vector<64x384xbf16>
    %c0_16 = arith.constant 0 : index
    %c0_17 = arith.constant 0 : index
    %45 = vector.load %arg4[%c0_16, %c0_17] : memref<384x256xbf16, #tpu.memory_space<vmem>>, vector<384x256xbf16>
    %cst_18 = arith.constant dense<0.000000e+00> : vector<64x256xf32>
    %46 = tpu.matmul %44, %45, %cst_18 {dimension_numbers = #tpu.dot_dimension_numbers<[1], [0], [0], [1], [0, 0, 1, 1], [], []>} : vector<64x384xbf16>, vector<384x256xbf16>, vector<64x256xf32> -> vector<64x256xf32>
    %47 = vector.extract_strided_slice %46 {offsets = [0, 0], sizes = [64, 128], strides = [1, 1]} : vector<64x256xf32> to vector<64x128xf32>
    %c0_19 = arith.constant 0 : index
    %c0_20 = arith.constant 0 : index
    %48 = vector.load %arg5[%c0_19, %c0_20] : memref<1x128xf32, #tpu.memory_space<vmem>>, vector<1x128xf32>
    %49 = vector.broadcast %48 : vector<1x128xf32> to vector<64x128xf32>
    %50 = arith.addf %47, %49 : vector<64x128xf32>
    %cst_21 = arith.constant 0.000000e+00 : f32
    %51 = vector.broadcast %cst_21 : f32 to vector<64x128xf32>
    %52 = arith.cmpf oge, %50, %51 : vector<64x128xf32>
    %cst_22 = arith.constant 2.000000e-01 : f32
    %53 = vector.broadcast %cst_22 : f32 to vector<64x128xf32>
    %54 = arith.mulf %53, %50 : vector<64x128xf32>
    %55 = arith.select %52, %50, %54 : vector<64x128xi1>, vector<64x128xf32>
    %cst_23 = arith.constant 1.41421354 : f32
    %56 = vector.broadcast %cst_23 : f32 to vector<64x128xf32>
    %57 = arith.mulf %55, %56 : vector<64x128xf32>
    %58 = vector.extract_strided_slice %46 {offsets = [0, 128], sizes = [64, 128], strides = [1, 1]} : vector<64x256xf32> to vector<64x128xf32>
    %59 = tpu.iota {dimensions = array<i32: 0>} : vector<64x128xi32>
    %c16_i32_24 = arith.constant 16 : i32
    %c0_i32_25 = arith.constant 0 : i32
    %60 = arith.cmpi eq, %c16_i32_24, %c0_i32_25 : i32
    %c1_i32_26 = arith.constant 1 : i32
    %61 = arith.select %60, %c1_i32_26, %c16_i32_24 : i32
    %62 = vector.broadcast %61 : i32 to vector<64x128xi32>
    %63 = arith.remsi %59, %62 : vector<64x128xi32>
    %c0_i32_27 = arith.constant 0 : i32
    %64 = vector.broadcast %c0_i32_27 : i32 to vector<64x128xi32>
    %65 = arith.cmpi ne, %63, %64 : vector<64x128xi32>
    %c0_i32_28 = arith.constant 0 : i32
    %66 = vector.broadcast %c0_i32_28 : i32 to vector<64x128xi32>
    %67 = arith.cmpi slt, %63, %66 : vector<64x128xi32>
    %c0_i32_29 = arith.constant 0 : i32
    %68 = arith.cmpi slt, %61, %c0_i32_29 : i32
    %69 = vector.broadcast %68 : i1 to vector<64x128xi1>
    %70 = vector.broadcast %69 : vector<64x128xi1> to vector<64x128xi1>
    %71 = arith.xori %67, %70 : vector<64x128xi1>
    %72 = arith.andi %71, %65 : vector<64x128xi1>
    %73 = vector.broadcast %61 : i32 to vector<64x128xi32>
    %74 = arith.addi %63, %73 : vector<64x128xi32>
    %75 = arith.select %72, %74, %63 : vector<64x128xi1>, vector<64x128xi32>
    %c0_i32_30 = arith.constant 0 : i32
    %76 = vector.broadcast %c0_i32_30 : i32 to vector<64x128xi32>
    %77 = arith.cmpi sgt, %75, %76 : vector<64x128xi32>
    %c1_i32_31 = arith.constant 1 : i32
    %78 = tpu.dynamic_rotate %57 by %c1_i32_31 dim 0 : vector<64x128xf32>, i32 -> vector<64x128xf32>
    %cst_32 = arith.constant 0.000000e+00 : f32
    %79 = vector.broadcast %cst_32 : f32 to vector<64x128xf32>
    %80 = arith.select %77, %78, %79 : vector<64x128xi1>, vector<64x128xf32>
    %c15_i32_33 = arith.constant 15 : i32
    %81 = vector.broadcast %c15_i32_33 : i32 to vector<64x128xi32>
    %82 = arith.cmpi slt, %75, %81 : vector<64x128xi32>
    %c63_i32_34 = arith.constant 63 : i32
    %83 = tpu.dynamic_rotate %57 by %c63_i32_34 dim 0 : vector<64x128xf32>, i32 -> vector<64x128xf32>
    %cst_35 = arith.constant 0.000000e+00 : f32
    %84 = vector.broadcast %cst_35 : f32 to vector<64x128xf32>
    %85 = arith.select %82, %83, %84 : vector<64x128xi1>, vector<64x128xf32>
    %86 = arith.truncf %80 : vector<64x128xf32> to vector<64x128xbf16>
    %87 = arith.truncf %57 : vector<64x128xf32> to vector<64x128xbf16>
    %88 = arith.truncf %85 : vector<64x128xf32> to vector<64x128xbf16>
    %89 = tpu.concatenate %86, %87, %88 in 1 : vector<64x128xbf16>, vector<64x128xbf16>, vector<64x128xbf16> -> vector<64x384xbf16>
    %c0_36 = arith.constant 0 : index
    %c0_37 = arith.constant 0 : index
    %90 = vector.load %arg6[%c0_36, %c0_37] : memref<384x128xbf16, #tpu.memory_space<vmem>>, vector<384x128xbf16>
    %cst_38 = arith.constant dense<0.000000e+00> : vector<64x128xf32>
    %91 = tpu.matmul %89, %90, %cst_38 {dimension_numbers = #tpu.dot_dimension_numbers<[1], [0], [0], [1], [0, 0, 1, 1], [], []>} : vector<64x384xbf16>, vector<384x128xbf16>, vector<64x128xf32> -> vector<64x128xf32>
    %92 = vector.shape_cast %91 : vector<64x128xf32> to vector<32x256xf32>
    %93 = vector.extract_strided_slice %92 {offsets = [0, 0], sizes = [32, 128], strides = [1, 1]} : vector<32x256xf32> to vector<32x128xf32>
    %94 = vector.extract_strided_slice %92 {offsets = [0, 128], sizes = [32, 128], strides = [1, 1]} : vector<32x256xf32> to vector<32x128xf32>
    %95 = arith.addf %93, %94 : vector<32x128xf32>
    %cst_39 = arith.constant 2.500000e-01 : f32
    %96 = vector.broadcast %cst_39 : f32 to vector<32x128xf32>
    %97 = arith.mulf %95, %96 : vector<32x128xf32>
    %c0_40 = arith.constant 0 : index
    %c0_41 = arith.constant 0 : index
    %98 = vector.load %arg7[%c0_40, %c0_41] : memref<1x128xf32, #tpu.memory_space<vmem>>, vector<1x128xf32>
    %99 = vector.broadcast %98 : vector<1x128xf32> to vector<32x128xf32>
    %100 = arith.addf %97, %99 : vector<32x128xf32>
    %cst_42 = arith.constant 0.000000e+00 : f32
    %101 = vector.broadcast %cst_42 : f32 to vector<32x128xf32>
    %102 = arith.cmpf oge, %100, %101 : vector<32x128xf32>
    %cst_43 = arith.constant 2.000000e-01 : f32
    %103 = vector.broadcast %cst_43 : f32 to vector<32x128xf32>
    %104 = arith.mulf %103, %100 : vector<32x128xf32>
    %105 = arith.select %102, %100, %104 : vector<32x128xi1>, vector<32x128xf32>
    %cst_44 = arith.constant 1.41421354 : f32
    %106 = vector.broadcast %cst_44 : f32 to vector<32x128xf32>
    %107 = arith.mulf %105, %106 : vector<32x128xf32>
    %108 = vector.shape_cast %58 : vector<64x128xf32> to vector<32x256xf32>
    %109 = vector.extract_strided_slice %108 {offsets = [0, 0], sizes = [32, 128], strides = [1, 1]} : vector<32x256xf32> to vector<32x128xf32>
    %110 = vector.extract_strided_slice %108 {offsets = [0, 128], sizes = [32, 128], strides = [1, 1]} : vector<32x256xf32> to vector<32x128xf32>
    %111 = arith.addf %109, %110 : vector<32x128xf32>
    %cst_45 = arith.constant 2.500000e-01 : f32
    %112 = vector.broadcast %cst_45 : f32 to vector<32x128xf32>
    %113 = arith.mulf %111, %112 : vector<32x128xf32>
    %114 = arith.addf %107, %113 : vector<32x128xf32>
    %cst_46 = arith.constant 0.707106769 : f32
    %115 = vector.broadcast %cst_46 : f32 to vector<32x128xf32>
    %116 = arith.mulf %114, %115 : vector<32x128xf32>
    %117 = tpu.iota {dimensions = array<i32: 0>} : vector<32x128xi32>
    %c8_i32 = arith.constant 8 : i32
    %c0_i32_47 = arith.constant 0 : i32
    %118 = arith.cmpi eq, %c8_i32, %c0_i32_47 : i32
    %c1_i32_48 = arith.constant 1 : i32
    %119 = arith.select %118, %c1_i32_48, %c8_i32 : i32
    %120 = vector.broadcast %119 : i32 to vector<32x128xi32>
    %121 = arith.remsi %117, %120 : vector<32x128xi32>
    %c0_i32_49 = arith.constant 0 : i32
    %122 = vector.broadcast %c0_i32_49 : i32 to vector<32x128xi32>
    %123 = arith.cmpi ne, %121, %122 : vector<32x128xi32>
    %c0_i32_50 = arith.constant 0 : i32
    %124 = vector.broadcast %c0_i32_50 : i32 to vector<32x128xi32>
    %125 = arith.cmpi slt, %121, %124 : vector<32x128xi32>
    %c0_i32_51 = arith.constant 0 : i32
    %126 = arith.cmpi slt, %119, %c0_i32_51 : i32
    %127 = vector.broadcast %126 : i1 to vector<32x128xi1>
    %128 = vector.broadcast %127 : vector<32x128xi1> to vector<32x128xi1>
    %129 = arith.xori %125, %128 : vector<32x128xi1>
    %130 = arith.andi %129, %123 : vector<32x128xi1>
    %131 = vector.broadcast %119 : i32 to vector<32x128xi32>
    %132 = arith.addi %121, %131 : vector<32x128xi32>
    %133 = arith.select %130, %132, %121 : vector<32x128xi1>, vector<32x128xi32>
    %c0_i32_52 = arith.constant 0 : i32
    %134 = vector.broadcast %c0_i32_52 : i32 to vector<32x128xi32>
    %135 = arith.cmpi sgt, %133, %134 : vector<32x128xi32>
    %c1_i32_53 = arith.constant 1 : i32
    %136 = tpu.dynamic_rotate %116 by %c1_i32_53 dim 0 : vector<32x128xf32>, i32 -> vector<32x128xf32>
    %cst_54 = arith.constant 0.000000e+00 : f32
    %137 = vector.broadcast %cst_54 : f32 to vector<32x128xf32>
    %138 = arith.select %135, %136, %137 : vector<32x128xi1>, vector<32x128xf32>
    %c7_i32 = arith.constant 7 : i32
    %139 = vector.broadcast %c7_i32 : i32 to vector<32x128xi32>
    %140 = arith.cmpi slt, %133, %139 : vector<32x128xi32>
    %c31_i32 = arith.constant 31 : i32
    %141 = tpu.dynamic_rotate %116 by %c31_i32 dim 0 : vector<32x128xf32>, i32 -> vector<32x128xf32>
    %cst_55 = arith.constant 0.000000e+00 : f32
    %142 = vector.broadcast %cst_55 : f32 to vector<32x128xf32>
    %143 = arith.select %140, %141, %142 : vector<32x128xi1>, vector<32x128xf32>
    %144 = arith.truncf %138 : vector<32x128xf32> to vector<32x128xbf16>
    %145 = arith.truncf %116 : vector<32x128xf32> to vector<32x128xbf16>
    %146 = arith.truncf %143 : vector<32x128xf32> to vector<32x128xbf16>
    %147 = tpu.concatenate %144, %145, %146 in 1 : vector<32x128xbf16>, vector<32x128xbf16>, vector<32x128xbf16> -> vector<32x384xbf16>
    %c0_56 = arith.constant 0 : index
    %c0_57 = arith.constant 0 : index
    %148 = vector.load %arg8[%c0_56, %c0_57] : memref<384x256xbf16, #tpu.memory_space<vmem>>, vector<384x256xbf16>
    %cst_58 = arith.constant dense<0.000000e+00> : vector<32x256xf32>
    %149 = tpu.matmul %147, %148, %cst_58 {dimension_numbers = #tpu.dot_dimension_numbers<[1], [0], [0], [1], [0, 0, 1, 1], [], []>} : vector<32x384xbf16>, vector<384x256xbf16>, vector<32x256xf32> -> vector<32x256xf32>
    %150 = vector.extract_strided_slice %149 {offsets = [0, 0], sizes = [32, 128], strides = [1, 1]} : vector<32x256xf32> to vector<32x128xf32>
    %c0_59 = arith.constant 0 : index
    %c0_60 = arith.constant 0 : index
    %151 = vector.load %arg9[%c0_59, %c0_60] : memref<1x128xf32, #tpu.memory_space<vmem>>, vector<1x128xf32>
    %152 = vector.broadcast %151 : vector<1x128xf32> to vector<32x128xf32>
    %153 = arith.addf %150, %152 : vector<32x128xf32>
    %cst_61 = arith.constant 0.000000e+00 : f32
    %154 = vector.broadcast %cst_61 : f32 to vector<32x128xf32>
    %155 = arith.cmpf oge, %153, %154 : vector<32x128xf32>
    %cst_62 = arith.constant 2.000000e-01 : f32
    %156 = vector.broadcast %cst_62 : f32 to vector<32x128xf32>
    %157 = arith.mulf %156, %153 : vector<32x128xf32>
    %158 = arith.select %155, %153, %157 : vector<32x128xi1>, vector<32x128xf32>
    %cst_63 = arith.constant 1.41421354 : f32
    %159 = vector.broadcast %cst_63 : f32 to vector<32x128xf32>
    %160 = arith.mulf %158, %159 : vector<32x128xf32>
    %161 = vector.extract_strided_slice %149 {offsets = [0, 128], sizes = [32, 128], strides = [1, 1]} : vector<32x256xf32> to vector<32x128xf32>
    %162 = tpu.iota {dimensions = array<i32: 0>} : vector<32x128xi32>
    %c8_i32_64 = arith.constant 8 : i32
    %c0_i32_65 = arith.constant 0 : i32
    %163 = arith.cmpi eq, %c8_i32_64, %c0_i32_65 : i32
    %c1_i32_66 = arith.constant 1 : i32
    %164 = arith.select %163, %c1_i32_66, %c8_i32_64 : i32
    %165 = vector.broadcast %164 : i32 to vector<32x128xi32>
    %166 = arith.remsi %162, %165 : vector<32x128xi32>
    %c0_i32_67 = arith.constant 0 : i32
    %167 = vector.broadcast %c0_i32_67 : i32 to vector<32x128xi32>
    %168 = arith.cmpi ne, %166, %167 : vector<32x128xi32>
    %c0_i32_68 = arith.constant 0 : i32
    %169 = vector.broadcast %c0_i32_68 : i32 to vector<32x128xi32>
    %170 = arith.cmpi slt, %166, %169 : vector<32x128xi32>
    %c0_i32_69 = arith.constant 0 : i32
    %171 = arith.cmpi slt, %164, %c0_i32_69 : i32
    %172 = vector.broadcast %171 : i1 to vector<32x128xi1>
    %173 = vector.broadcast %172 : vector<32x128xi1> to vector<32x128xi1>
    %174 = arith.xori %170, %173 : vector<32x128xi1>
    %175 = arith.andi %174, %168 : vector<32x128xi1>
    %176 = vector.broadcast %164 : i32 to vector<32x128xi32>
    %177 = arith.addi %166, %176 : vector<32x128xi32>
    %178 = arith.select %175, %177, %166 : vector<32x128xi1>, vector<32x128xi32>
    %c0_i32_70 = arith.constant 0 : i32
    %179 = vector.broadcast %c0_i32_70 : i32 to vector<32x128xi32>
    %180 = arith.cmpi sgt, %178, %179 : vector<32x128xi32>
    %c1_i32_71 = arith.constant 1 : i32
    %181 = tpu.dynamic_rotate %160 by %c1_i32_71 dim 0 : vector<32x128xf32>, i32 -> vector<32x128xf32>
    %cst_72 = arith.constant 0.000000e+00 : f32
    %182 = vector.broadcast %cst_72 : f32 to vector<32x128xf32>
    %183 = arith.select %180, %181, %182 : vector<32x128xi1>, vector<32x128xf32>
    %c7_i32_73 = arith.constant 7 : i32
    %184 = vector.broadcast %c7_i32_73 : i32 to vector<32x128xi32>
    %185 = arith.cmpi slt, %178, %184 : vector<32x128xi32>
    %c31_i32_74 = arith.constant 31 : i32
    %186 = tpu.dynamic_rotate %160 by %c31_i32_74 dim 0 : vector<32x128xf32>, i32 -> vector<32x128xf32>
    %cst_75 = arith.constant 0.000000e+00 : f32
    %187 = vector.broadcast %cst_75 : f32 to vector<32x128xf32>
    %188 = arith.select %185, %186, %187 : vector<32x128xi1>, vector<32x128xf32>
    %189 = arith.truncf %183 : vector<32x128xf32> to vector<32x128xbf16>
    %190 = arith.truncf %160 : vector<32x128xf32> to vector<32x128xbf16>
    %191 = arith.truncf %188 : vector<32x128xf32> to vector<32x128xbf16>
    %192 = tpu.concatenate %189, %190, %191 in 1 : vector<32x128xbf16>, vector<32x128xbf16>, vector<32x128xbf16> -> vector<32x384xbf16>
    %c0_76 = arith.constant 0 : index
    %c0_77 = arith.constant 0 : index
    %193 = vector.load %arg10[%c0_76, %c0_77] : memref<384x128xbf16, #tpu.memory_space<vmem>>, vector<384x128xbf16>
    %cst_78 = arith.constant dense<0.000000e+00> : vector<32x128xf32>
    %194 = tpu.matmul %192, %193, %cst_78 {dimension_numbers = #tpu.dot_dimension_numbers<[1], [0], [0], [1], [0, 0, 1, 1], [], []>} : vector<32x384xbf16>, vector<384x128xbf16>, vector<32x128xf32> -> vector<32x128xf32>
    %195 = vector.shape_cast %194 : vector<32x128xf32> to vector<16x256xf32>
    %196 = vector.extract_strided_slice %195 {offsets = [0, 0], sizes = [16, 128], strides = [1, 1]} : vector<16x256xf32> to vector<16x128xf32>
    %197 = vector.extract_strided_slice %195 {offsets = [0, 128], sizes = [16, 128], strides = [1, 1]} : vector<16x256xf32> to vector<16x128xf32>
    %198 = arith.addf %196, %197 : vector<16x128xf32>
    %cst_79 = arith.constant 2.500000e-01 : f32
    %199 = vector.broadcast %cst_79 : f32 to vector<16x128xf32>
    %200 = arith.mulf %198, %199 : vector<16x128xf32>
    %c0_80 = arith.constant 0 : index
    %c0_81 = arith.constant 0 : index
    %201 = vector.load %arg11[%c0_80, %c0_81] : memref<1x128xf32, #tpu.memory_space<vmem>>, vector<1x128xf32>
    %202 = vector.broadcast %201 : vector<1x128xf32> to vector<16x128xf32>
    %203 = arith.addf %200, %202 : vector<16x128xf32>
    %cst_82 = arith.constant 0.000000e+00 : f32
    %204 = vector.broadcast %cst_82 : f32 to vector<16x128xf32>
    %205 = arith.cmpf oge, %203, %204 : vector<16x128xf32>
    %cst_83 = arith.constant 2.000000e-01 : f32
    %206 = vector.broadcast %cst_83 : f32 to vector<16x128xf32>
    %207 = arith.mulf %206, %203 : vector<16x128xf32>
    %208 = arith.select %205, %203, %207 : vector<16x128xi1>, vector<16x128xf32>
    %cst_84 = arith.constant 1.41421354 : f32
    %209 = vector.broadcast %cst_84 : f32 to vector<16x128xf32>
    %210 = arith.mulf %208, %209 : vector<16x128xf32>
    %211 = vector.shape_cast %161 : vector<32x128xf32> to vector<16x256xf32>
    %212 = vector.extract_strided_slice %211 {offsets = [0, 0], sizes = [16, 128], strides = [1, 1]} : vector<16x256xf32> to vector<16x128xf32>
    %213 = vector.extract_strided_slice %211 {offsets = [0, 128], sizes = [16, 128], strides = [1, 1]} : vector<16x256xf32> to vector<16x128xf32>
    %214 = arith.addf %212, %213 : vector<16x128xf32>
    %cst_85 = arith.constant 2.500000e-01 : f32
    %215 = vector.broadcast %cst_85 : f32 to vector<16x128xf32>
    %216 = arith.mulf %214, %215 : vector<16x128xf32>
    %217 = arith.addf %210, %216 : vector<16x128xf32>
    %cst_86 = arith.constant 0.707106769 : f32
    %218 = vector.broadcast %cst_86 : f32 to vector<16x128xf32>
    %219 = arith.mulf %217, %218 : vector<16x128xf32>
    %220 = vector.shape_cast %219 : vector<16x128xf32> to vector<4x512xf32>
    %cst_87 = arith.constant dense<0.000000e+00> : vector<512xf32>
    %221 = vector.multi_reduction <add>, %220, %cst_87 [0] : vector<4x512xf32> to vector<512xf32>
    %222 = vector.shape_cast %221 : vector<512xf32> to vector<1x512xf32>
    %cst_88 = arith.constant 4.000000e+00 : f32
    %223 = vector.broadcast %cst_88 : f32 to vector<1x512xf32>
    %224 = arith.divf %222, %223 : vector<1x512xf32>
    %225 = vector.broadcast %224 : vector<1x512xf32> to vector<4x512xf32>
    %226 = arith.subf %220, %225 : vector<4x512xf32>
    %227 = arith.mulf %226, %226 : vector<4x512xf32>
    %cst_89 = arith.constant dense<0.000000e+00> : vector<512xf32>
    %228 = vector.multi_reduction <add>, %227, %cst_89 [0] : vector<4x512xf32> to vector<512xf32>
    %229 = vector.shape_cast %228 : vector<512xf32> to vector<1x512xf32>
    %cst_90 = arith.constant 4.000000e+00 : f32
    %230 = vector.broadcast %cst_90 : f32 to vector<1x512xf32>
    %231 = arith.divf %229, %230 : vector<1x512xf32>
    %cst_91 = arith.constant 9.99999993E-9 : f32
    %232 = vector.broadcast %cst_91 : f32 to vector<1x512xf32>
    %233 = arith.addf %231, %232 : vector<1x512xf32>
    %234 = math.sqrt %233 : vector<1x512xf32>
    %cst_92 = arith.constant dense<0.000000e+00> : vector<1xf32>
    %235 = vector.multi_reduction <add>, %234, %cst_92 [1] : vector<1x512xf32> to vector<1xf32>
    %236 = vector.shape_cast %235 : vector<1xf32> to vector<1x1xf32>
    %cst_93 = arith.constant 5.120000e+02 : f32
    %237 = vector.broadcast %cst_93 : f32 to vector<1x1xf32>
    %238 = arith.divf %236, %237 : vector<1x1xf32>
    %239 = tpu.iota {dimensions = array<i32: 0>} : vector<16x128xi32>
    %c4_i32 = arith.constant 4 : i32
    %c0_i32_94 = arith.constant 0 : i32
    %240 = arith.cmpi eq, %c4_i32, %c0_i32_94 : i32
    %c1_i32_95 = arith.constant 1 : i32
    %241 = arith.select %240, %c1_i32_95, %c4_i32 : i32
    %242 = vector.broadcast %241 : i32 to vector<16x128xi32>
    %243 = arith.remsi %239, %242 : vector<16x128xi32>
    %c0_i32_96 = arith.constant 0 : i32
    %244 = vector.broadcast %c0_i32_96 : i32 to vector<16x128xi32>
    %245 = arith.cmpi ne, %243, %244 : vector<16x128xi32>
    %c0_i32_97 = arith.constant 0 : i32
    %246 = vector.broadcast %c0_i32_97 : i32 to vector<16x128xi32>
    %247 = arith.cmpi slt, %243, %246 : vector<16x128xi32>
    %c0_i32_98 = arith.constant 0 : i32
    %248 = arith.cmpi slt, %241, %c0_i32_98 : i32
    %249 = vector.broadcast %248 : i1 to vector<16x128xi1>
    %250 = vector.broadcast %249 : vector<16x128xi1> to vector<16x128xi1>
    %251 = arith.xori %247, %250 : vector<16x128xi1>
    %252 = arith.andi %251, %245 : vector<16x128xi1>
    %253 = vector.broadcast %241 : i32 to vector<16x128xi32>
    %254 = arith.addi %243, %253 : vector<16x128xi32>
    %255 = arith.select %252, %254, %243 : vector<16x128xi1>, vector<16x128xi32>
    %c0_i32_99 = arith.constant 0 : i32
    %256 = vector.broadcast %c0_i32_99 : i32 to vector<16x128xi32>
    %257 = arith.cmpi sgt, %255, %256 : vector<16x128xi32>
    %c1_i32_100 = arith.constant 1 : i32
    %258 = tpu.dynamic_rotate %219 by %c1_i32_100 dim 0 : vector<16x128xf32>, i32 -> vector<16x128xf32>
    %cst_101 = arith.constant 0.000000e+00 : f32
    %259 = vector.broadcast %cst_101 : f32 to vector<16x128xf32>
    %260 = arith.select %257, %258, %259 : vector<16x128xi1>, vector<16x128xf32>
    %c3_i32 = arith.constant 3 : i32
    %261 = vector.broadcast %c3_i32 : i32 to vector<16x128xi32>
    %262 = arith.cmpi slt, %255, %261 : vector<16x128xi32>
    %c15_i32_102 = arith.constant 15 : i32
    %263 = tpu.dynamic_rotate %219 by %c15_i32_102 dim 0 : vector<16x128xf32>, i32 -> vector<16x128xf32>
    %cst_103 = arith.constant 0.000000e+00 : f32
    %264 = vector.broadcast %cst_103 : f32 to vector<16x128xf32>
    %265 = arith.select %262, %263, %264 : vector<16x128xi1>, vector<16x128xf32>
    %266 = arith.truncf %260 : vector<16x128xf32> to vector<16x128xbf16>
    %267 = arith.truncf %219 : vector<16x128xf32> to vector<16x128xbf16>
    %268 = arith.truncf %265 : vector<16x128xf32> to vector<16x128xbf16>
    %269 = tpu.concatenate %266, %267, %268 in 1 : vector<16x128xbf16>, vector<16x128xbf16>, vector<16x128xbf16> -> vector<16x384xbf16>
    %c0_104 = arith.constant 0 : index
    %c0_105 = arith.constant 0 : index
    %270 = vector.load %arg12[%c0_104, %c0_105] : memref<384x128xbf16, #tpu.memory_space<vmem>>, vector<384x128xbf16>
    %cst_106 = arith.constant dense<0.000000e+00> : vector<16x128xf32>
    %271 = tpu.matmul %269, %270, %cst_106 {dimension_numbers = #tpu.dot_dimension_numbers<[1], [0], [0], [1], [0, 0, 1, 1], [], []>} : vector<16x384xbf16>, vector<384x128xbf16>, vector<16x128xf32> -> vector<16x128xf32>
    %c0_107 = arith.constant 0 : index
    %c0_108 = arith.constant 0 : index
    %272 = vector.load %arg13[%c0_107, %c0_108] : memref<1x128xf32, #tpu.memory_space<vmem>>, vector<1x128xf32>
    %273 = vector.broadcast %272 : vector<1x128xf32> to vector<16x128xf32>
    %274 = arith.addf %271, %273 : vector<16x128xf32>
    %c0_109 = arith.constant 0 : index
    %c0_110 = arith.constant 0 : index
    %275 = vector.load %arg14[%c0_109, %c0_110] : memref<16x128xf32, #tpu.memory_space<vmem>>, vector<16x128xf32>
    %276 = vector.broadcast %238 : vector<1x1xf32> to vector<16x128xf32>
    %277 = arith.mulf %276, %275 : vector<16x128xf32>
    %278 = arith.addf %274, %277 : vector<16x128xf32>
    %cst_111 = arith.constant 0.000000e+00 : f32
    %279 = vector.broadcast %cst_111 : f32 to vector<16x128xf32>
    %280 = arith.cmpf oge, %278, %279 : vector<16x128xf32>
    %cst_112 = arith.constant 2.000000e-01 : f32
    %281 = vector.broadcast %cst_112 : f32 to vector<16x128xf32>
    %282 = arith.mulf %281, %278 : vector<16x128xf32>
    %283 = arith.select %280, %278, %282 : vector<16x128xi1>, vector<16x128xf32>
    %cst_113 = arith.constant 1.41421354 : f32
    %284 = vector.broadcast %cst_113 : f32 to vector<16x128xf32>
    %285 = arith.mulf %283, %284 : vector<16x128xf32>
    %286 = vector.shape_cast %285 : vector<16x128xf32> to vector<4x512xf32>
    %287 = arith.truncf %286 : vector<4x512xf32> to vector<4x512xbf16>
    %c0_114 = arith.constant 0 : index
    %c0_115 = arith.constant 0 : index
    %288 = vector.load %arg15[%c0_114, %c0_115] : memref<512x128xbf16, #tpu.memory_space<vmem>>, vector<512x128xbf16>
    %cst_116 = arith.constant dense<0.000000e+00> : vector<4x128xf32>
    %289 = tpu.matmul %287, %288, %cst_116 {dimension_numbers = #tpu.dot_dimension_numbers<[1], [0], [0], [1], [0, 0, 1, 1], [], []>} : vector<4x512xbf16>, vector<512x128xbf16>, vector<4x128xf32> -> vector<4x128xf32>
    %c0_117 = arith.constant 0 : index
    %c0_118 = arith.constant 0 : index
    %290 = vector.load %arg16[%c0_117, %c0_118] : memref<1x128xf32, #tpu.memory_space<vmem>>, vector<1x128xf32>
    %291 = vector.broadcast %290 : vector<1x128xf32> to vector<4x128xf32>
    %292 = arith.addf %289, %291 : vector<4x128xf32>
    %cst_119 = arith.constant 0.000000e+00 : f32
    %293 = vector.broadcast %cst_119 : f32 to vector<4x128xf32>
    %294 = arith.cmpf oge, %292, %293 : vector<4x128xf32>
    %cst_120 = arith.constant 2.000000e-01 : f32
    %295 = vector.broadcast %cst_120 : f32 to vector<4x128xf32>
    %296 = arith.mulf %295, %292 : vector<4x128xf32>
    %297 = arith.select %294, %292, %296 : vector<4x128xi1>, vector<4x128xf32>
    %cst_121 = arith.constant 1.41421354 : f32
    %298 = vector.broadcast %cst_121 : f32 to vector<4x128xf32>
    %299 = arith.mulf %297, %298 : vector<4x128xf32>
    %300 = arith.truncf %299 : vector<4x128xf32> to vector<4x128xbf16>
    %c0_122 = arith.constant 0 : index
    %c0_123 = arith.constant 0 : index
    %301 = vector.load %arg17[%c0_122, %c0_123] : memref<128x1xbf16, #tpu.memory_space<vmem>>, vector<128x1xbf16>
    %cst_124 = arith.constant dense<0.000000e+00> : vector<4x1xf32>
    %302 = tpu.matmul %300, %301, %cst_124 {dimension_numbers = #tpu.dot_dimension_numbers<[1], [0], [0], [1], [0, 0, 1, 1], [], []>} : vector<4x128xbf16>, vector<128x1xbf16>, vector<4x1xf32> -> vector<4x1xf32>
    %c0_125 = arith.constant 0 : index
    %c0_126 = arith.constant 0 : index
    %303 = vector.load %arg18[%c0_125, %c0_126] : memref<1x1xf32, #tpu.memory_space<vmem>>, vector<1x1xf32>
    %304 = vector.broadcast %303 : vector<1x1xf32> to vector<4x1xf32>
    %305 = arith.addf %302, %304 : vector<4x1xf32>
    %306 = vector.shape_cast %305 : vector<4x1xf32> to vector<1x4x1xf32>
    %c0_127 = arith.constant 0 : index
    %c0_128 = arith.constant 0 : index
    %c0_129 = arith.constant 0 : index
    %307 = vector.load %arg19[%c0_127, %c0_128, %c0_129] : memref<1x4x1xf32, #tpu.memory_space<vmem>>, vector<1x4x1xf32>
    tpu.vector_store %arg19[%c0_127, %c0_128, %c0_129], %306 {strides = array<i32>} : memref<1x4x1xf32, #tpu.memory_space<vmem>>, vector<1x4x1xf32>,
    return
  }
  func.func @transform_0(%arg0: i32) -> (i32, i32, i32) {
    %c0_i32 = arith.constant 0 : i32
    %c0_i32_0 = arith.constant 0 : i32
    %c0_i32_1 = arith.constant 0 : i32
    return %arg0, %c0_i32, %c0_i32_0 : i32, i32, i32
  }
  func.func @transform_1(%arg0: i32) -> (i32, i32) {
    %c0_i32 = arith.constant 0 : i32
    %c0_i32_0 = arith.constant 0 : i32
    %c0_i32_1 = arith.constant 0 : i32
    return %c0_i32, %c0_i32_0 : i32, i32
  }
  func.func @transform_2(%arg0: i32) -> (i32, i32) {
    %c0_i32 = arith.constant 0 : i32
    %c0_i32_0 = arith.constant 0 : i32
    %c0_i32_1 = arith.constant 0 : i32
    return %c0_i32, %c0_i32_0 : i32, i32
  }
  func.func @transform_3(%arg0: i32) -> (i32, i32) {
    %c0_i32 = arith.constant 0 : i32
    %c0_i32_0 = arith.constant 0 : i32
    %c0_i32_1 = arith.constant 0 : i32
    return %c0_i32, %c0_i32_0 : i32, i32
  }
  func.func @transform_4(%arg0: i32) -> (i32, i32) {
    %c0_i32 = arith.constant 0 : i32
    %c0_i32_0 = arith.constant 0 : i32
    %c0_i32_1 = arith.constant 0 : i32
    return %c0_i32, %c0_i32_0 : i32, i32
  }
  func.func @transform_5(%arg0: i32) -> (i32, i32) {
    %c0_i32 = arith.constant 0 : i32
    %c0_i32_0 = arith.constant 0 : i32
    %c0_i32_1 = arith.constant 0 : i32
    return %c0_i32, %c0_i32_0 : i32, i32
  }
  func.func @transform_6(%arg0: i32) -> (i32, i32) {
    %c0_i32 = arith.constant 0 : i32
    %c0_i32_0 = arith.constant 0 : i32
    %c0_i32_1 = arith.constant 0 : i32
    return %c0_i32, %c0_i32_0 : i32, i32
  }
  func.func @transform_7(%arg0: i32) -> (i32, i32) {
    %c0_i32 = arith.constant 0 : i32
    %c0_i32_0 = arith.constant 0 : i32
    %c0_i32_1 = arith.constant 0 : i32
    return %c0_i32, %c0_i32_0 : i32, i32
  }
  func.func @transform_8(%arg0: i32) -> (i32, i32) {
    %c0_i32 = arith.constant 0 : i32
    %c0_i32_0 = arith.constant 0 : i32
    %c0_i32_1 = arith.constant 0 : i32
    return %c0_i32, %c0_i32_0 : i32, i32
  }
  func.func @transform_9(%arg0: i32) -> (i32, i32) {
    %c0_i32 = arith.constant 0 : i32
    %c0_i32_0 = arith.constant 0 : i32
    %c0_i32_1 = arith.constant 0 : i32
    return %c0_i32, %c0_i32_0 : i32, i32
  }
  func.func @transform_10(%arg0: i32) -> (i32, i32) {
    %c0_i32 = arith.constant 0 : i32
    %c0_i32_0 = arith.constant 0 : i32
    %c0_i32_1 = arith.constant 0 : i32
    return %c0_i32, %c0_i32_0 : i32, i32
  }
  func.func @transform_11(%arg0: i32) -> (i32, i32) {
    %c0_i32 = arith.constant 0 : i32
    %c0_i32_0 = arith.constant 0 : i32
    %c0_i32_1 = arith.constant 0 : i32
    return %c0_i32, %c0_i32_0 : i32, i32
  }
  func.func @transform_12(%arg0: i32) -> (i32, i32) {
    %c0_i32 = arith.constant 0 : i32
    %c0_i32_0 = arith.constant 0 : i32
    %c0_i32_1 = arith.constant 0 : i32
    return %c0_i32, %c0_i32_0 : i32, i32
  }
  func.func @transform_13(%arg0: i32) -> (i32, i32) {
    %c0_i32 = arith.constant 0 : i32
    %c0_i32_0 = arith.constant 0 : i32
    %c0_i32_1 = arith.constant 0 : i32
    return %c0_i32, %c0_i32_0 : i32, i32
  }
  func.func @transform_14(%arg0: i32) -> (i32, i32) {
    %c0_i32 = arith.constant 0 : i32
    %c0_i32_0 = arith.constant 0 : i32
    %c0_i32_1 = arith.constant 0 : i32
    return %c0_i32, %c0_i32_0 : i32, i32
  }
  func.func @transform_15(%arg0: i32) -> (i32, i32) {
    %c0_i32 = arith.constant 0 : i32
    %c0_i32_0 = arith.constant 0 : i32
    %c0_i32_1 = arith.constant 0 : i32
    return %c0_i32, %c0_i32_0 : i32, i32
  }
  func.func @transform_16(%arg0: i32) -> (i32, i32) {
    %c0_i32 = arith.constant 0 : i32
    %c0_i32_0 = arith.constant 0 : i32
    %c0_i32_1 = arith.constant 0 : i32
    return %c0_i32, %c0_i32_0 : i32, i32
  }
  func.func @transform_17(%arg0: i32) -> (i32, i32) {
    %c0_i32 = arith.constant 0 : i32
    %c0_i32_0 = arith.constant 0 : i32
    %c0_i32_1 = arith.constant 0 : i32
    return %c0_i32, %c0_i32_0 : i32, i32
  }
  func.func @transform_18(%arg0: i32) -> (i32, i32, i32) {
    %c0_i32 = arith.constant 0 : i32
    %c0_i32_0 = arith.constant 0 : i32
    %c0_i32_1 = arith.constant 0 : i32
    return %arg0, %c0_i32, %c0_i32_0 : i32, i32, i32
  }
}

</mosaic_0001>

<bundles_post_ra>
// kernel: forward.1
= control target key start
LH: loop header
LB: loop body
LE: loop exit
PB: predicated region body
PF: predicated region fallthrough
CT: control target
= control target key end

     0   :  { %s6379_s0 = inlined_call_operand.vmem [shape: bf16[2,64,48], index: 0, kind: input, shape index: {}]   ;;  %s6380_s1 = inlined_call_operand.vmem [shape: bf16[48,128], index: 1, kind: input, shape index: {}]   ;;  %s6381_s2 = inlined_call_operand.vmem [shape: f32[1,128], index: 2, kind: input, shape index: {}]   ;;  %s6382_s3 = inlined_call_operand.vmem [shape: bf16[384,256], index: 3, kind: input, shape index: {}]   ;;  %s6383_s4 = inlined_call_operand.vmem [shape: f32[1,128], index: 4, kind: input, shape index: {}]   ;;  %s6384_s5 = inlined_call_operand.hbm [shape: bf16[384,128], index: 5, kind: input, shape index: {}]   ;;  %s6385_s6 = inlined_call_operand.vmem [shape: f32[1,128], index: 6, kind: input, shape index: {}]   ;;  %s6386_s7 = inlined_call_operand.vmem [shape: bf16[384,256], index: 7, kind: input, shape index: {}]   ;;  %s6387_s8 = inlined_call_operand.vmem [shape: f32[1,128], index: 8, kind: input, shape index: {}]   ;;  %s6388_s9 = inlined_call_operand.hbm [shape: bf16[384,128], index: 9, kind: input, shape index: {}]   ;;  %s6389_s10 = inlined_call_operand.vmem [shape: f32[1,128], index: 10, kind: input, shape index: {}]   ;;  %s6390_s11 = inlined_call_operand.vmem [shape: bf16[384,128], index: 11, kind: input, shape index: {}]   ;;  %s6391_s12 = inlined_call_operand.vmem [shape: f32[1,128], index: 12, kind: input, shape index: {}]   ;;  %s6392_s13 = inlined_call_operand.vmem [shape: f32[16,128], index: 13, kind: input, shape index: {}]   ;;  %s6393_s14 = inlined_call_operand.vmem [shape: bf16[512,128], index: 14, kind: input, shape index: {}]   ;;  %s6394_s15 = inlined_call_operand.vmem [shape: f32[1,128], index: 15, kind: input, shape index: {}]   ;;  %s6395_s16 = inlined_call_operand.vmem [shape: bf16[128,1], index: 16, kind: input, shape index: {}]   ;;  %s6396_s17 = inlined_call_operand.<no memory space> [shape: f32[1,1], index: 17, kind: input, shape index: {}]   ;;  %s6397_s18 = inlined_call_operand.vmem [shape: f32[2,4,1], index: 18, kind: output, shape index: {}]  }
   0x1   :  { %6401 = sst [smem:[#allocation9_spill]] %s6379_s0  ;;  %v23_v0 = vstv %s6396_s17 }
   0x2   :  { %6402 = sst [smem:[#allocation10_spill]] %s6380_s1  ;;  %24 = vst [vmem:[#allocation2] sm:$0x1] %v23_v0 }
   0x3   :  { %6403 = sst [smem:[#allocation11_spill]] %s6381_s2 }
   0x4   :  { %25 = vsyncpa [#allocation4], 0 }
   0x5   :  { %26 = vsyncpa [#allocation6], 0  ;;  %s5259_s29 = smov 0  }
   0x6 LB: > { %s5265_s30 = sadd.s32 4294967295, %s5148_s29   ;;  %p4176_p0 = scmp.ge.s32.totalorder %s5148_s29, 1  ;;  %s5148_s29 = sphi %s5259_s29, %s32_s29  }
   0x7   : > { %p446_p1 = scmp.lt.s32.totalorder %s5148_s29, 3  ;;  %s5150_s17 = smov [#allocation3]  }
   0x8   : > { %s470_s0 = sshll.u32 %s5150_s17, 4  ;;  %p4788_p3 = scmp.eq.s32.totalorder %s5265_s30, 0  ;;  %s471_s0 = int_to_ptr.vmem [resolvable:$true] %s470_s0 }
   0x9   : > { %p5269_p2 = pnand %p4176_p0, %p446_p1  ;;  %s5151_s1 = smov [#allocation5]  }
   0xa   : > { %s492_s20 = sshll.u32 %s5151_s1, 4  ;;  %s5093_s22 = scalar_lea.vmem %s471_s0, 3072  ;;  %s493_s20 = int_to_ptr.vmem [resolvable:$true] %s492_s20 }
   0xb   : > { %p4781_p4 = pneg %p5269_p2  ;;  %p5094_p7 = scmp.ne.s32.totalorder %s471_s0, %s5093_s22 }
   0xc   : > { %p5101_p10 = scmp.lt.s32.totalorder %s471_s0, %s471_s0  ;;  %p5102_p11 = scmp.lt.s32.totalorder %s5093_s22, %s5093_s22 }
   0xd   : > { %p5278_p5 = pnand %p4788_p3, %p4781_p4 }
   0xe   : > { %p5103_p12 = por %p5102_p11, %p5101_p10 }
   0xf   : > { %p5084_p6 = pneg %p5278_p5 }
  0x11   : > { %p5096_p8 = pnand %p5094_p7, %p5084_p6 }
  0x13   : > { %p5097_p9 = pneg %p5096_p8 }
  0x15   : > { %p5104_p13 = pnand %p5103_p12, %p5097_p9 }
  0x17   : > { %5107 = shalt.err (!%p5104_p13)
}
  0x18   : > { %s5152_s2 = smov 64   ;;  %s5153_s23 = smov 4  }
  0x19   : > { %4784 = dma.hbm_to_vmem [thread:$0]  (!%p5278_p5), %s6384_s5, 3072, %s471_s0, [#allocation4], %s5152_s2, %s5152_s2, %s5153_s23  }
  0x1a   : > { %s5119_s26 = scalar_lea.vmem %s493_s20, 3072  ;;  %p5127_p7 = scmp.lt.s32.totalorder %s493_s20, %s493_s20 }
  0x1b   : > { %p5120_p0 = scmp.ne.s32.totalorder %s493_s20, %s5119_s26  ;;  %p5128_p8 = scmp.lt.s32.totalorder %s5119_s26, %s5119_s26 }
  0x1d   : > { %p5122_p1 = pnand %p5120_p0, %p5084_p6  ;;  %p5129_p10 = por %p5128_p8, %p5127_p7 }
  0x1f   : > { %p5123_p4 = pneg %p5122_p1 }
  0x21   : > { %p5130_p9 = pnand %p5129_p10, %p5123_p4 }
  0x23   : > { %5133 = shalt.err (!%p5130_p9)
}
  0x24   : > { %4787 = dma.hbm_to_vmem [thread:$0]  (!%p5278_p5), %s6388_s9, 3072, %s493_s20, [#allocation6], %s5152_s2, %s5152_s2, %s5153_s23  }
  0x25   : > { %540 = sbr.rel (%p5269_p2) target bundleno = 1869 (0x74d), region = 92 }
  0x2a   : > { %5139 = dma.done.wait (%p4788_p3), [#allocation4], 3072  }
  0x2b   : > { %5141 = vsyncadd (%p4788_p3), [#allocation4], 4294964224 }
  0x2c   : > { %5143 = dma.done.wait (%p4788_p3), [#allocation6], 3072  }
  0x2d   : > { %5145 = vsyncadd (%p4788_p3), [#allocation6], 4294964224  ;;  %p597_p6 = scmp.lt.s32.totalorder %s5265_s30, 1  ;;  %s6406_s1 = sld [smem:[#allocation10_spill]]  ;;  %vm666_vm0 = vcmask 392192   ;;  %v5154_v54 = vmov 0   ;;  %v776_v57 = vlaneseq }
  0x2e   : > { %s6407_s22 = sld [smem:[#allocation9_spill]]  ;;  %v4818_v5 = vld [vmem:[%s6382_s3 + $0x74] ss:$8 sps:$4 sm:$0xff]   ;;  %v4820_v6 = vld [vmem:[%s6382_s3 + $0x70] ss:$8 sps:$4 sm:$0xff]   ;;  %vm5155_vm10 = vmmov 1  }
  0x2f   : > { %s6454_s30 = smov (!%p597_p6, %s5265_s30), 1  ;;  %1247 = vmatprep.subr.bf16.mxu1 %v4818_v5  ;;  %v4821_v8 = vld [vmem:[%s6382_s3 + $0x64] ss:$8 sps:$4 sm:$0xff]   ;;  %v4823_v10 = vld [vmem:[%s6382_s3 + $0x60] ss:$8 sps:$4 sm:$0xff]   ;;  %s6408_s23 = sld [smem:[#allocation11_spill]] }
  0x30   : > { %s4493_s17 = sshll.u32 %s6454_s30, 5  ;;  %1248 = vmatpush1.bf16.msra.mxu1 %v4820_v6  ;;  %v4824_v11 = vld [vmem:[%s6382_s3 + $0x54] ss:$8 sps:$4 sm:$0xff]   ;;  %v4826_v12 = vld [vmem:[%s6382_s3 + $0x50] ss:$8 sps:$4 sm:$0xff]   ;;  %v5479_v59 = vshrl.u32 %v776_v57, 7 }
  0x31   : > { %1249 = vmatprep.subr.bf16.mxu1 %v4821_v8  ;;  %v4827_v13 = vld [vmem:[%s6382_s3 + $0x44] ss:$8 sps:$4 sm:$0xff]   ;;  %v4839_v15 = vld [vmem:[%s6382_s3 + $0x170] ss:$8 sps:$4 sm:$0xff]   ;;  %v4841_v16 = vld [vmem:[%s6382_s3 + $0x174] ss:$8 sps:$4 sm:$0xff]  }
  0x32   : > { %v4829_v17 = vld [vmem:[%s6382_s3 + $0x40] ss:$8 sps:$4 sm:$0xff]   ;;  %v4830_v18 = vld [vmem:[%s6382_s3 + $0x34] ss:$8 sps:$4 sm:$0xff]   ;;  %v4847_v20 = vld [vmem:[%s6382_s3 + $0x164] ss:$8 sps:$4 sm:$0xff]  }
  0x33   : > { %v4811_v1 = vld [vmem:[%s6406_s1 + $0x10] sm:$0xff]   ;;  %v4812_v2 = vld [vmem:[%s6406_s1 + $0x8] sm:$0xff]   ;;  %v4813_v4 = vld [vmem:[%s6406_s1] sm:$0xff]   ;;  %vm930_vm5 = vcmp.lt.s32.totalorder %v5479_v59, 7  ;;  %vm897_vm14 = vcmp.lt.s32.totalorder %v5479_v59, 1 }
  0x34   : > { %s601_s2 = scalar_lea.vmem %s6407_s22, %s4493_s17  ;;  %4675 = vmatprep.subr.bf16.mxu0 %v4811_v1  ;;  %1250 = vmatpush1.bf16.msra.mxu1 %v4823_v10  ;;  %v4845_v19 = vld [vmem:[%s6382_s3 + $0x160] ss:$8 sps:$4 sm:$0xff]   ;;  %v4832_v21 = vld [vmem:[%s6382_s3 + $0x30] ss:$8 sps:$4 sm:$0xff]   ;;  %v4853_v22 = vld [vmem:[%s6382_s3 + $0x154] ss:$8 sps:$4 sm:$0xff]  }
  0x35   : > { %4676 = vmatpush3.bf16.msra.mxu0 %v4811_v1  ;;  %v4814_v3 = vld [vmem:[%s601_s2] sm:$0xff]   ;;  %v4815_v7 = vld [vmem:[%s601_s2 + $0x8] sm:$0xff]   ;;  %v4816_v9 = vld [vmem:[%s601_s2 + $0x10] sm:$0xff]   ;;  %1251 = vmatprep.subr.bf16.mxu1 %v4824_v11  ;;  %v5482_v1 = vadd.s32 8, %v5479_v59  ;;  %s4185_s17 = sshll.u32 %s6454_s30, 2 }
  0x36   : > { %4677 = vmatprep.subr.bf16.mxu0 %v4812_v2  ;;  %4681 = vmatprep.mubr.msk.bf16.mxu0 %vm666_vm0, %v4814_v3  ;;  %v4817_v14 = vld [vmem:[%s601_s2 + $0x18] sm:$0xff]   ;;  %v4833_v23 = vld [vmem:[%s6382_s3 + $0x24] ss:$8 sps:$4 sm:$0xff]   ;;  %v4835_v24 = vld [vmem:[%s6382_s3 + $0x20] ss:$8 sps:$4 sm:$0xff]   ;;  %s605_s20 = scalar_lea.vmem %s6397_s18, %s4185_s17 }
  0x37   : > { %v4851_v25 = vld [vmem:[%s6382_s3 + $0x150] ss:$8 sps:$4 sm:$0xff]   ;;  %v4836_v26 = vld [vmem:[%s6382_s3 + $0x14] ss:$8 sps:$4 sm:$0xff]   ;;  %v4859_v27 = vld [vmem:[%s6382_s3 + $0x144] ss:$8 sps:$4 sm:$0xff]  }
  0x38   : > { %1252 = vmatpush1.bf16.msra.mxu1 %v4826_v12  ;;  %v4857_v28 = vld [vmem:[%s6382_s3 + $0x140] ss:$8 sps:$4 sm:$0xff]   ;;  %v4838_v29 = vld [vmem:[%s6382_s3 + $0x10] ss:$8 sps:$4 sm:$0xff]   ;;  %v4842_v30 = vld [vmem:[%s6382_s3 + $0x4] ss:$8 sps:$4 sm:$0xff]  }
  0x39   : > { %4678 = vmatpush3.bf16.msra.mxu0 %v4812_v2  ;;  %1253 = vmatprep.subr.bf16.mxu1 %v4827_v13  ;;  %v4844_v31 = vld [vmem:[%s6382_s3] ss:$8 sps:$4 sm:$0xff]   ;;  %v4848_v32 = vld [vmem:[%s6382_s3 + $0xf4] ss:$8 sps:$4 sm:$0xff]   ;;  %v4850_v33 = vld [vmem:[%s6382_s3 + $0xf0] ss:$8 sps:$4 sm:$0xff]  }
  0x3a   : > { %4679 = vmatprep.subr.bf16.mxu0 %v4813_v4  ;;  %v4854_v34 = vld [vmem:[%s6382_s3 + $0xe4] ss:$8 sps:$4 sm:$0xff]   ;;  %v4856_v35 = vld [vmem:[%s6382_s3 + $0xe0] ss:$8 sps:$4 sm:$0xff]   ;;  %v4860_v36 = vld [vmem:[%s6382_s3 + $0xd4] ss:$8 sps:$4 sm:$0xff]  }
  0x3b   : > { %v4862_v37 = vld [vmem:[%s6382_s3 + $0xd0] ss:$8 sps:$4 sm:$0xff]   ;;  %v4865_v38 = vld [vmem:[%s6382_s3 + $0x134] ss:$8 sps:$4 sm:$0xff]   ;;  %v4866_v40 = vld [vmem:[%s6382_s3 + $0xc4] ss:$8 sps:$4 sm:$0xff]  }
  0x3c   : > { %1254 = vmatpush1.bf16.msra.mxu1 %v4829_v17  ;;  %v4863_v39 = vld [vmem:[%s6382_s3 + $0x130] ss:$8 sps:$4 sm:$0xff]   ;;  %v4868_v41 = vld [vmem:[%s6382_s3 + $0xc0] ss:$8 sps:$4 sm:$0xff]   ;;  %v4871_v42 = vld [vmem:[%s6382_s3 + $0x124] ss:$8 sps:$4 sm:$0xff]  }
  0x3d   : > { %4680 = vmatpush3.bf16.msra.mxu0 %v4813_v4  ;;  %1255 = vmatprep.subr.bf16.mxu1 %v4830_v18  ;;  %v4869_v43 = vld [vmem:[%s6382_s3 + $0x120] ss:$8 sps:$4 sm:$0xff]   ;;  %v4872_v44 = vld [vmem:[%s6382_s3 + $0xb4] ss:$8 sps:$4 sm:$0xff]   ;;  %v4874_v45 = vld [vmem:[%s6382_s3 + $0xb0] ss:$8 sps:$4 sm:$0xff]  }
  0x3e   : > { %1320 = vmatprep.subr.bf16.mxu0 %v4841_v16  ;;  %v4877_v46 = vld [vmem:[%s6382_s3 + $0x114] ss:$8 sps:$4 sm:$0xff]   ;;  %v4875_v47 = vld [vmem:[%s6382_s3 + $0x110] ss:$8 sps:$4 sm:$0xff]   ;;  %v4878_v48 = vld [vmem:[%s6382_s3 + $0xa4] ss:$8 sps:$4 sm:$0xff]  }
  0x3f   : > { %v4880_v49 = vld [vmem:[%s6382_s3 + $0xa0] ss:$8 sps:$4 sm:$0xff]   ;;  %v4883_v50 = vld [vmem:[%s6382_s3 + $0x104] ss:$8 sps:$4 sm:$0xff]   ;;  %v4884_v52 = vld [vmem:[%s6382_s3 + $0x94] ss:$8 sps:$4 sm:$0xff]  }
  0x40   : > { %4682 = vmatmul.mubr.msk.bf16.vlgmr.msra.gmra.mxu0 %vm666_vm0, %v4815_v7  ;;  %1256 = vmatpush1.bf16.msra.mxu1 %v4832_v21  ;;  %v4881_v51 = vld [vmem:[%s6382_s3 + $0x100] ss:$8 sps:$4 sm:$0xff]   ;;  %v4886_v53 = vld [vmem:[%s6382_s3 + $0x90] ss:$8 sps:$4 sm:$0xff]   ;;  %v4887_v55 = vld [vmem:[%s6382_s3 + $0x84] ss:$8 sps:$4 sm:$0xff]  }
  0x41   : > { %4685 = vmatprep.mubr.msk.bf16.mxu0 %vm666_vm0, %v4816_v9  ;;  %1321 = vmatpush1.bf16.msra.mxu0 %v4839_v15  ;;  %v4889_v56 = vld [vmem:[%s6382_s3 + $0x80] ss:$8 sps:$4 sm:$0xff]   ;;  %v796_v9 = vand.u32 15, %v5482_v1 }
  0x42   : > { %1322 = vmatprep.subr.bf16.mxu0 %v4847_v20  ;;  %1257 = vmatprep.subr.bf16.mxu1 %v4833_v23  ;;  %v4186_v58 = vld [vmem:[%s6408_s23] ss:$0 sm:$0xff]  ;;  %v5499_v23 = vadd.s32 24, %v5479_v59 }
  0x43   : > { %vm5490_vm6 = vcmp.lt.s32.totalorder %v796_v9, 15 }
  0x44   : > { %1258 = vmatpush1.bf16.msra.mxu1 %v4835_v24  ;;  %vm5519_vm11 = vmpackc.low %vm5490_vm6, %vm5155_vm10 }
  0x45   : > { %1323 = vmatpush1.bf16.msra.mxu0 %v4845_v19  ;;  %1259 = vmatprep.subr.bf16.mxu1 %v4836_v26 }
  0x46   : > { %1324 = vmatprep.subr.bf16.mxu0 %v4853_v22  ;;  %v789_v22 = vand.u32 15, %v5479_v59 }
  0x48   : > { %4686 = vmatmul.mubr.msk.bf16.gmra.mxu0 %vm666_vm0, %v4817_v14  ;;  %1260 = vmatpush1.bf16.msra.mxu1 %v4838_v29  ;;  %vm881_vm13 = vcmp.gt.s32.totalorder %v789_v22, 0 }
  0x49   : > { %1325 = vmatpush1.bf16.msra.mxu0 %v4851_v25  ;;  %1261 = vmatprep.subr.bf16.mxu1 %v4842_v30  ;;  %vm5544_vm0 = vmpackc.low %vm5155_vm10, %vm881_vm13 }
  0x4a   : > { %1326 = vmatprep.subr.bf16.mxu0 %v4859_v27  ;;  %1352 = vmatprep.mubr.bf16.mxu0 %v5154_v54 }
  0x4c   : > { %1262 = vmatpush1.bf16.msra.mxu1 %v4844_v31 }
  0x4d   : > { %1327 = vmatpush1.bf16.msra.mxu0 %v4857_v28  ;;  %1263 = vmatprep.subr.bf16.mxu1 %v4848_v32 }
  0x4e   : > { %1328 = vmatprep.subr.bf16.mxu0 %v4865_v38  ;;  %v810_v38 = vand.u32 15, %v5499_v23 }
  0x50   : > { %1264 = vmatpush2.bf16.msra.mxu1 %v4850_v33  ;;  %vm917_vm15 = vcmp.lt.s32.totalorder %v810_v38, 15 }
  0x51   : > { %1265 = vmatprep.subr.bf16.mxu1 %v4854_v34  ;;  %1329 = vmatpush1.bf16.msra.mxu0 %v4863_v39 }
  0x52   : > { %1330 = vmatprep.subr.bf16.mxu0 %v4871_v42 }
  0x54   : > { %1266 = vmatpush2.bf16.msra.mxu1 %v4856_v35 }
  0x55   : > { %1267 = vmatprep.subr.bf16.mxu1 %v4860_v36  ;;  %1331 = vmatpush1.bf16.msra.mxu0 %v4869_v43 }
  0x56   : > { %1332 = vmatprep.subr.bf16.mxu0 %v4877_v46 }
  0x58   : > { %1268 = vmatpush2.bf16.msra.mxu1 %v4862_v37 }
  0x59   : > { %1269 = vmatprep.subr.bf16.mxu1 %v4866_v40  ;;  %1333 = vmatpush1.bf16.msra.mxu0 %v4875_v47 }
  0x5a   : > { %1334 = vmatprep.subr.bf16.mxu0 %v4883_v50 }
  0x5c   : > { %1270 = vmatpush2.bf16.msra.mxu1 %v4868_v41 }
  0x5d   : > { %1271 = vmatprep.subr.bf16.mxu1 %v4872_v44  ;;  %1335 = vmatpush1.bf16.msra.mxu0 %v4881_v51 }
  0x60   : > { %1272 = vmatpush2.bf16.msra.mxu1 %v4874_v45 }
  0x61   : > { %1273 = vmatprep.subr.bf16.mxu1 %v4878_v48  ;;  %v5528_v48 = vadd.s32 16, %v5479_v59 }
  0x64   : > { %1274 = vmatpush2.bf16.msra.mxu1 %v4880_v49 }
  0x65   : > { %1275 = vmatprep.subr.bf16.mxu1 %v4884_v52 }
  0x68   : > { %1276 = vmatpush2.bf16.msra.mxu1 %v4886_v53 }
  0x69   : > { %1277 = vmatprep.subr.bf16.mxu1 %v4887_v55 }
  0x6c   : > { %1278 = vmatpush2.bf16.msra.mxu1 %v4889_v56 }
 0x100   : > { %v4683_v60 = vpop.f32.mrf.mxu0 }
 0x101   : > { %v722_v61 = vadd.f32 %v4683_v60, %v4186_v58 }
 0x102   : > { %v713_v62 = vpop.f32.mrf.mxu0 }
 0x103   : > { %vm746_vm1 = vcmp.ge.f32.partialorder %v722_v61, 0.0  ;;  %v754_v63 = vmul.f32 0.2, %v722_v61  ;;  %v714_v0 = vadd.f32 %v4186_v58, %v713_v62 }
 0x104   : > { %v4684_v2 = vpop.f32.mrf.mxu0 }
 0x105   : > { %v762_v3 = vsel %vm746_vm1, %v722_v61, %v754_v63  ;;  %vm744_vm2 = vcmp.ge.f32.partialorder %v714_v0, 0.0  ;;  %v752_v4 = vmul.f32 0.2, %v714_v0  ;;  %v725_v5 = vadd.f32 %v4684_v2, %v4186_v58  ;;  %vm5559_vm1 = vmpackc.low %vm917_vm15, %vm5155_vm10 }
 0x106   : > { %v716_v6 = vpop.f32.mrf.mxu0  ;;  %v5485_v10 = vmul.f32 1.4142135, %v762_v3  ;;  %v803_v63 = vand.u32 15, %v5528_v48 }
 0x107   : > { %v717_v7 = vadd.f32 %v4186_v58, %v716_v6  ;;  %v760_v8 = vsel %vm744_vm2, %v714_v0, %v752_v4  ;;  %v755_v12 = vmul.f32 0.2, %v725_v5  ;;  %vm747_vm4 = vcmp.ge.f32.partialorder %v725_v5, 0.0 }
 0x108   : > { %v4687_v11 = vpop.f32.mrf.mxu0  ;;  %v5487_v15 = vmul.f32 1.4142135, %v760_v8  ;;  %v924_v19 = vrot.slane %v5485_v10, 1  ;;  %vm883_vm2 = vcmp.gt.s32.totalorder %v803_v63, 0  ;;  %v4903_v63 = vld [vmem:[#allocation3 + $0x20] sm:$0xff]  }
 0x109   : > { %vm745_vm3 = vcmp.ge.f32.partialorder %v717_v7, 0.0  ;;  %v753_v13 = vmul.f32 0.2, %v717_v7  ;;  %v763_v24 = vsel %vm747_vm4, %v725_v5, %v755_v12  ;;  %v738_v27 = vadd.f32 %v4687_v11, %v4186_v58 }
 0x10a   : > { %v729_v14 = vpop.f32.mrf.mxu0  ;;  %v922_v29 = vrot.slane %v5487_v15, 1  ;;  %v5505_v35 = vmul.f32 1.4142135, %v763_v24  ;;  %v889_v51 = vrot.slane %v5487_v15, 7  ;;  %v891_v5 = vrot.slane %v5485_v10, 7 }
 0x10b   : > { %v730_v16 = vadd.f32 %v4186_v58, %v729_v14  ;;  %v761_v17 = vsel %vm745_vm3, %v717_v7, %v753_v13  ;;  %v758_v43 = vmul.f32 0.2, %v738_v27  ;;  %vm750_vm12 = vcmp.ge.f32.partialorder %v738_v27, 0.0  ;;  %vm5574_vm3 = vmpackc.low %vm5155_vm10, %vm883_vm2 }
 0x10c   : > { %v4688_v20 = vpop.f32.mrf.mxu0  ;;  %v5495_v21 = vmul.f32 1.4142135, %v761_v17  ;;  %v925_v52 = vrot.slane %v5505_v35, 1  ;;  %v952_v0 = vpack.c.bf16 %v5505_v35, %v5485_v10  ;;  %v892_v6 = vrot.slane %v5505_v35, 7 }
 0x10d   : > { %vm748_vm7 = vcmp.ge.f32.partialorder %v730_v16, 0.0  ;;  %v756_v25 = vmul.f32 0.2, %v730_v16  ;;  %v741_v26 = vadd.f32 %v4688_v20, %v4186_v58  ;;  %v766_v53 = vsel %vm750_vm12, %v738_v27, %v758_v43  ;;  %v4922_v43 = vld [vmem:[%s6386_s7 + $0x54] ss:$8 sps:$4 sm:$0xff]  }
 0x10e   : > { %v732_v28 = vpop.f32.mrf.mxu0  ;;  %v923_v30 = vrot.slane %v5495_v21, 1  ;;  %v951_v31 = vpack.c.bf16 %v5495_v21, %v5487_v15  ;;  %v890_v45 = vrot.slane %v5495_v21, 7  ;;  %v774_v2 = vmul.f32 1.4142135, %v766_v53  ;;  %v4898_v53 = vld [vmem:[#allocation3 + $0x98] sm:$0xff]  }
 0x10f   : > { %v764_v32 = vsel %vm748_vm7, %v730_v16, %v756_v25  ;;  %vm751_vm8 = vcmp.ge.f32.partialorder %v741_v26, 0.0  ;;  %v759_v33 = vmul.f32 0.2, %v741_v26  ;;  %v733_v34 = vadd.f32 %v4186_v58, %v732_v28 }
 0x110   : > { %v5507_v36 = vmul.f32 1.4142135, %v764_v32  ;;  %v936_v37 = vsel %vm930_vm5, %v923_v30, %v924_v19  ;;  %1279 = vmatprep.mubr.bf16.mxu1 %v951_v31  ;;  %v937_v41 = vsel %vm930_vm5, %v922_v29, %v923_v30  ;;  %v904_v55 = vsel %vm897_vm14, %v889_v51, %v890_v45 }
 0x111   : > { %v767_v39 = vsel %vm751_vm8, %v741_v26, %v759_v33  ;;  %vm749_vm9 = vcmp.ge.f32.partialorder %v733_v34, 0.0  ;;  %v757_v40 = vmul.f32 0.2, %v733_v34  ;;  %v4259_v46 = vpack.c.bf16 %v936_v37, %v937_v41  ;;  %v4916_v33 = vld [vmem:[%s6386_s7 + $0x74] ss:$8 sps:$4 sm:$0xff]  }
 0x112   : > { %v5523_v44 = vmul.f32 1.4142135, %v767_v39  ;;  %v926_v47 = vrot.slane %v5507_v36, 1  ;;  %v782_v58 = vadd.s32 40, %v5479_v59  ;;  %v935_v3 = vsel %vm930_vm5, %v924_v19, %v925_v52 }
 0x113   : > { %v765_v50 = vsel %vm749_vm9, %v733_v34, %v757_v40  ;;  %4260 = vmatmul.mubr.msk.bf16.vlgmr.msra.gmra.mxu0 %vm5519_vm11, %v4259_v46  ;;  %v781_v11 = vadd.s32 32, %v5479_v59  ;;  %v903_v12 = vsel %vm897_vm14, %v890_v45, %v891_v5  ;;  %v928_v13 = vrot.slane %v774_v2, 1  ;;  %v4890_v46 = vld [vmem:[#allocation3 + $0xb8] sm:$0xff]  }
 0x114   : > { %v896_v49 = vrot.slane %v5523_v44, 7  ;;  %1362 = vmatprep.mubr.bf16.mxu0 %v5154_v54  ;;  %v773_v60 = vmul.f32 1.4142135, %v765_v50  ;;  %v934_v62 = vsel %vm930_vm5, %v925_v52, %v926_v47  ;;  %v824_v8 = vand.u32 15, %v782_v58  ;;  %4689 = vmatprep.subr.bf16.mxu1 %v4890_v46  ;;  %v4892_v50 = vld [vmem:[#allocation3 + $0xa8] sm:$0xff]   ;;  %v4896_v52 = vld [vmem:[#allocation3 + $0x70] sm:$0xff]  }
 0x115   : > { %v4262_v7 = vpack.c.bf16 %v934_v62, %v935_v3  ;;  %v902_v10 = vsel %vm897_vm14, %v891_v5, %v892_v6  ;;  %v784_v16 = vadd.s32 56, %v5479_v59  ;;  %v817_v20 = vand.u32 15, %v781_v11  ;;  %v4901_v58 = vld [vmem:[#allocation3 + $0x90] sm:$0xff]   ;;  %v4904_v62 = vld [vmem:[#allocation3 + $0x88] sm:$0xff]   ;;  %v4906_v3 = vld [vmem:[#allocation3 + $0x18] sm:$0xff]  }
 0x116   : > { %v905_v56 = vsel %vm897_vm14, %v896_v49, %v889_v51  ;;  %v927_v9 = vrot.slane %v773_v60, 1  ;;  %vm919_vm4 = vcmp.lt.s32.totalorder %v824_v8, 15  ;;  %v4250_v17 = vpack.c.bf16 %v902_v10, %v903_v12  ;;  %v4894_v51 = vld [vmem:[#allocation3 + $0x38] sm:$0xff]   ;;  %v4908_v5 = vld [vmem:[#allocation3 + $0x50] sm:$0xff]   ;;  %v4911_v8 = vld [vmem:[#allocation3 + $0x8] sm:$0xff]  }
 0x117   : > { %v4247_v61 = vpack.c.bf16 %v904_v55, %v905_v56  ;;  %v894_v21 = vrot.slane %v773_v60, 7  ;;  %v953_v22 = vpack.c.bf16 %v773_v60, %v5507_v36  ;;  %vm5587_vm6 = vmpackc.low %vm919_vm4, %vm5155_vm10  ;;  %v893_v25 = vrot.slane %v5507_v36, 7  ;;  %v4897_v55 = vld [vmem:[#allocation3 + $0x30] sm:$0xff]   ;;  %v4899_v56 = vld [vmem:[#allocation3 + $0x68] sm:$0xff]  }
 0x118   : > { %v932_v18 = vsel %vm930_vm5, %v927_v9, %v928_v13  ;;  %v933_v19 = vsel %vm930_vm5, %v926_v47, %v927_v9  ;;  %v838_v27 = vand.u32 15, %v784_v16  ;;  %v929_v28 = vrot.slane %v5523_v44, 1  ;;  %v4891_v47 = vld [vmem:[#allocation3 + $0xb0] sm:$0xff]   ;;  %v4900_v60 = vld [vmem:[#allocation3 + $0x28] sm:$0xff]   ;;  %v4912_v9 = vld [vmem:[#allocation3 + $0x40] sm:$0xff]  }
 0x119   : > { %4248 = vmatmul.mubr.msk.bf16.vlgmr.msra.gmra.mxu1 %vm5544_vm0, %v4247_v61  ;;  %v4265_v26 = vpack.c.bf16 %v932_v18, %v933_v19  ;;  %vm885_vm7 = vcmp.gt.s32.totalorder %v817_v20, 0  ;;  %v783_v30 = vadd.s32 48, %v5479_v59  ;;  %v900_v31 = vsel %vm897_vm14, %v893_v25, %v894_v21  ;;  %v4902_v61 = vld [vmem:[#allocation3 + $0x60] sm:$0xff]  }
 0x11a   : > { %1289 = vmatprep.mubr.bf16.mxu1 %v952_v0  ;;  %v901_v32 = vsel %vm897_vm14, %v892_v6, %v893_v25  ;;  %vm5602_vm8 = vmpackc.low %vm5155_vm10, %vm885_vm7  ;;  %vm921_vm9 = vcmp.lt.s32.totalorder %v838_v27, 15  ;;  %v931_v35 = vsel %vm930_vm5, %v928_v13, %v929_v28  ;;  %v938_v36 = vsel %vm930_vm5, %v929_v28, %v922_v29  ;;  %4690 = vmatpush3.bf16.msra.mxu1 %v4890_v46  ;;  %v4905_v0 = vld [vmem:[#allocation3 + $0x58] sm:$0xff]   ;;  %v4909_v6 = vld [vmem:[#allocation3 + $0x10] sm:$0xff]  }
 0x11b   : > { %4263 = vmatmul.mubr.msk.bf16.gmra.mxu0 %vm5559_vm1, %v4262_v7  ;;  %v4253_v34 = vpack.c.bf16 %v900_v31, %v901_v32  ;;  %v831_v37 = vand.u32 15, %v783_v30  ;;  %v954_v38 = vpack.c.bf16 %v5523_v44, %v774_v2  ;;  %vm5616_vm12 = vmpackc.low %vm921_vm9, %vm5155_vm10  ;;  %v895_v40 = vrot.slane %v774_v2, 7  ;;  %4691 = vmatprep.subr.bf16.mxu1 %v4891_v47  ;;  %v4893_v44 = vld [vmem:[#allocation3 + $0x78] sm:$0xff]   ;;  %v4907_v2 = vld [vmem:[#allocation3 + $0x80] sm:$0xff]  }
 0x11c   : > { %1372 = vmatprep.mubr.bf16.mxu0 %v5154_v54  ;;  %v4268_v41 = vpack.c.bf16 %v938_v36, %v931_v35  ;;  %4501 = vmatprep.subr.bf16.mxu0 %v4893_v44  ;;  %v4910_v7 = vld [vmem:[#allocation3 + $0x48] sm:$0xff]   ;;  %v4913_v11 = vld [vmem:[#allocation3] sm:$0xff]  }
 0x11d   : > { %vm887_vm13 = vcmp.gt.s32.totalorder %v831_v37, 0  ;;  %v899_v15 = vsel %vm897_vm14, %v894_v21, %v895_v40  ;;  %v898_v29 = vsel %vm897_vm14, %v895_v40, %v896_v49  ;;  %v4895_v49 = vld [vmem:[#allocation3 + $0xa0] sm:$0xff]   ;;  %4502 = vmatpush3.bf16.msra.mxu0 %v4894_v51 }
 0x11e   : > { %vm5629_vm15 = vmpackc.low %vm5155_vm10, %vm887_vm13  ;;  %v4256_v45 = vpack.c.bf16 %v898_v29, %v899_v15  ;;  %4692 = vmatpush3.bf16.msra.mxu1 %v4891_v47  ;;  %4503 = vmatprep.subr.bf16.mxu0 %v4896_v52 }
 0x11f   : > { %4693 = vmatprep.subr.bf16.mxu1 %v4892_v50 }
 0x121   : > { %4251 = vmatmul.mubr.msk.bf16.gmra.mxu1 %vm5574_vm3, %v4250_v17  ;;  %4504 = vmatpush3.bf16.msra.mxu0 %v4897_v55  ;;  %v5638_v17 = vld [vmem:[%s6383_s4] ss:$0 sm:$0xff] }
 0x122   : > { %1299 = vmatprep.mubr.bf16.mxu1 %v953_v22  ;;  %4694 = vmatpush3.bf16.msra.mxu1 %v4892_v50 }
 0x123   : > { %4266 = vmatmul.mubr.msk.bf16.gmra.mxu0 %vm5587_vm6, %v4265_v26  ;;  %4695 = vmatprep.subr.bf16.mxu1 %v4895_v49 }
 0x124   : > { %1382 = vmatprep.mubr.bf16.mxu0 %v5154_v54  ;;  %4505 = vmatprep.subr.bf16.mxu0 %v4899_v56 }
 0x125   : > { %4506 = vmatpush3.bf16.msra.mxu0 %v4900_v60 }
 0x126   : > { %4696 = vmatpush3.bf16.msra.mxu1 %v4895_v49  ;;  %4507 = vmatprep.subr.bf16.mxu0 %v4902_v61 }
 0x127   : > { %4697 = vmatprep.subr.bf16.mxu1 %v4898_v53 }
 0x129   : > { %4254 = vmatmul.mubr.msk.bf16.gmra.mxu1 %vm5602_vm8, %v4253_v34  ;;  %4508 = vmatpush3.bf16.msra.mxu0 %v4903_v63 }
 0x12a   : > { %1309 = vmatprep.mubr.bf16.mxu1 %v954_v38  ;;  %4698 = vmatpush3.bf16.msra.mxu1 %v4898_v53 }
 0x12b   : > { %4269 = vmatmul.mubr.msk.bf16.gmra.mxu0 %vm5616_vm12, %v4268_v41  ;;  %4699 = vmatprep.subr.bf16.mxu1 %v4901_v58 }
 0x12c   : > { %4509 = vmatprep.subr.bf16.mxu0 %v4905_v0 }
 0x12d   : > { %4510 = vmatpush3.bf16.msra.mxu0 %v4906_v3 }
 0x12e   : > { %4700 = vmatpush3.bf16.msra.mxu1 %v4901_v58  ;;  %4511 = vmatprep.subr.bf16.mxu0 %v4908_v5 }
 0x12f   : > { %4701 = vmatprep.subr.bf16.mxu1 %v4904_v62 }
 0x131   : > { %4257 = vmatmul.mubr.msk.bf16.gmra.mxu1 %vm5629_vm15, %v4256_v45  ;;  %4512 = vmatpush3.bf16.msra.mxu0 %v4909_v6 }
 0x132   : > { %4702 = vmatpush3.bf16.msra.mxu1 %v4904_v62  ;;  %4513 = vmatprep.subr.bf16.mxu0 %v4910_v7 }
 0x133   : > { %4703 = vmatprep.subr.bf16.mxu1 %v4907_v2 }
 0x135   : > { %4514 = vmatpush3.bf16.msra.mxu0 %v4911_v8 }
 0x136   : > { %4704 = vmatpush3.bf16.msra.mxu1 %v4907_v2  ;;  %4515 = vmatprep.subr.bf16.mxu0 %v4912_v9 }
 0x139   : > { %4516 = vmatpush3.bf16.msra.mxu0 %v4913_v11 }
 0x13a   : > { %2469 = vmatprep.subr.bf16.mxu0 %v4916_v33 }
 0x1d3   : > { %v1354_v12 = vpop.f32.mrf.mxu0 }
 0x1d5   : > { %v1356_v13 = vpop.f32.mrf.mxu0 }
 0x1d7   : > { %v1358_v10 = vpop.f32.mrf.mxu0 }
 0x1d9   : > { %v1281_v16 = vpop.f32.mrf.mxu1  ;;  %v1360_v19 = vpop.f32.mrf.mxu0 }
 0x1da   : > { %v1355_v18 = vadd.f32 %v1354_v12, %v1281_v16 }
 0x1db   : > { %v1283_v20 = vpop.f32.mrf.mxu1  ;;  %v1364_v25 = vpop.f32.mrf.mxu0 }
 0x1dc   : > { %v1400_v21 = vadd.f32 %v5638_v17, %v1355_v18  ;;  %v5641_v22 = vadd.f32 %v1356_v13, %v1283_v20 }
 0x1dd   : > { %v1285_v26 = vpop.f32.mrf.mxu1  ;;  %v1366_v28 = vpop.f32.mrf.mxu0 }
 0x1de   : > { %v1359_v27 = vadd.f32 %v1358_v10, %v1285_v26  ;;  %v1416_v31 = vmul.f32 0.2, %v1400_v21  ;;  %vm1408_vm10 = vcmp.ge.f32.partialorder %v1400_v21, 0.0 }
 0x1df   : > { %v1287_v30 = vpop.f32.mrf.mxu1  ;;  %v1368_v35 = vpop.f32.mrf.mxu0 }
 0x1e0   : > { %v1401_v32 = vadd.f32 %v5638_v17, %v1359_v27  ;;  %v5644_v34 = vadd.f32 %v1360_v19, %v1287_v30  ;;  %v1424_v15 = vsel %vm1408_vm10, %v1400_v21, %v1416_v31 }
 0x1e1   : > { %v1291_v36 = vpop.f32.mrf.mxu1  ;;  %v1370_v38 = vpop.f32.mrf.mxu0  ;;  %v5651_v52 = vmul.f32 1.4142135, %v1424_v15 }
 0x1e2   : > { %vm1409_vm2 = vcmp.ge.f32.partialorder %v1401_v32, 0.0  ;;  %v1417_v37 = vmul.f32 0.2, %v1401_v32  ;;  %v1365_v40 = vadd.f32 %v1364_v25, %v1291_v36 }
 0x1e3   : > { %v1293_v41 = vpop.f32.mrf.mxu1  ;;  %v1374_v46 = vpop.f32.mrf.mxu0  ;;  %v1464_v16 = vrot.slane %v5651_v52, 1 }
 0x1e4   : > { %v1425_v29 = vsel %vm1409_vm2, %v1401_v32, %v1417_v37  ;;  %v5646_v45 = vadd.f32 %v1366_v28, %v1293_v41  ;;  %v1402_v50 = vadd.f32 %v5638_v17, %v1365_v40 }
 0x1e5   : > { %v5648_v47 = vmul.f32 1.4142135, %v1425_v29  ;;  %v1295_v44 = vpop.f32.mrf.mxu1  ;;  %v1376_v51 = vpop.f32.mrf.mxu0 }
 0x1e6   : > { %v1369_v49 = vadd.f32 %v1368_v35, %v1295_v44  ;;  %vm1410_vm4 = vcmp.ge.f32.partialorder %v1402_v50, 0.0  ;;  %v1418_v53 = vmul.f32 0.2, %v1402_v50 }
 0x1e7   : > { %v1297_v55 = vpop.f32.mrf.mxu1  ;;  %v1378_v60 = vpop.f32.mrf.mxu0  ;;  %v1492_v63 = vpack.c.bf16 %v5648_v47, %v5651_v52  ;;  %v1465_v7 = vrot.slane %v5648_v47, 1 }
 0x1e8   : > { %v1403_v56 = vadd.f32 %v5638_v17, %v1369_v49  ;;  %v5654_v58 = vadd.f32 %v1370_v38, %v1297_v55  ;;  %v1426_v61 = vsel %vm1410_vm4, %v1402_v50, %v1418_v53 }
 0x1e9   : > { %v1301_v62 = vpop.f32.mrf.mxu1  ;;  %v5658_v0 = vmul.f32 1.4142135, %v1426_v61  ;;  %v1380_v3 = vpop.f32.mrf.mxu0  ;;  %1724 = vmatprep.mubr.bf16.mxu0 %v1492_v63  ;;  %v1478_v28 = vsel %vm930_vm5, %v1464_v16, %v1465_v7 }
 0x1ea   : > { %vm1411_vm7 = vcmp.ge.f32.partialorder %v1403_v56, 0.0  ;;  %v1419_v2 = vmul.f32 0.2, %v1403_v56  ;;  %v1375_v5 = vadd.f32 %v1374_v46, %v1301_v62 }
 0x1eb   : > { %v1303_v6 = vpop.f32.mrf.mxu1  ;;  %v1466_v8 = vrot.slane %v5658_v0, 1  ;;  %v1384_v13 = vpop.f32.mrf.mxu0  ;;  %v1442_v24 = vrot.slane %v5658_v0, 7 }
 0x1ec   : > { %v1427_v9 = vsel %vm1411_vm7, %v1403_v56, %v1419_v2  ;;  %v1404_v11 = vadd.f32 %v5638_v17, %v1375_v5  ;;  %v5663_v12 = vadd.f32 %v1376_v51, %v1303_v6 }
 0x1ed   : > { %v1305_v10 = vpop.f32.mrf.mxu1  ;;  %v1477_v19 = vsel %vm930_vm5, %v1465_v7, %v1466_v8  ;;  %v5668_v20 = vmul.f32 1.4142135, %v1427_v9  ;;  %v1386_v30 = vpop.f32.mrf.mxu0  ;;  %v1441_v7 = vrot.slane %v5648_v47, 7 }
 0x1ee   : > { %v1379_v18 = vadd.f32 %v1378_v60, %v1305_v10  ;;  %vm1412_vm9 = vcmp.ge.f32.partialorder %v1404_v11, 0.0  ;;  %v1420_v25 = vmul.f32 0.2, %v1404_v11  ;;  %v4308_v31 = vpack.c.bf16 %v1477_v19, %v1478_v28 }
 0x1ef   : > { %v1307_v21 = vpop.f32.mrf.mxu1  ;;  %v1467_v37 = vrot.slane %v5668_v20, 1  ;;  %v1388_v50 = vpop.f32.mrf.mxu0  ;;  %v1493_v28 = vpack.c.bf16 %v5668_v20, %v5658_v0 }
 0x1f0   : > { %v1405_v26 = vadd.f32 %v5638_v17, %v1379_v18  ;;  %v5671_v27 = vadd.f32 %v1380_v3, %v1307_v21  ;;  %v1428_v35 = vsel %vm1412_vm9, %v1404_v11, %v1420_v25  ;;  %4705 = vmatprep.mubr.msk.bf16.mxu1 %vm5519_vm11, %v4308_v31 }
 0x1f1   : > { %v1311_v32 = vpop.f32.mrf.mxu1  ;;  %v1436_v38 = vmul.f32 1.4142135, %v1428_v35  ;;  %v1476_v53 = vsel %vm930_vm5, %v1466_v8, %v1467_v37  ;;  %v5877_v33 = vpop.f32.mrf.mxu0 }
 0x1f2   : > { %vm1413_vm13 = vcmp.ge.f32.partialorder %v1405_v26, 0.0  ;;  %v1421_v36 = vmul.f32 0.2, %v1405_v26  ;;  %v1385_v40 = vadd.f32 %v1384_v13, %v1311_v32 }
 0x1f3   : > { %v1313_v41 = vpop.f32.mrf.mxu1  ;;  %v1468_v46 = vrot.slane %v1436_v38, 1  ;;  %v1444_v57 = vrot.slane %v1436_v38, 7 }
 0x1f4   : > { %v1429_v15 = vsel %vm1413_vm13, %v1405_v26, %v1421_v36  ;;  %v5678_v29 = vadd.f32 %v1386_v30, %v1313_v41  ;;  %v1406_v49 = vadd.f32 %v5638_v17, %v1385_v40  ;;  %v1443_v26 = vrot.slane %v5668_v20, 7  ;;  %v4914_v41 = vld [vmem:[%s6386_s7 + $0x70] ss:$8 sps:$4 sm:$0xff]  }
 0x1f5   : > { %v1315_v44 = vpop.f32.mrf.mxu1  ;;  %v1475_v55 = vsel %vm930_vm5, %v1467_v37, %v1468_v46  ;;  %v1437_v56 = vmul.f32 1.4142135, %v1429_v15  ;;  %v1453_v30 = vsel %vm897_vm14, %v1441_v7, %v1442_v24  ;;  %v4917_v15 = vld [vmem:[%s6386_s7 + $0x60] ss:$8 sps:$4 sm:$0xff]  }
 0x1f6   : > { %v1389_v51 = vadd.f32 %v1388_v50, %v1315_v44  ;;  %v4311_v42 = vpack.c.bf16 %v1475_v55, %v1476_v53  ;;  %vm1414_vm11 = vcmp.ge.f32.partialorder %v1406_v49, 0.0  ;;  %v1422_v60 = vmul.f32 0.2, %v1406_v49  ;;  %v4920_v50 = vld [vmem:[%s6386_s7 + $0x50] ss:$8 sps:$4 sm:$0xff]  }
 0x1f7   : > { %v1469_v63 = vrot.slane %v1437_v56, 1  ;;  %v1445_v32 = vrot.slane %v1437_v56, 7  ;;  %v1494_v20 = vpack.c.bf16 %v1437_v56, %v1436_v38  ;;  %v1451_v0 = vsel %vm897_vm14, %v1443_v26, %v1444_v57  ;;  %v4925_v44 = vld [vmem:[%s6386_s7 + $0x44] ss:$8 sps:$4 sm:$0xff]   ;;  %v4926_v53 = vld [vmem:[%s6386_s7 + $0x30] ss:$8 sps:$4 sm:$0xff]  }
 0x1f8   : > { %v1407_v61 = vadd.f32 %v5638_v17, %v1389_v51  ;;  %v1430_v62 = vsel %vm1414_vm11, %v1406_v49, %v1422_v60  ;;  %4706 = vmatmul.mubr.msk.bf16.vlgmr.msra.gmra.mxu1 %vm5559_vm1, %v4311_v42  ;;  %v1440_v17 = vrot.slane %v5651_v52, 7  ;;  %v4923_v49 = vld [vmem:[%s6386_s7 + $0x40] ss:$8 sps:$4 sm:$0xff]   ;;  %v4928_v51 = vld [vmem:[%s6386_s7 + $0x34] ss:$8 sps:$4 sm:$0xff]  }
 0x1f9   : > { %v1438_v2 = vmul.f32 1.4142135, %v1430_v62  ;;  %v1474_v11 = vsel %vm930_vm5, %v1468_v46, %v1469_v63  ;;  %v1450_v39 = vsel %vm897_vm14, %v1444_v57, %v1445_v32  ;;  %v4919_v46 = vld [vmem:[%s6386_s7 + $0x64] ss:$8 sps:$4 sm:$0xff]   ;;  %v4929_v56 = vld [vmem:[%s6386_s7 + $0x20] ss:$8 sps:$4 sm:$0xff]  }
 0x1fa   : > { %vm1415_vm10 = vcmp.ge.f32.partialorder %v1407_v61, 0.0  ;;  %v1423_v3 = vmul.f32 0.2, %v1407_v61  ;;  %v1454_v18 = vsel %vm897_vm14, %v1440_v17, %v1441_v7  ;;  %v4302_v35 = vpack.c.bf16 %v1450_v39, %v1451_v0  ;;  %v4931_v55 = vld [vmem:[%s6386_s7 + $0x24] ss:$8 sps:$4 sm:$0xff]  }
 0x1fb   : > { %v1470_v5 = vrot.slane %v1438_v2, 1  ;;  %v1446_v37 = vrot.slane %v1438_v2, 7  ;;  %v4934_v42 = vld [vmem:[%s6386_s7 + $0x14] ss:$8 sps:$4 sm:$0xff]   ;;  %v4935_v62 = vld [vmem:[%s6386_s7 + $0x170] ss:$8 sps:$4 sm:$0xff]  }
 0x1fc   : > { %v1431_v6 = vsel %vm1415_vm10, %v1407_v61, %v1423_v3  ;;  %v4937_v60 = vld [vmem:[%s6386_s7 + $0x174] ss:$8 sps:$4 sm:$0xff]   ;;  %v4932_v61 = vld [vmem:[%s6386_s7 + $0x10] ss:$8 sps:$4 sm:$0xff]   ;;  %v4938_v3 = vld [vmem:[%s6386_s7] ss:$8 sps:$4 sm:$0xff]  }
 0x1fd   : > { %v1439_v8 = vmul.f32 1.4142135, %v1431_v6  ;;  %v1473_v9 = vsel %vm930_vm5, %v1469_v63, %v1470_v5  ;;  %v1449_v14 = vsel %vm897_vm14, %v1445_v32, %v1446_v37  ;;  %2522 = vmatprep.subr.bf16.mxu1 %v4937_v60  ;;  %v4940_v63 = vld [vmem:[%s6386_s7 + $0x4] ss:$8 sps:$4 sm:$0xff]   ;;  %v4946_v6 = vld [vmem:[%s6386_s7 + $0xf4] ss:$8 sps:$4 sm:$0xff]  }
 0x1fe   : > { %v4314_v10 = vpack.c.bf16 %v1473_v9, %v1474_v11  ;;  %2523 = vmatpush1.bf16.msra.mxu1 %v4935_v62  ;;  %v4949_v7 = vld [vmem:[%s6386_s7 + $0x154] ss:$8 sps:$4 sm:$0xff]   ;;  %v4947_v9 = vld [vmem:[%s6386_s7 + $0x150] ss:$8 sps:$4 sm:$0xff]   ;;  %v4952_v11 = vld [vmem:[%s6386_s7 + $0xe4] ss:$8 sps:$4 sm:$0xff]  }
 0x1ff   : > { %v1447_v13 = vrot.slane %v1439_v8, 7  ;;  %v1471_v4 = vrot.slane %v1439_v8, 1  ;;  %v1495_v36 = vpack.c.bf16 %v1439_v8, %v1438_v2  ;;  %v4943_v2 = vld [vmem:[%s6386_s7 + $0x164] ss:$8 sps:$4 sm:$0xff]   ;;  %v4944_v8 = vld [vmem:[%s6386_s7 + $0xf0] ss:$8 sps:$4 sm:$0xff]  }
 0x200   : > { %4709 = vmatprep.mubr.msk.bf16.mxu1 %vm5587_vm6, %v4314_v10  ;;  %2524 = vmatprep.subr.bf16.mxu1 %v4943_v2  ;;  %v4958_v10 = vld [vmem:[%s6386_s7 + $0xd4] ss:$8 sps:$4 sm:$0xff]   ;;  %v4979_v32 = vld [vmem:[%s6386_s7 + $0x104] ss:$8 sps:$4 sm:$0xff]   ;;  %v4977_v57 = vld [vmem:[%s6386_s7 + $0x100] ss:$8 sps:$4 sm:$0xff]  }
 0x201   : > { %v1455_v19 = vsel %vm897_vm14, %v1447_v13, %v1440_v17  ;;  %v1472_v47 = vsel %vm930_vm5, %v1470_v5, %v1471_v4  ;;  %v1479_v21 = vsel %vm930_vm5, %v1471_v4, %v1464_v16  ;;  %v1452_v16 = vsel %vm897_vm14, %v1442_v24, %v1443_v26  ;;  %v4941_v5 = vld [vmem:[%s6386_s7 + $0x160] ss:$8 sps:$4 sm:$0xff]   ;;  %v4955_v17 = vld [vmem:[%s6386_s7 + $0x144] ss:$8 sps:$4 sm:$0xff]   ;;  %v4973_v24 = vld [vmem:[%s6386_s7 + $0x114] ss:$8 sps:$4 sm:$0xff]  }
 0x202   : > { %v4296_v25 = vpack.c.bf16 %v1454_v18, %v1455_v19  ;;  %v4317_v52 = vpack.c.bf16 %v1479_v21, %v1472_v47  ;;  %v4299_v31 = vpack.c.bf16 %v1452_v16, %v1453_v30  ;;  %v1448_v40 = vsel %vm897_vm14, %v1446_v37, %v1447_v13  ;;  %2525 = vmatpush1.bf16.msra.mxu1 %v4941_v5  ;;  %v4950_v13 = vld [vmem:[%s6386_s7 + $0xe0] ss:$8 sps:$4 sm:$0xff]   ;;  %v4961_v18 = vld [vmem:[%s6386_s7 + $0x134] ss:$8 sps:$4 sm:$0xff]   ;;  %v4956_v19 = vld [vmem:[%s6386_s7 + $0xd0] ss:$8 sps:$4 sm:$0xff]  }
 0x203   : > { %v4305_v38 = vpack.c.bf16 %v1448_v40, %v1449_v14  ;;  %2526 = vmatprep.subr.bf16.mxu1 %v4949_v7  ;;  %v4953_v4 = vld [vmem:[%s6386_s7 + $0x140] ss:$8 sps:$4 sm:$0xff]   ;;  %v4959_v47 = vld [vmem:[%s6386_s7 + $0x130] ss:$8 sps:$4 sm:$0xff]   ;;  %v4964_v21 = vld [vmem:[%s6386_s7 + $0xc4] ss:$8 sps:$4 sm:$0xff]   ;;  %v5875_v14 = vpop.f32.mrf.mxu1 }
 0x204   : > { %4297 = vmatmul.mubr.msk.bf16.vlgmr.msra.gmra.mxu0 %vm5544_vm0, %v4296_v25  ;;  %4710 = vmatmul.mubr.msk.bf16.gmra.mxu1 %vm5616_vm12, %v4317_v52  ;;  %v4967_v25 = vld [vmem:[%s6386_s7 + $0x124] ss:$8 sps:$4 sm:$0xff]   ;;  %v4962_v52 = vld [vmem:[%s6386_s7 + $0xc0] ss:$8 sps:$4 sm:$0xff]   ;;  %v4968_v16 = vld [vmem:[%s6386_s7 + $0xb0] ss:$8 sps:$4 sm:$0xff]  }
 0x205   : > { %1732 = vmatprep.mubr.bf16.mxu0 %v1493_v28  ;;  %2554 = vmatprep.mubr.bf16.mxu1 %v5154_v54  ;;  %v4965_v26 = vld [vmem:[%s6386_s7 + $0x120] ss:$8 sps:$4 sm:$0xff]   ;;  %v4970_v28 = vld [vmem:[%s6386_s7 + $0xb4] ss:$8 sps:$4 sm:$0xff]   ;;  %v4971_v30 = vld [vmem:[%s6386_s7 + $0x110] ss:$8 sps:$4 sm:$0xff]  }
 0x206   : > { %2470 = vmatpush1.bf16.msra.mxu0 %v4914_v41  ;;  %2527 = vmatpush1.bf16.msra.mxu1 %v4947_v9  ;;  %v4982_v39 = vld [vmem:[%s6386_s7 + $0x94] ss:$8 sps:$4 sm:$0xff]   ;;  %v4980_v0 = vld [vmem:[%s6386_s7 + $0x90] ss:$8 sps:$4 sm:$0xff]   ;;  %v5156_v37 = vmov 1966171168  }
 0x207   : > { %2471 = vmatprep.subr.bf16.mxu0 %v4919_v46  ;;  %2528 = vmatprep.subr.bf16.mxu1 %v4955_v17  ;;  %v1823_v40 = vunpack.c.l.s4 %v5156_v37 }
 0x209   : > { %v1824_v41 = vunpack.c.0.s8 %v1823_v40 }
 0x20a   : > { %2472 = vmatpush1.bf16.msra.mxu0 %v4917_v15  ;;  %2529 = vmatpush1.bf16.msra.mxu1 %v4953_v4 }
 0x20b   : > { %2473 = vmatprep.subr.bf16.mxu0 %v4922_v43  ;;  %2530 = vmatprep.subr.bf16.mxu1 %v4961_v18  ;;  %v5880_v43 = vsub.s32 %v1824_v41, %v5479_v59 }
 0x20c   : > { %4300 = vmatmul.mubr.msk.bf16.gmra.mxu0 %vm5574_vm3, %v4299_v31  ;;  %v4976_v31 = vld [vmem:[%s6386_s7 + $0xa4] ss:$8 sps:$4 sm:$0xff]  }
 0x20d   : > { %1740 = vmatprep.mubr.bf16.mxu0 %v1494_v20  ;;  %v4974_v20 = vld [vmem:[%s6386_s7 + $0xa0] ss:$8 sps:$4 sm:$0xff]  }
 0x20e   : > { %2474 = vmatpush1.bf16.msra.mxu0 %v4920_v50  ;;  %2531 = vmatpush1.bf16.msra.mxu1 %v4959_v47 }
 0x20f   : > { %2475 = vmatprep.subr.bf16.mxu0 %v4925_v44  ;;  %2532 = vmatprep.subr.bf16.mxu1 %v4967_v25 }
 0x212   : > { %2476 = vmatpush1.bf16.msra.mxu0 %v4923_v49  ;;  %2533 = vmatpush1.bf16.msra.mxu1 %v4965_v26 }
 0x213   : > { %2477 = vmatprep.subr.bf16.mxu0 %v4928_v51  ;;  %2534 = vmatprep.subr.bf16.mxu1 %v4973_v24 }
 0x214   : > { %4303 = vmatmul.mubr.msk.bf16.gmra.mxu0 %vm5602_vm8, %v4302_v35  ;;  %v4985_v35 = vld [vmem:[%s6386_s7 + $0x84] ss:$8 sps:$4 sm:$0xff]  }
 0x215   : > { %1748 = vmatprep.mubr.bf16.mxu0 %v1495_v36  ;;  %v4983_v36 = vld [vmem:[%s6386_s7 + $0x80] ss:$8 sps:$4 sm:$0xff]  }
 0x216   : > { %2478 = vmatpush1.bf16.msra.mxu0 %v4926_v53  ;;  %2535 = vmatpush1.bf16.msra.mxu1 %v4971_v30 }
 0x217   : > { %2479 = vmatprep.subr.bf16.mxu0 %v4931_v55  ;;  %2536 = vmatprep.subr.bf16.mxu1 %v4979_v32  ;;  %v1973_v55 = vrot.slane %v5641_v22, %v5880_v43 }
 0x219   : > { %v2031_v5 = vrot.slane %v1973_v55, 4 }
 0x21a   : > { %2480 = vmatpush1.bf16.msra.mxu0 %v4929_v56  ;;  %2537 = vmatpush1.bf16.msra.mxu1 %v4977_v57 }
 0x21b   : > { %2481 = vmatprep.subr.bf16.mxu0 %v4934_v42 }
 0x21c   : > { %4306 = vmatmul.mubr.msk.bf16.gmra.mxu0 %vm5629_vm15, %v4305_v38 }
 0x21e   : > { %2482 = vmatpush1.bf16.msra.mxu0 %v4932_v61  ;;  %v1980_v61 = vrot.slane %v5644_v34, %v5880_v43  ;;  %v5895_v34 = vld [vmem:[%s6385_s6] ss:$0 sm:$0xff] }
 0x21f   : > { %2483 = vmatprep.subr.bf16.mxu0 %v4940_v63 }
 0x222   : > { %2484 = vmatpush1.bf16.msra.mxu0 %v4938_v3 }
 0x223   : > { %2485 = vmatprep.subr.bf16.mxu0 %v4946_v6  ;;  %v1987_v6 = vrot.slane %v5646_v45, %v5880_v43  ;;  %v5899_v45 = vcombine.high %v5895_v34, %v5895_v34 }
 0x225   : > { %v2033_v47 = vrot.slane %v1987_v6, 4 }
 0x226   : > { %2486 = vmatpush2.bf16.msra.mxu0 %v4944_v8 }
 0x227   : > { %2487 = vmatprep.subr.bf16.mxu0 %v4952_v11  ;;  %v2032_v11 = vrot.slane %v1980_v61, 4 }
 0x229   : > { %v2048_v24 = vadd.f32 %v2032_v11, %v1980_v61 }
 0x22a   : > { %2488 = vmatpush2.bf16.msra.mxu0 %v4950_v13 }
 0x22b   : > { %2489 = vmatprep.subr.bf16.mxu0 %v4958_v10 }
 0x22e   : > { %2490 = vmatpush2.bf16.msra.mxu0 %v4956_v19  ;;  %v2047_v19 = vadd.f32 %v2031_v5, %v1973_v55 }
 0x22f   : > { %2491 = vmatprep.subr.bf16.mxu0 %v4964_v21 }
 0x232   : > { %2492 = vmatpush2.bf16.msra.mxu0 %v4962_v52 }
 0x233   : > { %2493 = vmatprep.subr.bf16.mxu0 %v4970_v28 }
 0x236   : > { %2494 = vmatpush2.bf16.msra.mxu0 %v4968_v16  ;;  %v1994_v16 = vrot.slane %v5654_v58, %v5880_v43 }
 0x237   : > { %2495 = vmatprep.subr.bf16.mxu0 %v4976_v31 }
 0x23a   : > { %2496 = vmatpush2.bf16.msra.mxu0 %v4974_v20 }
 0x23b   : > { %2497 = vmatprep.subr.bf16.mxu0 %v4982_v39  ;;  %v2055_v39 = vmul.f32 0.25, %v2047_v19 }
 0x23e   : > { %2498 = vmatpush2.bf16.msra.mxu0 %v4980_v0  ;;  %v2049_v0 = vadd.f32 %v2033_v47, %v1987_v6 }
 0x23f   : > { %2499 = vmatprep.subr.bf16.mxu0 %v4985_v35 }
 0x242   : > { %2500 = vmatpush2.bf16.msra.mxu0 %v4983_v36 }
 0x2b8   : > { %v4707_v38 = vpop.f32.mrf.mxu1 }
 0x2ba   : > { %v1791_v15 = vpop.f32.mrf.mxu1 }
 0x2bc   : > { %v4708_v49 = vpop.f32.mrf.mxu1 }
 0x2be   : > { %v1794_v62 = vpop.f32.mrf.mxu1 }
 0x2c4   : > { %v4517_v46 = vpop.f32.mrf.mxu0  ;;  %v5890_v17 = vpop.f32.mrf.mxu1 }
 0x2c6   : > { %v4518_v50 = vpop.f32.mrf.mxu0  ;;  %v1807_v30 = vpop.f32.mrf.mxu1 }
 0x2c7   : > { %v4519_v44 = vadd.f32 %v4518_v50, %v4517_v46  ;;  %v2034_v46 = vrot.slane %v1994_v16, 4 }
 0x2c8   : > { %v4520_v51 = vpop.f32.mrf.mxu0  ;;  %v5906_v50 = vpop.f32.mrf.mxu1 }
 0x2c9   : > { %v1792_v53 = vadd.f32 %v4519_v44, %v1791_v15  ;;  %v2056_v15 = vmul.f32 0.25, %v2048_v24  ;;  %v2050_v6 = vadd.f32 %v2034_v46, %v1994_v16 }
 0x2ca   : > { %v4521_v56 = vpop.f32.mrf.mxu0 }
 0x2cb   : > { %v1828_v42 = vrot.slane %v1792_v53, %v5880_v43  ;;  %v4522_v60 = vadd.f32 %v4521_v56, %v4520_v51 }
 0x2cc   : > { %v4523_v63 = vpop.f32.mrf.mxu0 }
 0x2cd   : > { %v1886_v2 = vrot.slane %v1828_v42, 4  ;;  %v1795_v3 = vadd.f32 %v4522_v60, %v1794_v62  ;;  %v2008_v60 = vrot.slane %v5671_v27, %v5880_v43 }
 0x2ce   : > { %v4524_v7 = vpop.f32.mrf.mxu0 }
 0x2cf   : > { %v1902_v8 = vadd.f32 %v1886_v2, %v1828_v42  ;;  %v1835_v9 = vrot.slane %v1795_v3, %v5880_v43  ;;  %v4525_v22 = vadd.f32 %v4524_v7, %v4523_v63  ;;  %v2057_v42 = vmul.f32 0.25, %v2049_v0  ;;  %v1810_v7 = vpop.f32.mrf.mxu1 }
 0x2d0   : > { %v4526_v13 = vpop.f32.mrf.mxu0  ;;  %v2036_v27 = vrot.slane %v2008_v60, 4 }
 0x2d1   : > { %v1910_v4 = vmul.f32 0.25, %v1902_v8  ;;  %v1887_v10 = vrot.slane %v1835_v9, 4  ;;  %v1800_v18 = vadd.f32 %v4707_v38, %v4525_v22 }
 0x2d2   : > { %v4527_v21 = vpop.f32.mrf.mxu0 }
 0x2d3   : > { %v1927_v25 = vadd.f32 %v5895_v34, %v1910_v4  ;;  %v1903_v52 = vadd.f32 %v1887_v10, %v1835_v9  ;;  %v1842_v26 = vrot.slane %v1800_v18, %v5880_v43  ;;  %v4528_v28 = vadd.f32 %v4527_v21, %v4526_v13 }
 0x2d4   : > { %v4529_v31 = vpop.f32.mrf.mxu0 }
 0x2d5   : > { %vm1935_vm0 = vcmp.ge.f32.partialorder %v1927_v25, 0.0  ;;  %v1943_v32 = vmul.f32 0.2, %v1927_v25  ;;  %v1911_v20 = vmul.f32 0.25, %v1903_v52  ;;  %v1888_v57 = vrot.slane %v1842_v26, 4 }
 0x2d6   : > { %v1803_v35 = vadd.f32 %v4708_v49, %v4528_v28  ;;  %v4530_v36 = vpop.f32.mrf.mxu0  ;;  %v2001_v49 = vrot.slane %v5663_v12, %v5880_v43  ;;  %v2015_v28 = vrot.slane %v5678_v29, %v5880_v43 }
 0x2d7   : > { %v1928_v37 = vadd.f32 %v5899_v45, %v1911_v20  ;;  %v1904_v40 = vadd.f32 %v1888_v57, %v1842_v26  ;;  %v4531_v38 = vadd.f32 %v4530_v36, %v4529_v31  ;;  %v1951_v41 = vsel %vm1935_vm0, %v1927_v25, %v1943_v32 }
 0x2d8   : > { %v1849_v58 = vrot.slane %v1803_v35, %v5880_v43  ;;  %v4532_v44 = vpop.f32.mrf.mxu0  ;;  %v1959_v51 = vmul.f32 1.4142135, %v1951_v41  ;;  %v2035_v10 = vrot.slane %v2001_v49, 4  ;;  %v1391_v32 = vadd.f32 %v5877_v33, %v5875_v14 }
 0x2d9   : > { %vm1936_vm1 = vcmp.ge.f32.partialorder %v1928_v37, 0.0  ;;  %v1944_v53 = vmul.f32 0.2, %v1928_v37  ;;  %v1912_v55 = vmul.f32 0.25, %v1904_v40  ;;  %v1808_v56 = vadd.f32 %v4531_v38, %v1807_v30 }
 0x2da   : > { %v1889_v61 = vrot.slane %v1849_v58, 4  ;;  %v4533_v62 = vpop.f32.mrf.mxu0  ;;  %v2063_v11 = vadd.f32 %v2055_v39, %v1959_v51  ;;  %v2051_v46 = vadd.f32 %v2035_v10, %v2001_v49  ;;  %v2037_v51 = vrot.slane %v2015_v28, 4 }
 0x2db   : > { %v1929_v63 = vadd.f32 %v5895_v34, %v1912_v55  ;;  %v1856_v2 = vrot.slane %v1808_v56, %v5880_v43  ;;  %v4534_v3 = vadd.f32 %v4533_v62, %v4532_v44  ;;  %v1952_v5 = vsel %vm1936_vm1, %v1928_v37, %v1944_v53 }
 0x2dc   : > { %v1905_v8 = vadd.f32 %v1889_v61, %v1849_v58  ;;  %v4535_v9 = vpop.f32.mrf.mxu0  ;;  %v1960_v22 = vmul.f32 1.4142135, %v1952_v5  ;;  %v2071_v30 = vmul.f32 0.70710677, %v2063_v11  ;;  %v2052_v58 = vadd.f32 %v2036_v27, %v2008_v60 }
 0x2dd   : > { %vm1937_vm3 = vcmp.ge.f32.partialorder %v1929_v63, 0.0  ;;  %v1945_v13 = vmul.f32 0.2, %v1929_v63  ;;  %v1890_v12 = vrot.slane %v1856_v2, 4  ;;  %v1811_v4 = vadd.f32 %v4534_v3, %v1810_v7 }
 0x2de   : > { %v1913_v18 = vmul.f32 0.25, %v1905_v8  ;;  %v4536_v19 = vpop.f32.mrf.mxu0  ;;  %v2064_v47 = vadd.f32 %v2056_v15, %v1960_v22  ;;  %v2058_v15 = vmul.f32 0.25, %v2050_v6  ;;  %v2022_v61 = vrot.slane %v1391_v32, %v5880_v43 }
 0x2df   : > { %v1906_v21 = vadd.f32 %v1890_v12, %v1856_v2  ;;  %v1863_v25 = vrot.slane %v1811_v4, %v5880_v43  ;;  %v4537_v52 = vadd.f32 %v4536_v19, %v4535_v9  ;;  %v1953_v26 = vsel %vm1937_vm3, %v1929_v63, %v1945_v13 }
 0x2e0   : > { %v1930_v24 = vadd.f32 %v5899_v45, %v1913_v18  ;;  %v4538_v16 = vpop.f32.mrf.mxu0  ;;  %v2072_v31 = vmul.f32 0.70710677, %v2064_v47  ;;  %v1961_v36 = vmul.f32 1.4142135, %v1953_v26  ;;  %v2059_v5 = vmul.f32 0.25, %v2051_v46 }
 0x2e1   : > { %v1914_v20 = vmul.f32 0.25, %v1906_v21  ;;  %v1891_v57 = vrot.slane %v1863_v25, 4  ;;  %v1816_v39 = vadd.f32 %v5890_v17, %v4537_v52  ;;  %v2060_v8 = vmul.f32 0.25, %v2052_v58 }
 0x2e2   : > { %vm1938_vm6 = vcmp.ge.f32.partialorder %v1930_v24, 0.0  ;;  %v1946_v0 = vmul.f32 0.2, %v1930_v24  ;;  %v4539_v35 = vpop.f32.mrf.mxu0  ;;  %v5922_v37 = vcombine.low %v2071_v30, %v2072_v31  ;;  %v2065_v56 = vadd.f32 %v2057_v42, %v1961_v36 }
 0x2e3   : > { %v1931_v29 = vadd.f32 %v5895_v34, %v1914_v20  ;;  %v1907_v40 = vadd.f32 %v1891_v57, %v1863_v25  ;;  %v1870_v38 = vrot.slane %v1816_v39, %v5880_v43  ;;  %v4540_v41 = vadd.f32 %v4539_v35, %v4538_v16 }
 0x2e4   : > { %v1954_v14 = vsel %vm1938_vm6, %v1930_v24, %v1946_v0  ;;  %v2073_v22 = vmul.f32 0.70710677, %v2065_v56  ;;  %v2053_v11 = vadd.f32 %v2037_v51, %v2015_v28  ;;  %v2038_v42 = vrot.slane %v2022_v61, 4 }
 0x2e5   : > { %vm1939_vm8 = vcmp.ge.f32.partialorder %v1931_v29, 0.0  ;;  %v1947_v33 = vmul.f32 0.2, %v1931_v29  ;;  %v1915_v44 = vmul.f32 0.25, %v1907_v40  ;;  %v1892_v17 = vrot.slane %v1870_v38, 4 }
 0x2e6   : > { %v1819_v53 = vadd.f32 %v5906_v50, %v4540_v41  ;;  %v1962_v55 = vmul.f32 1.4142135, %v1954_v14  ;;  %v2147_v47 = vrot.slane %v5922_v37, 7  ;;  %v2083_v21 = vand.u32 7, %v5479_v59 }
 0x2e7   : > { %v1955_v62 = vsel %vm1939_vm8, %v1931_v29, %v1947_v33  ;;  %v1932_v63 = vadd.f32 %v5899_v45, %v1915_v44  ;;  %v1908_v2 = vadd.f32 %v1892_v17, %v1870_v38  ;;  %v2163_v28 = vrot.slane %v5922_v37, 1 }
 0x2e8   : > { %v1963_v3 = vmul.f32 1.4142135, %v1955_v62  ;;  %v1877_v49 = vrot.slane %v1819_v53, %v5880_v43  ;;  %v2066_v60 = vadd.f32 %v2058_v15, %v1962_v55  ;;  %v2054_v39 = vadd.f32 %v2038_v42, %v2022_v61  ;;  %v4986_v42 = vld [vmem:[#allocation5 + $0x78] sm:$0xff]  }
 0x2e9   : > { %vm1940_vm12 = vcmp.ge.f32.partialorder %v1932_v63, 0.0  ;;  %v1948_v6 = vmul.f32 0.2, %v1932_v63  ;;  %v1916_v7 = vmul.f32 0.25, %v1908_v2  ;;  %v2061_v40 = vmul.f32 0.25, %v2053_v11  ;;  %4553 = vmatprep.subr.bf16.mxu1 %v4986_v42  ;;  %v5011_v2 = vld [vmem:[%s6390_s11 + $0x38] sm:$0xff]  }
 0x2ea   : > { %v1893_v9 = vrot.slane %v1877_v49, 4  ;;  %v2074_v50 = vmul.f32 0.70710677, %v2066_v60  ;;  %v2067_v4 = vadd.f32 %v2059_v5, %v1963_v3  ;;  %vm5941_vm4 = vcmp.lt.s32.totalorder %v2083_v21, 7  ;;  %v5014_v11 = vld [vmem:[%s6390_s11 + $0x30] sm:$0xff]  }
 0x2eb   : > { %v1956_v13 = vsel %vm1940_vm12, %v1932_v63, %v1948_v6  ;;  %v1933_v12 = vadd.f32 %v5895_v34, %v1916_v7  ;;  %v2090_v34 = vand.u32 7, %v5482_v1  ;;  %v2062_v46 = vmul.f32 0.25, %v2054_v39  ;;  %v5008_v39 = vld [vmem:[#allocation5 + $0x80] sm:$0xff]   ;;  %v5010_v63 = vld [vmem:[%s6390_s11 + $0x78] sm:$0xff]  }
 0x2ec   : > { %v1964_v10 = vmul.f32 1.4142135, %v1956_v13  ;;  %v1909_v27 = vadd.f32 %v1893_v9, %v1877_v49  ;;  %v2140_v18 = vcombine.low %v2073_v22, %v2074_v50  ;;  %v2075_v31 = vmul.f32 0.70710677, %v2067_v4  ;;  %v4987_v13 = vld [vmem:[#allocation5 + $0xb8] sm:$0xff]   ;;  %v4989_v4 = vld [vmem:[#allocation5 + $0x70] sm:$0xff]  }
 0x2ed   : > { %vm1941_vm15 = vcmp.ge.f32.partialorder %v1933_v12, 0.0  ;;  %v1949_v19 = vmul.f32 0.2, %v1933_v12  ;;  %vm5945_vm7 = vcmp.lt.s32.totalorder %v2090_v34, 7  ;;  %v2097_v53 = vand.u32 7, %v5528_v48  ;;  %4713 = vmatprep.subr.bf16.mxu0 %v4987_v13  ;;  %v5013_v50 = vld [vmem:[%s6390_s11 + $0x70] sm:$0xff]  }
 0x2ee   : > { %v2068_v25 = vadd.f32 %v2060_v8, %v1964_v10  ;;  %v1917_v52 = vmul.f32 0.25, %v1909_v27  ;;  %v2148_v26 = vrot.slane %v2140_v18, 7  ;;  %v2164_v24 = vrot.slane %v2140_v18, 1  ;;  %vm4374_vm9 = vmpackc.low %vm5945_vm7, %vm5941_vm4  ;;  %v4990_v10 = vld [vmem:[#allocation5 + $0xb0] sm:$0xff]  }
 0x2ef   : > { %v1957_v16 = vsel %vm1941_vm15, %v1933_v12, %v1949_v19  ;;  %v2177_v30 = vpack.c.bf16 %v2140_v18, %v5922_v37  ;;  %v2104_v55 = vand.u32 7, %v5499_v23  ;;  %vm5965_vm13 = vcmp.gt.s32.totalorder %v2083_v21, 0  ;;  %v4988_v12 = vld [vmem:[#allocation5 + $0x38] sm:$0xff]   ;;  %v4991_v27 = vld [vmem:[#allocation5 + $0x30] sm:$0xff]   ;;  %v4992_v18 = vld [vmem:[#allocation5 + $0x68] sm:$0xff]  }
 0x2f0   : > { %v2076_v32 = vmul.f32 0.70710677, %v2068_v25  ;;  %v1934_v20 = vadd.f32 %v5899_v45, %v1917_v52  ;;  %v2153_v57 = vsel %vm897_vm14, %v2147_v47, %v2148_v26  ;;  %v1965_v0 = vmul.f32 1.4142135, %v1957_v16  ;;  %v4993_v19 = vld [vmem:[#allocation5 + $0xa8] sm:$0xff]   ;;  %v4995_v21 = vld [vmem:[#allocation5 + $0x60] sm:$0xff]  }
 0x2f1   : > { %v2169_v35 = vsel %vm930_vm5, %v2163_v28, %v2164_v24  ;;  %2501 = vmatprep.mubr.bf16.mxu0 %v2177_v30  ;;  %vm5969_vm11 = vcmp.gt.s32.totalorder %v2090_v34, 0  ;;  %vm5973_vm10 = vcmp.lt.s32.totalorder %v2097_v53, 7  ;;  %vm5977_vm0 = vcmp.lt.s32.totalorder %v2104_v55, 7  ;;  %v4996_v25 = vld [vmem:[#allocation5 + $0xa0] sm:$0xff]   ;;  %v5000_v16 = vld [vmem:[#allocation5 + $0x18] sm:$0xff]   ;;  %v5002_v30 = vld [vmem:[#allocation5 + $0x90] sm:$0xff]  }
 0x2f2   : > { %v2141_v36 = vcombine.low %v2075_v31, %v2076_v32  ;;  %vm1942_vm2 = vcmp.ge.f32.partialorder %v1934_v20, 0.0  ;;  %v1950_v29 = vmul.f32 0.2, %v1934_v20  ;;  %v2069_v58 = vadd.f32 %v2061_v40, %v1965_v0  ;;  %vm4368_vm1 = vmpackc.low %vm5969_vm11, %vm5965_vm13  ;;  %v4997_v52 = vld [vmem:[#allocation5 + $0x20] sm:$0xff]   ;;  %v5003_v34 = vld [vmem:[#allocation5 + $0x10] sm:$0xff]  }
 0x2f3   : > { %vm6400_vm3 = vmpackc.low %vm5977_vm0, %vm5973_vm10  ;;  %vm6007_vm6 = vcmp.gt.s32.totalorder %v2097_v53, 0  ;;  %vm6011_vm8 = vcmp.gt.s32.totalorder %v2104_v55, 0  ;;  %v5004_v31 = vld [vmem:[#allocation5 + $0x48] sm:$0xff]   ;;  %v5009_v0 = vld [vmem:[#allocation5] sm:$0xff]   ;;  %v5157_v48 = vmov 0.0   ;;  %vm5158_vm7 = vmmov 0  }
 0x2f4   : > { %v1958_v45 = vsel %vm1942_vm2, %v1934_v20, %v1950_v29  ;;  %v2165_v41 = vrot.slane %v2141_v36, 1  ;;  %v2149_v15 = vrot.slane %v2141_v36, 7  ;;  %v2077_v56 = vmul.f32 0.70710677, %v2069_v58  ;;  %vm6399_vm12 = vmpackc.low %vm6011_vm8, %vm6007_vm6  ;;  %v5005_v32 = vld [vmem:[#allocation5 + $0x88] sm:$0xff]   ;;  %v5012_v23 = vld [vmem:[%s6390_s11 + $0xb8] sm:$0xff]  }
 0x2f5   : > { %v1966_v14 = vmul.f32 1.4142135, %v1958_v45  ;;  %v5006_v20 = vld [vmem:[#allocation5 + $0x8] sm:$0xff]   ;;  %vm6444_vm4 = vmpackc.low %vm6011_vm8, %vm6007_vm6 }
 0x2f6   : > { %v2168_v33 = vsel %vm930_vm5, %v2164_v24, %v2165_v41  ;;  %v2152_v44 = vsel %vm897_vm14, %v2148_v26, %v2149_v15  ;;  %v4998_v26 = vld [vmem:[#allocation5 + $0x58] sm:$0xff]  }
 0x2f7   : > { %v2070_v17 = vadd.f32 %v2062_v46, %v1966_v14  ;;  %v4375_v51 = vpack.c.bf16 %v2168_v33, %v2169_v35  ;;  %v4999_v24 = vld [vmem:[#allocation5 + $0x98] sm:$0xff]  }
 0x2f9   : > { %v2078_v61 = vmul.f32 0.70710677, %v2070_v17  ;;  %4376 = vmatmul.mubr.msk.bf16.vlgmr.msra.gmra.mxu1 %vm4374_vm9, %v4375_v51 }
 0x2fa   : > { %2564 = vmatprep.mubr.bf16.mxu1 %v5154_v54  ;;  %4554 = vmatpush3.bf16.msra.mxu1 %v4988_v12 }
 0x2fb   : > { %v2142_v62 = vcombine.low %v2077_v56, %v2078_v61  ;;  %4555 = vmatprep.subr.bf16.mxu1 %v4989_v4 }
 0x2fd   : > { %v2150_v3 = vrot.slane %v2142_v62, 7  ;;  %v2166_v49 = vrot.slane %v2142_v62, 1  ;;  %v2178_v54 = vpack.c.bf16 %v2142_v62, %v2141_v36 }
 0x2fe   : > { %4556 = vmatpush3.bf16.msra.mxu1 %v4991_v27 }
 0x2ff   : > { %v2154_v60 = vsel %vm897_vm14, %v2150_v3, %v2147_v47  ;;  %v2167_v5 = vsel %vm930_vm5, %v2165_v41, %v2166_v49  ;;  %v2170_v6 = vsel %vm930_vm5, %v2166_v49, %v2163_v28  ;;  %v2151_v7 = vsel %vm897_vm14, %v2149_v15, %v2150_v3  ;;  %v4994_v47 = vld [vmem:[#allocation5 + $0x28] sm:$0xff]   ;;  %4557 = vmatprep.subr.bf16.mxu1 %v4992_v18  ;;  %v5001_v28 = vld [vmem:[#allocation5 + $0x50] sm:$0xff]   ;;  %v4380_v41 = vld [vmem:[%s6387_s8] ss:$0 sm:$0xff] }
 0x300   : > { %v4369_v8 = vpack.c.bf16 %v2153_v57, %v2154_v60  ;;  %v4378_v9 = vpack.c.bf16 %v2170_v6, %v2167_v5  ;;  %v4372_v22 = vpack.c.bf16 %v2151_v7, %v2152_v44  ;;  %v5007_v57 = vld [vmem:[#allocation5 + $0x40] sm:$0xff]  }
 0x302   : > { %4370 = vmatmul.mubr.msk.bf16.vlgmr.msra.gmra.mxu0 %vm4368_vm1, %v4369_v8  ;;  %4379 = vmatmul.mubr.msk.bf16.gmra.mxu1 %vm6400_vm3, %v4378_v9 }
 0x303   : > { %2511 = vmatprep.mubr.bf16.mxu0 %v2178_v54  ;;  %4714 = vmatpush3.bf16.msra.mxu0 %v4987_v13 }
 0x304   : > { %4715 = vmatprep.subr.bf16.mxu0 %v4990_v10  ;;  %4558 = vmatpush3.bf16.msra.mxu1 %v4994_v47 }
 0x305   : > { %4559 = vmatprep.subr.bf16.mxu1 %v4995_v21 }
 0x307   : > { %4716 = vmatpush3.bf16.msra.mxu0 %v4990_v10 }
 0x308   : > { %4717 = vmatprep.subr.bf16.mxu0 %v4993_v19  ;;  %4560 = vmatpush3.bf16.msra.mxu1 %v4997_v52 }
 0x309   : > { %4561 = vmatprep.subr.bf16.mxu1 %v4998_v26 }
 0x30a   : > { %4373 = vmatmul.mubr.msk.bf16.gmra.mxu0 %vm6399_vm12, %v4372_v22 }
 0x30b   : > { %4718 = vmatpush3.bf16.msra.mxu0 %v4993_v19 }
 0x30c   : > { %4719 = vmatprep.subr.bf16.mxu0 %v4996_v25  ;;  %4562 = vmatpush3.bf16.msra.mxu1 %v5000_v16 }
 0x30d   : > { %4563 = vmatprep.subr.bf16.mxu1 %v5001_v28 }
 0x30f   : > { %4720 = vmatpush3.bf16.msra.mxu0 %v4996_v25 }
 0x310   : > { %4721 = vmatprep.subr.bf16.mxu0 %v4999_v24  ;;  %4564 = vmatpush3.bf16.msra.mxu1 %v5003_v34 }
 0x311   : > { %4565 = vmatprep.subr.bf16.mxu1 %v5004_v31 }
 0x313   : > { %4722 = vmatpush3.bf16.msra.mxu0 %v4999_v24 }
 0x314   : > { %4723 = vmatprep.subr.bf16.mxu0 %v5002_v30  ;;  %4566 = vmatpush3.bf16.msra.mxu1 %v5006_v20 }
 0x315   : > { %4567 = vmatprep.subr.bf16.mxu1 %v5007_v57 }
 0x317   : > { %4724 = vmatpush3.bf16.msra.mxu0 %v5002_v30 }
 0x318   : > { %4725 = vmatprep.subr.bf16.mxu0 %v5005_v32  ;;  %4568 = vmatpush3.bf16.msra.mxu1 %v5009_v0 }
 0x319   : > { %4591 = vmatprep.subr.bf16.mxu1 %v5010_v63 }
 0x31b   : > { %4726 = vmatpush3.bf16.msra.mxu0 %v5005_v32 }
 0x31c   : > { %4727 = vmatprep.subr.bf16.mxu0 %v5008_v39 }
 0x31f   : > { %4728 = vmatpush3.bf16.msra.mxu0 %v5008_v39 }
 0x320   : > { %4733 = vmatprep.subr.bf16.mxu0 %v5157_v48 }
 0x3b9   : > { %v2556_v35 = vpop.f32.mrf.mxu1 }
 0x3bb   : > { %v2558_v36 = vpop.f32.mrf.mxu1 }
 0x3bd   : > { %v2560_v29 = vpop.f32.mrf.mxu1 }
 0x3bf   : > { %v2562_v40 = vpop.f32.mrf.mxu1 }
 0x3c2   : > { %v2503_v45 = vpop.f32.mrf.mxu0  ;;  %v2566_v33 = vpop.f32.mrf.mxu1 }
 0x3c3   : > { %v2557_v15 = vadd.f32 %v2556_v35, %v2503_v45 }
 0x3c4   : > { %v2505_v46 = vpop.f32.mrf.mxu0  ;;  %v2568_v61 = vpop.f32.mrf.mxu1 }
 0x3c5   : > { %v2582_v58 = vadd.f32 %v4380_v41, %v2557_v15  ;;  %v6027_v14 = vadd.f32 %v2558_v36, %v2505_v46  ;;  %v5016_v15 = vld [vmem:[%s6390_s11 + $0x68] sm:$0xff]  }
 0x3c6   : > { %v2507_v44 = vpop.f32.mrf.mxu0  ;;  %v2570_v8 = vpop.f32.mrf.mxu1  ;;  %v5017_v46 = vld [vmem:[%s6390_s11 + $0x28] sm:$0xff]  }
 0x3c7   : > { %v2561_v17 = vadd.f32 %v2560_v29, %v2507_v44  ;;  %v2590_v53 = vmul.f32 0.2, %v2582_v58  ;;  %vm2586_vm15 = vcmp.ge.f32.partialorder %v2582_v58, 0.0  ;;  %v5020_v44 = vld [vmem:[%s6390_s11 + $0x20] sm:$0xff]  }
 0x3c8   : > { %v2509_v51 = vpop.f32.mrf.mxu0 }
 0x3c9   : > { %v2583_v55 = vadd.f32 %v4380_v41, %v2561_v17  ;;  %v6029_v56 = vadd.f32 %v2562_v40, %v2509_v51  ;;  %v2594_v60 = vsel %vm2586_vm15, %v2582_v58, %v2590_v53  ;;  %v5018_v58 = vld [vmem:[%s6390_s11 + $0xa8] sm:$0xff]   ;;  %v5021_v17 = vld [vmem:[%s6390_s11 + $0xa0] sm:$0xff]   ;;  %v5022_v51 = vld [vmem:[%s6390_s11 + $0x58] sm:$0xff]   ;;  %vm3101_vm15 = vcmask 1043456  }
 0x3ca   : > { %v2513_v62 = vpop.f32.mrf.mxu0  ;;  %v2598_v13 = vmul.f32 1.4142135, %v2594_v60  ;;  %v5023_v53 = vld [vmem:[%s6390_s11 + $0x18] sm:$0xff]   ;;  %v5030_v60 = vld [vmem:[%s6390_s11 + $0x88] sm:$0xff]  }
 0x3cb   : > { %vm2587_vm2 = vcmp.ge.f32.partialorder %v2583_v55, 0.0  ;;  %v2591_v3 = vmul.f32 0.2, %v2583_v55  ;;  %v2567_v49 = vadd.f32 %v2566_v33, %v2513_v62  ;;  %v5019_v33 = vld [vmem:[%s6390_s11 + $0x60] sm:$0xff]   ;;  %v5026_v62 = vld [vmem:[%s6390_s11 + $0x10] sm:$0xff]  }
 0x3cc   : > { %v2515_v54 = vpop.f32.mrf.mxu0  ;;  %v2614_v21 = vrot.slane %v2598_v13, 1  ;;  %v2602_v30 = vrot.slane %v2598_v13, 7 }
 0x3cd   : > { %v2595_v5 = vsel %vm2587_vm2, %v2583_v55, %v2591_v3  ;;  %v6031_v6 = vadd.f32 %v2568_v61, %v2515_v54  ;;  %v2584_v9 = vadd.f32 %v4380_v41, %v2567_v49  ;;  %v5024_v55 = vld [vmem:[%s6390_s11 + $0x98] sm:$0xff]   ;;  %v5025_v61 = vld [vmem:[%s6390_s11 + $0x50] sm:$0xff]   ;;  %v5028_v49 = vld [vmem:[%s6390_s11 + $0x48] sm:$0xff]  }
 0x3ce   : > { %v2599_v7 = vmul.f32 1.4142135, %v2595_v5  ;;  %v2517_v22 = vpop.f32.mrf.mxu0  ;;  %v5027_v3 = vld [vmem:[%s6390_s11 + $0x90] sm:$0xff]   ;;  %v5029_v54 = vld [vmem:[%s6390_s11 + $0x8] sm:$0xff]   ;;  %v5031_v5 = vld [vmem:[%s6390_s11 + $0x40] sm:$0xff]  }
 0x3cf   : > { %v2571_v42 = vadd.f32 %v2570_v8, %v2517_v22  ;;  %vm2588_vm12 = vcmp.ge.f32.partialorder %v2584_v9, 0.0  ;;  %v2592_v12 = vmul.f32 0.2, %v2584_v9  ;;  %v5033_v8 = vld [vmem:[%s6390_s11 + $0x80] sm:$0xff]  }
 0x3d0   : > { %v2628_v27 = vpack.c.bf16 %v2599_v7, %v2598_v13  ;;  %v2615_v18 = vrot.slane %v2599_v7, 1  ;;  %v2603_v26 = vrot.slane %v2599_v7, 7  ;;  %v5032_v7 = vld [vmem:[%s6390_s11] sm:$0xff]   ;;  %v2519_v22 = vpop.f32.mrf.mxu0 }
 0x3d1   : > { %v2585_v4 = vadd.f32 %v4380_v41, %v2571_v42  ;;  %v2596_v10 = vsel %vm2588_vm12, %v2584_v9, %v2592_v12  ;;  %v5015_v41 = vld [vmem:[%s6390_s11 + $0xb0] sm:$0xff]   ;;  %v2572_v9 = vpop.f32.mrf.mxu1 }
 0x3d2   : > { %v2600_v19 = vmul.f32 1.4142135, %v2596_v10  ;;  %2856 = vmatprep.mubr.bf16.mxu1 %v2628_v27  ;;  %v2620_v28 = vsel %vm930_vm5, %v2614_v21, %v2615_v18  ;;  %v2608_v20 = vsel %vm897_vm14, %v2602_v30, %v2603_v26 }
 0x3d3   : > { %vm2589_vm3 = vcmp.ge.f32.partialorder %v2585_v4, 0.0  ;;  %v2593_v47 = vmul.f32 0.2, %v2585_v4 }
 0x3d4   : > { %v2616_v25 = vrot.slane %v2600_v19, 1  ;;  %v2604_v38 = vrot.slane %v2600_v19, 7 }
 0x3d5   : > { %v2597_v52 = vsel %vm2589_vm3, %v2585_v4, %v2593_v47  ;;  %vm6443_vm3 = vmpackc.low %vm5977_vm0, %vm5973_vm10 }
 0x3d6   : > { %v2601_v24 = vmul.f32 1.4142135, %v2597_v52  ;;  %v2619_v16 = vsel %vm930_vm5, %v2615_v18, %v2616_v25  ;;  %v2607_v40 = vsel %vm897_vm14, %v2603_v26, %v2604_v38 }
 0x3d7   : > { %v4412_v32 = vpack.c.bf16 %v2619_v16, %v2620_v28  ;;  %v3005_v28 = vrot.slane %v6027_v14, %v5880_v43 }
 0x3d8   : > { %v2605_v34 = vrot.slane %v2601_v24, 7  ;;  %v2617_v31 = vrot.slane %v2601_v24, 1  ;;  %v2629_v29 = vpack.c.bf16 %v2601_v24, %v2600_v19 }
 0x3d9   : > { %4729 = vmatprep.mubr.msk.bf16.mxu0 %vm4374_vm9, %v4412_v32 }
 0x3da   : > { %v2609_v57 = vsel %vm897_vm14, %v2605_v34, %v2602_v30  ;;  %v2618_v39 = vsel %vm930_vm5, %v2616_v25, %v2617_v31  ;;  %v2621_v0 = vsel %vm930_vm5, %v2617_v31, %v2614_v21  ;;  %v2606_v37 = vsel %vm897_vm14, %v2604_v38, %v2605_v34 }
 0x3db   : > { %v4406_v35 = vpack.c.bf16 %v2608_v20, %v2609_v57  ;;  %v4415_v36 = vpack.c.bf16 %v2621_v0, %v2618_v39  ;;  %v4409_v45 = vpack.c.bf16 %v2606_v37, %v2607_v40  ;;  %v3012_v30 = vrot.slane %v6029_v56, %v5880_v43  ;;  %v4417_v57 = vld [vmem:[%s6389_s10] ss:$0 sm:$0xff] }
 0x3dc   : > { %v2977_v37 = vcombine.high %v4417_v57, %v4417_v57 }
 0x3dd   : > { %4407 = vmatmul.mubr.msk.bf16.vlgmr.msra.gmra.mxu1 %vm4368_vm1, %v4406_v35  ;;  %4730 = vmatmul.mubr.msk.bf16.vlgmr.msra.gmra.mxu0 %vm6443_vm3, %v4415_v36  ;;  %v3032_v38 = vrot.slane %v3012_v30, 4 }
 0x3de   : > { %2864 = vmatprep.mubr.bf16.mxu1 %v2629_v29  ;;  %4592 = vmatpush3.bf16.msra.mxu1 %v5011_v2  ;;  %v3031_v29 = vrot.slane %v3005_v28, 4  ;;  %v2573_v2 = vadd.f32 %v2572_v9, %v2519_v22 }
 0x3df   : > { %4734 = vmatpush3.bf16.msra.mxu0 %v5012_v23  ;;  %4593 = vmatprep.subr.bf16.mxu1 %v5013_v50 }
 0x3e0   : > { %4735 = vmatprep.subr.bf16.mxu0 %v5157_v48  ;;  %4749 = vmatprep.mubr.msk.bf16.mxu0 %vm5158_vm7, %v5157_v48 }
 0x3e2   : > { %4594 = vmatpush3.bf16.msra.mxu1 %v5014_v11 }
 0x3e3   : > { %4736 = vmatpush3.bf16.msra.mxu0 %v5015_v41  ;;  %4595 = vmatprep.subr.bf16.mxu1 %v5016_v15  ;;  %v3039_v41 = vadd.f32 %v3031_v29, %v3005_v28  ;;  %v3040_v15 = vadd.f32 %v3032_v38, %v3012_v30 }
 0x3e4   : > { %4737 = vmatprep.subr.bf16.mxu0 %v5157_v48 }
 0x3e5   : > { %4410 = vmatmul.mubr.msk.bf16.gmra.mxu1 %vm6444_vm4, %v4409_v45 }
 0x3e6   : > { %4596 = vmatpush3.bf16.msra.mxu1 %v5017_v46 }
 0x3e7   : > { %4738 = vmatpush3.bf16.msra.mxu0 %v5018_v58  ;;  %4597 = vmatprep.subr.bf16.mxu1 %v5019_v33  ;;  %v3019_v58 = vrot.slane %v6031_v6, %v5880_v43 }
 0x3e8   : > { %4739 = vmatprep.subr.bf16.mxu0 %v5157_v48 }
 0x3ea   : > { %4598 = vmatpush3.bf16.msra.mxu1 %v5020_v44 }
 0x3eb   : > { %4740 = vmatpush3.bf16.msra.mxu0 %v5021_v17  ;;  %4599 = vmatprep.subr.bf16.mxu1 %v5022_v51 }
 0x3ec   : > { %4741 = vmatprep.subr.bf16.mxu0 %v5157_v48 }
 0x3ee   : > { %4600 = vmatpush3.bf16.msra.mxu1 %v5023_v53 }
 0x3ef   : > { %4742 = vmatpush3.bf16.msra.mxu0 %v5024_v55  ;;  %4601 = vmatprep.subr.bf16.mxu1 %v5025_v61  ;;  %v3026_v55 = vrot.slane %v2573_v2, %v5880_v43 }
 0x3f0   : > { %4743 = vmatprep.subr.bf16.mxu0 %v5157_v48 }
 0x3f1   : > { %v3034_v22 = vrot.slane %v3026_v55, 4 }
 0x3f2   : > { %4602 = vmatpush3.bf16.msra.mxu1 %v5026_v62 }
 0x3f3   : > { %4744 = vmatpush3.bf16.msra.mxu0 %v5027_v3  ;;  %4603 = vmatprep.subr.bf16.mxu1 %v5028_v49  ;;  %v3043_v3 = vmul.f32 0.25, %v3039_v41 }
 0x3f4   : > { %4745 = vmatprep.subr.bf16.mxu0 %v5157_v48 }
 0x3f6   : > { %4604 = vmatpush3.bf16.msra.mxu1 %v5029_v54  ;;  %v3044_v54 = vmul.f32 0.25, %v3040_v15 }
 0x3f7   : > { %4746 = vmatpush3.bf16.msra.mxu0 %v5030_v60  ;;  %4605 = vmatprep.subr.bf16.mxu1 %v5031_v5  ;;  %v3033_v60 = vrot.slane %v3019_v58, 4 }
 0x3f8   : > { %4747 = vmatprep.subr.bf16.mxu0 %v5157_v48 }
 0x3fa   : > { %4606 = vmatpush3.bf16.msra.mxu1 %v5032_v7 }
 0x3fb   : > { %4748 = vmatpush3.bf16.msra.mxu0 %v5033_v8 }
 0x49d   : > { %v4569_v42 = vpop.f32.mrf.mxu1  ;;  %v4731_v13 = vpop.f32.mrf.mxu0 }
 0x49f   : > { %v4570_v12 = vpop.f32.mrf.mxu1  ;;  %v2907_v4 = vpop.f32.mrf.mxu0 }
 0x4a0   : > { %v4571_v10 = vadd.f32 %v4570_v12, %v4569_v42 }
 0x4a1   : > { %v4572_v27 = vpop.f32.mrf.mxu1  ;;  %v4732_v18 = vpop.f32.mrf.mxu0 }
 0x4a2   : > { %v2908_v19 = vadd.f32 %v4571_v10, %v2907_v4  ;;  %v3041_v4 = vadd.f32 %v3033_v60, %v3019_v58 }
 0x4a3   : > { %v4573_v47 = vpop.f32.mrf.mxu1  ;;  %v2910_v52 = vpop.f32.mrf.mxu0 }
 0x4a4   : > { %v2928_v21 = vrot.slane %v2908_v19, %v5880_v43  ;;  %v4574_v25 = vadd.f32 %v4573_v47, %v4572_v27 }
 0x4a5   : > { %v4575_v26 = vpop.f32.mrf.mxu1 }
 0x4a6   : > { %v2954_v24 = vrot.slane %v2928_v21, 4  ;;  %v2911_v16 = vadd.f32 %v4574_v25, %v2910_v52 }
 0x4a7   : > { %v4576_v34 = vpop.f32.mrf.mxu1 }
 0x4a8   : > { %v2962_v31 = vadd.f32 %v2954_v24, %v2928_v21  ;;  %v2935_v32 = vrot.slane %v2911_v16, %v5880_v43  ;;  %v4577_v20 = vadd.f32 %v4576_v34, %v4575_v26  ;;  %v3042_v21 = vadd.f32 %v3034_v22, %v3026_v55 }
 0x4a9   : > { %v4578_v39 = vpop.f32.mrf.mxu1  ;;  %v3045_v24 = vmul.f32 0.25, %v3041_v4  ;;  %v5160_v16 = vmov 1983009808  }
 0x4aa   : > { %v2966_v0 = vmul.f32 0.25, %v2962_v31  ;;  %v2955_v35 = vrot.slane %v2935_v32, 4  ;;  %v2916_v36 = vadd.f32 %v4731_v13, %v4577_v20  ;;  %v3082_v28 = vunpack.c.l.s4 %v5160_v16 }
 0x4ab   : > { %v4579_v14 = vpop.f32.mrf.mxu1  ;;  %v3046_v31 = vmul.f32 0.25, %v3042_v21 }
 0x4ac   : > { %v2979_v40 = vadd.f32 %v4417_v57, %v2966_v0  ;;  %v2963_v45 = vadd.f32 %v2955_v35, %v2935_v32  ;;  %v2942_v56 = vrot.slane %v2916_v36, %v5880_v43  ;;  %v4580_v63 = vadd.f32 %v4579_v14, %v4578_v39 }
 0x4ad   : > { %v3083_v39 = vunpack.c.0.s8 %v3082_v28  ;;  %v3262_v0 = vand.u32 3, %v5479_v59  ;;  %v3269_v35 = vand.u32 3, %v5482_v1 }
 0x4ae   : > { %vm2983_vm9 = vcmp.ge.f32.partialorder %v2979_v40, 0.0  ;;  %v2987_v23 = vmul.f32 0.2, %v2979_v40  ;;  %v2967_v50 = vmul.f32 0.25, %v2963_v45  ;;  %v2956_v11 = vrot.slane %v2942_v56, 4 }
 0x4af   : > { %v2919_v46 = vadd.f32 %v4732_v18, %v4580_v63  ;;  %v6171_v14 = vsub.s32 %v3083_v39, %v5479_v59  ;;  %vm6173_vm0 = vcmp.gt.s32.totalorder %v3262_v0, 0  ;;  %vm6177_vm1 = vcmp.gt.s32.totalorder %v3269_v35, 0 }
 0x4b0   : > { %v2991_v33 = vsel %vm2983_vm9, %v2979_v40, %v2987_v23  ;;  %v2980_v44 = vadd.f32 %v2977_v37, %v2967_v50  ;;  %v2964_v17 = vadd.f32 %v2956_v11, %v2942_v56  ;;  %vm6184_vm6 = vcmp.lt.s32.totalorder %v3262_v0, 3  ;;  %vm4443_vm12 = vmpackc.low %vm6177_vm1, %vm6173_vm0 }
 0x4b1   : > { %v2995_v51 = vmul.f32 1.4142135, %v2991_v33  ;;  %v2949_v53 = vrot.slane %v2919_v46, %v5880_v43  ;;  %v5159_v43 = vmov 1935823168   ;;  %vm6188_vm8 = vcmp.lt.s32.totalorder %v3269_v35, 3 }
 0x4b2   : > { %vm2984_vm13 = vcmp.ge.f32.partialorder %v2980_v44, 0.0  ;;  %v2988_v61 = vmul.f32 0.2, %v2980_v44  ;;  %v2968_v62 = vmul.f32 0.25, %v2964_v17  ;;  %v3064_v27 = vunpack.c.l.s4 %v5159_v43  ;;  %vm4446_vm2 = vmpackc.low %vm6188_vm8, %vm6184_vm6 }
 0x4b3   : > { %v2957_v49 = vrot.slane %v2949_v53, 4  ;;  %v3047_v8 = vadd.f32 %v3043_v3, %v2995_v51  ;;  %vm4097_vm6 = vcmask 3072  }
 0x4b4   : > { %v2992_v5 = vsel %vm2984_vm13, %v2980_v44, %v2988_v61  ;;  %v2981_v7 = vadd.f32 %v4417_v57, %v2968_v62  ;;  %v3065_v34 = vunpack.c.0.s8 %v3064_v27 }
 0x4b5   : > { %v2996_v9 = vmul.f32 1.4142135, %v2992_v5  ;;  %v2965_v6 = vadd.f32 %v2957_v49, %v2949_v53  ;;  %v3051_v19 = vmul.f32 0.70710677, %v3047_v8 }
 0x4b6   : > { %vm2985_vm11 = vcmp.ge.f32.partialorder %v2981_v7, 0.0  ;;  %v2989_v42 = vmul.f32 0.2, %v2981_v7  ;;  %v6168_v36 = vsub.s32 %v3065_v34, %v5479_v59 }
 0x4b7   : > { %v3048_v13 = vadd.f32 %v3044_v54, %v2996_v9  ;;  %v2969_v12 = vmul.f32 0.25, %v2965_v6 }
 0x4b8   : > { %v2993_v10 = vsel %vm2985_vm11, %v2981_v7, %v2989_v42 }
 0x4b9   : > { %v2982_v18 = vadd.f32 %v2977_v37, %v2969_v12  ;;  %v3052_v47 = vmul.f32 0.70710677, %v3048_v13  ;;  %v2997_v25 = vmul.f32 1.4142135, %v2993_v10 }
 0x4bb   : > { %vm2986_vm10 = vcmp.ge.f32.partialorder %v2982_v18, 0.0  ;;  %v2990_v52 = vmul.f32 0.2, %v2982_v18  ;;  %v3059_v26 = vcombine.low %v3051_v19, %v3052_v47  ;;  %v3049_v20 = vadd.f32 %v3045_v24, %v2997_v25 }
 0x4bd   : > { %v2994_v30 = vsel %vm2986_vm10, %v2982_v18, %v2990_v52  ;;  %v3053_v29 = vmul.f32 0.70710677, %v3049_v20  ;;  %v6182_v56 = vrot.slane %v3059_v26, %v6168_v36  ;;  %v3284_v1 = vrot.slane %v3059_v26, 7 }
 0x4be   : > { %v2998_v32 = vmul.f32 1.4142135, %v2994_v30  ;;  %v3292_v15 = vrot.slane %v3059_v26, 1 }
 0x4c0   : > { %v3050_v57 = vadd.f32 %v3046_v31, %v2998_v32 }
 0x4c2   : > { %v3054_v38 = vmul.f32 0.70710677, %v3050_v57 }
 0x4c4   : > { %v3060_v37 = vcombine.low %v3053_v29, %v3054_v38 }
 0x4c6   : > { %v3076_v23 = vrot.slane %v3060_v37, %v6168_v36  ;;  %v3285_v50 = vrot.slane %v3060_v37, 7  ;;  %v3299_v11 = vpack.c.bf16 %v3060_v37, %v3059_v26  ;;  %v3293_v41 = vrot.slane %v3060_v37, 1 }
 0x4c8   : > { %v3079_v46 = vcombine.low %v6182_v56, %v3076_v23  ;;  %v3080_v58 = vcombine.high %v6182_v56, %v3076_v23  ;;  %3532 = vmatprep.mubr.bf16.mxu1 %v3299_v11  ;;  %v3286_v33 = vsel %vm897_vm14, %v3284_v1, %v3285_v50  ;;  %v3287_v44 = vsel %vm897_vm14, %v3285_v50, %v3284_v1 }
 0x4c9   : > { %v4444_v17 = vpack.c.bf16 %v3286_v33, %v3287_v44  ;;  %v3294_v51 = vsel %vm930_vm5, %v3292_v15, %v3293_v41  ;;  %v3295_v53 = vsel %vm930_vm5, %v3293_v41, %v3292_v15 }
 0x4ca   : > { %v3087_v55 = vrot.slane %v3079_v46, %v6171_v14  ;;  %v3094_v61 = vrot.slane %v3080_v58, %v6171_v14  ;;  %v4447_v62 = vpack.c.bf16 %v3295_v53, %v3294_v51 }
 0x4cb   : > { %4445 = vmatmul.mubr.msk.bf16.vlgmr.msra.gmra.mxu1 %vm4443_vm12, %v4444_v17 }
 0x4cc   : > { %v3095_v3 = vcombine.high %v3087_v55, %v3087_v55  ;;  %v3096_v49 = vcombine.high %v3094_v61, %v3094_v61  ;;  %v3102_v54 = vsel %vm3101_vm15, %v3087_v55, 0.0  ;;  %v3116_v60 = vsel %vm3101_vm15, %v3094_v61, 0.0  ;;  %4750 = vmatmul.mubr.msk.bf16.vlgmr.msra.gmra.mxu0 %vm4446_vm2, %v4447_v62 }
 0x4cd   : > { %v3103_v59 = vrot.slane %v3102_v54, 4  ;;  %v3117_v5 = vrot.slane %v3116_v60, 4 }
 0x4ce   : > { %v3109_v7 = vsel %vm3101_vm15, %v3095_v3, 0.0  ;;  %v3123_v8 = vsel %vm3101_vm15, %v3096_v49, 0.0 }
 0x4cf   : > { %v3104_v9 = vadd.f32 %v3103_v59, %v3102_v54  ;;  %v3110_v6 = vrot.slane %v3109_v7, 4  ;;  %v3118_v22 = vadd.f32 %v3117_v5, %v3116_v60  ;;  %v3124_v42 = vrot.slane %v3123_v8, 4 }
 0x4d1   : > { %v3105_v13 = vrot.slane %v3104_v9, 2  ;;  %v3111_v12 = vadd.f32 %v3110_v6, %v3109_v7  ;;  %v3119_v4 = vrot.slane %v3118_v22, 2  ;;  %v3125_v10 = vadd.f32 %v3124_v42, %v3123_v8 }
 0x4d3   : > { %v3106_v43 = vadd.f32 %v3105_v13, %v3104_v9  ;;  %v3112_v27 = vrot.slane %v3111_v12, 2  ;;  %v3120_v18 = vadd.f32 %v3119_v4, %v3118_v22  ;;  %v3126_v19 = vrot.slane %v3125_v10, 2 }
 0x4d5   : > { %v3107_v47 = vrot.slane %v3106_v43, 1  ;;  %v3113_v21 = vadd.f32 %v3112_v27, %v3111_v12  ;;  %v3121_v25 = vrot.slane %v3120_v18, 1  ;;  %v3127_v52 = vadd.f32 %v3126_v19, %v3125_v10 }
 0x4d7   : > { %v3108_v26 = vadd.f32 %v3107_v47, %v3106_v43  ;;  %v3114_v24 = vrot.slane %v3113_v21, 1  ;;  %v3122_v16 = vadd.f32 %v3121_v25, %v3120_v18  ;;  %v3128_v28 = vrot.slane %v3127_v52, 1 }
 0x4d9   : > { %v3115_v30 = vadd.f32 %v3114_v24, %v3113_v21  ;;  %v3129_v34 = vadd.f32 %v3128_v28, %v3127_v52  ;;  %v3131_v31 = vmul.f32 0.25, %v3108_v26  ;;  %v3133_v20 = vmul.f32 0.25, %v3122_v16 }
 0x4db   : > { %v3132_v32 = vmul.f32 0.25, %v3115_v30  ;;  %v3134_v57 = vmul.f32 0.25, %v3129_v34 }
 0x4dd   : > { %v3139_v39 = vcombine.low %v3131_v31, %v3132_v32  ;;  %v3140_v0 = vcombine.low %v3133_v20, %v3134_v57 }
 0x4df   : > { %v3147_v35 = vrot.slane %v3139_v39, %v6171_v14  ;;  %v3154_v29 = vrot.slane %v3140_v0, %v6171_v14 }
 0x4e1   : > { %v3155_v38 = vcombine.low %v3147_v35, %v3154_v29  ;;  %v3156_v37 = vcombine.high %v3147_v35, %v3154_v29 }
 0x4e3   : > { %v3159_v40 = vsub.f32 %v6182_v56, %v3155_v38  ;;  %v3160_v45 = vsub.f32 %v3076_v23, %v3156_v37 }
 0x4e5   : > { %v3161_v1 = vmul.f32 %v3159_v40, %v3159_v40  ;;  %v3162_v63 = vmul.f32 %v3160_v45, %v3160_v45 }
 0x4e7   : > { %v3165_v2 = vcombine.low %v3161_v1, %v3162_v63  ;;  %v3166_v50 = vcombine.high %v3161_v1, %v3162_v63 }
 0x4e9   : > { %v3173_v11 = vrot.slane %v3165_v2, %v6171_v14  ;;  %v3180_v41 = vrot.slane %v3166_v50, %v6171_v14 }
 0x4eb   : > { %v3181_v15 = vcombine.high %v3173_v11, %v3173_v11  ;;  %v3187_v46 = vsel %vm3101_vm15, %v3173_v11, 0.0  ;;  %v3182_v58 = vcombine.high %v3180_v41, %v3180_v41  ;;  %v3201_v33 = vsel %vm3101_vm15, %v3180_v41, 0.0 }
 0x4ec   : > { %v3188_v44 = vrot.slane %v3187_v46, 4  ;;  %v3202_v17 = vrot.slane %v3201_v33, 4 }
 0x4ed   : > { %v3194_v51 = vsel %vm3101_vm15, %v3181_v15, 0.0  ;;  %v3208_v56 = vsel %vm3101_vm15, %v3182_v58, 0.0  ;;  %v5034_v15 = vld [vmem:[%s6393_s14 + $0x78] sm:$0xff]  }
 0x4ee   : > { %v3189_v23 = vadd.f32 %v3188_v44, %v3187_v46  ;;  %v3195_v53 = vrot.slane %v3194_v51, 4  ;;  %v3203_v55 = vadd.f32 %v3202_v17, %v3201_v33  ;;  %v3209_v61 = vrot.slane %v3208_v56, 4  ;;  %v5035_v46 = vld [vmem:[%s6393_s14 + $0xf8] sm:$0xff]   ;;  %v5038_v44 = vld [vmem:[%s6393_s14 + $0x70] sm:$0xff]   ;;  %4622 = vmatprep.subr.bf16.mxu1 %v5034_v15 }
 0x4ef   : > { %v5036_v58 = vld [vmem:[%s6393_s14 + $0x38] sm:$0xff]   ;;  %v5039_v17 = vld [vmem:[%s6393_s14 + $0xf0] sm:$0xff]   ;;  %4644 = vmatprep.subr.bf16.mxu0 %v5035_v46 }
 0x4f0   : > { %v3190_v62 = vrot.slane %v3189_v23, 2  ;;  %v3196_v3 = vadd.f32 %v3195_v53, %v3194_v51  ;;  %v3204_v49 = vrot.slane %v3203_v55, 2  ;;  %v3210_v54 = vadd.f32 %v3209_v61, %v3208_v56  ;;  %v5037_v33 = vld [vmem:[%s6393_s14 + $0xb8] sm:$0xff]   ;;  %4623 = vmatpush3.bf16.msra.mxu1 %v5036_v58  ;;  %v5040_v51 = vld [vmem:[%s6393_s14 + $0x30] sm:$0xff]   ;;  %v5043_v53 = vld [vmem:[%s6393_s14 + $0xe8] sm:$0xff]  }
 0x4f1   : > { %4645 = vmatpush3.bf16.msra.mxu0 %v5037_v33  ;;  %v5041_v56 = vld [vmem:[%s6393_s14 + $0xb0] sm:$0xff]   ;;  %4624 = vmatprep.subr.bf16.mxu1 %v5038_v44  ;;  %v5045_v61 = vld [vmem:[%s6393_s14 + $0xa8] sm:$0xff]  }
 0x4f2   : > { %v3191_v60 = vadd.f32 %v3190_v62, %v3189_v23  ;;  %v3197_v59 = vrot.slane %v3196_v3, 2  ;;  %v3205_v5 = vadd.f32 %v3204_v49, %v3203_v55  ;;  %v3211_v7 = vrot.slane %v3210_v54, 2  ;;  %4646 = vmatprep.subr.bf16.mxu0 %v5039_v17  ;;  %v5042_v23 = vld [vmem:[%s6393_s14 + $0x68] sm:$0xff]   ;;  %v5046_v62 = vld [vmem:[%s6393_s14 + $0x60] sm:$0xff]  }
 0x4f3   : > { %v5044_v55 = vld [vmem:[%s6393_s14 + $0x28] sm:$0xff]   ;;  %v5048_v49 = vld [vmem:[%s6393_s14 + $0x20] sm:$0xff]  }
 0x4f4   : > { %v3192_v8 = vrot.slane %v3191_v60, 1  ;;  %v3198_v9 = vadd.f32 %v3197_v59, %v3196_v3  ;;  %v3206_v6 = vrot.slane %v3205_v5, 1  ;;  %v3212_v22 = vadd.f32 %v3211_v7, %v3210_v54  ;;  %4625 = vmatpush3.bf16.msra.mxu1 %v5040_v51  ;;  %v5047_v3 = vld [vmem:[%s6393_s14 + $0xe0] sm:$0xff]   ;;  %v5051_v59 = vld [vmem:[%s6393_s14 + $0xd8] sm:$0xff]  }
 0x4f5   : > { %4647 = vmatpush3.bf16.msra.mxu0 %v5041_v56  ;;  %4626 = vmatprep.subr.bf16.mxu1 %v5042_v23  ;;  %v5049_v54 = vld [vmem:[%s6393_s14 + $0xa0] sm:$0xff]   ;;  %v5053_v7 = vld [vmem:[%s6393_s14 + $0x98] sm:$0xff]  }
 0x4f6   : > { %v3193_v42 = vadd.f32 %v3192_v8, %v3191_v60  ;;  %v3199_v13 = vrot.slane %v3198_v9, 1  ;;  %v3207_v12 = vadd.f32 %v3206_v6, %v3205_v5  ;;  %v3213_v4 = vrot.slane %v3212_v22, 1  ;;  %4648 = vmatprep.subr.bf16.mxu0 %v5043_v53  ;;  %v5050_v60 = vld [vmem:[%s6393_s14 + $0x58] sm:$0xff]   ;;  %v5054_v8 = vld [vmem:[%s6393_s14 + $0x50] sm:$0xff]  }
 0x4f7   : > { %v5052_v5 = vld [vmem:[%s6393_s14 + $0x18] sm:$0xff]   ;;  %v5056_v6 = vld [vmem:[%s6393_s14 + $0x10] sm:$0xff]  }
 0x4f8   : > { %v3200_v10 = vadd.f32 %v3199_v13, %v3198_v9  ;;  %v3214_v43 = vadd.f32 %v3213_v4, %v3212_v22  ;;  %v3215_v27 = vmul.f32 0.25, %v3193_v42  ;;  %v3217_v18 = vmul.f32 0.25, %v3207_v12  ;;  %4627 = vmatpush3.bf16.msra.mxu1 %v5044_v55  ;;  %v5055_v9 = vld [vmem:[%s6393_s14 + $0xd0] sm:$0xff]   ;;  %v5058_v42 = vld [vmem:[%s6393_s14 + $0x48] sm:$0xff]   ;;  %v5066_v55 = vld [vmem:[%s6395_s16 + $0x38] sm:$0xff]  }
 0x4f9   : > { %4649 = vmatpush3.bf16.msra.mxu0 %v5045_v61  ;;  %4628 = vmatprep.subr.bf16.mxu1 %v5046_v62  ;;  %v5057_v22 = vld [vmem:[%s6393_s14 + $0x90] sm:$0xff]   ;;  %v5059_v13 = vld [vmem:[%s6393_s14 + $0xc8] sm:$0xff]  }
 0x4fa   : > { %v3216_v19 = vmul.f32 0.25, %v3200_v10  ;;  %v3218_v47 = vmul.f32 0.25, %v3214_v43  ;;  %v3219_v21 = vadd.f32 1e-08, %v3215_v27  ;;  %v3221_v25 = vadd.f32 1e-08, %v3217_v18  ;;  %4650 = vmatprep.subr.bf16.mxu0 %v5047_v3 }
 0x4fb   : > { %v5060_v12 = vld [vmem:[%s6393_s14 + $0x8] sm:$0xff]   ;;  %v5062_v10 = vld [vmem:[%s6393_s14 + $0x40] sm:$0xff]  }
 0x4fc   : > { %v3220_v52 = vadd.f32 1e-08, %v3216_v19  ;;  %v3222_v26 = vadd.f32 1e-08, %v3218_v47  ;;  %5074 = vrsqrt.f32 %v3219_v21  ;;  %vm3225_vm5 = vcmp.eq.f32.partialorder %v3219_v21, inf  ;;  %4629 = vmatpush3.bf16.msra.mxu1 %v5048_v49  ;;  %v5061_v4 = vld [vmem:[%s6393_s14 + $0x88] sm:$0xff]  }
 0x4fd   : > { %5076 = vrsqrt.f32 %v3221_v25  ;;  %v3228_v20 = vand.u32 2147483648, %v3219_v21  ;;  %vm3239_vm3 = vcmp.eq.f32.partialorder %v3221_v25, inf  ;;  %vm3227_vm4 = vcmp.eq.f32.partialorder %v3219_v21, 0.0  ;;  %4651 = vmatpush3.bf16.msra.mxu0 %v5049_v54  ;;  %4630 = vmatprep.subr.bf16.mxu1 %v5050_v60  ;;  %v5063_v43 = vld [vmem:[%s6393_s14 + $0xc0] sm:$0xff]   ;;  %v5070_v49 = vld [vmem:[%s6395_s16 + $0x18] sm:$0xff]   ;;  %v5071_v54 = vld [vmem:[%s6395_s16 + $0x10] sm:$0xff]  }
 0x4fe   : > { %5078 = vrsqrt.f32 %v3220_v52  ;;  %vm3232_vm14 = vcmp.eq.f32.partialorder %v3220_v52, inf  ;;  %v3235_v39 = vand.u32 2147483648, %v3220_v52  ;;  %vm3234_vm9 = vcmp.eq.f32.partialorder %v3220_v52, 0.0  ;;  %4652 = vmatprep.subr.bf16.mxu0 %v5051_v59  ;;  %v5064_v27 = vld [vmem:[%s6393_s14] sm:$0xff]   ;;  %v5072_v60 = vld [vmem:[%s6395_s16 + $0x8] sm:$0xff]  }
 0x4ff   : > { %5080 = vrsqrt.f32 %v3222_v26  ;;  %v3242_v40 = vand.u32 2147483648, %v3221_v25  ;;  %vm3246_vm13 = vcmp.eq.f32.partialorder %v3222_v26, inf  ;;  %vm3241_vm11 = vcmp.eq.f32.partialorder %v3221_v25, 0.0  ;;  %v5065_v18 = vld [vmem:[%s6393_s14 + $0x80] sm:$0xff]  }
 0x500   : > { %v3249_v2 = vand.u32 2147483648, %v3222_v26  ;;  %vm3248_vm10 = vcmp.eq.f32.partialorder %v3222_v26, 0.0  ;;  %4631 = vmatpush3.bf16.msra.mxu1 %v5052_v5  ;;  %v5069_v3 = vld [vmem:[%s6395_s16 + $0x20] sm:$0xff]  }
 0x501   : > { %4653 = vmatpush3.bf16.msra.mxu0 %v5053_v7  ;;  %4632 = vmatprep.subr.bf16.mxu1 %v5054_v8  ;;  %v5073_v59 = vld [vmem:[%s6395_s16] sm:$0xff]  }
 0x502   : > { %4654 = vmatprep.subr.bf16.mxu0 %v5055_v9  ;;  %v4449_v8 = vld [vmem:[%s6394_s15] ss:$0 sm:$0xff] }
 0x504   : > { %4633 = vmatpush3.bf16.msra.mxu1 %v5056_v6 }
 0x505   : > { %4655 = vmatpush3.bf16.msra.mxu0 %v5057_v22  ;;  %4634 = vmatprep.subr.bf16.mxu1 %v5058_v42 }
 0x506   : > { %4656 = vmatprep.subr.bf16.mxu0 %v5059_v13 }
 0x508   : > { %4635 = vmatpush3.bf16.msra.mxu1 %v5060_v12 }
 0x509   : > { %v5075_v24 = vpop.eup %5074  ;;  %4657 = vmatpush3.bf16.msra.mxu0 %v5061_v4  ;;  %4636 = vmatprep.subr.bf16.mxu1 %v5062_v10 }
 0x50a   : > { %v5077_v16 = vpop.eup %5076  ;;  %v3224_v28 = vmul.f32 %v5075_v24, %v3219_v21  ;;  %4658 = vmatprep.subr.bf16.mxu0 %v5063_v43 }
 0x50b   : > { %v5079_v30 = vpop.eup %5078  ;;  %v3238_v34 = vmul.f32 %v5077_v16, %v3221_v25 }
 0x50c   : > { %v5081_v31 = vpop.eup %5080  ;;  %v3226_v32 = vsel %vm3225_vm5, %v3219_v21, %v3224_v28  ;;  %v3231_v57 = vmul.f32 %v5079_v30, %v3220_v52  ;;  %4637 = vmatpush3.bf16.msra.mxu1 %v5064_v27 }
 0x50d   : > { %v3245_v0 = vmul.f32 %v5081_v31, %v3222_v26  ;;  %v3240_v29 = vsel %vm3239_vm3, %v3221_v25, %v3238_v34  ;;  %v3229_v38 = vsel %vm3227_vm4, %v3228_v20, %v3226_v32  ;;  %4659 = vmatpush3.bf16.msra.mxu0 %v5065_v18  ;;  %4753 = vmatprep.subr.bf16.mxu1 %v5157_v48  ;;  %v4418_v34 = vld [vmem:[%s6391_s12] ss:$0 sm:$0xff] }
 0x50e   : > { %v3233_v35 = vsel %vm3232_vm14, %v3220_v52, %v3231_v57  ;;  %v3243_v63 = vsel %vm3241_vm11, %v3242_v40, %v3240_v29  ;;  %v3582_v57 = vld [vmem:[%s6392_s13] sm:$0xff] }
 0x50f   : > { %v3236_v37 = vsel %vm3234_vm9, %v3235_v39, %v3233_v35  ;;  %v3247_v45 = vsel %vm3246_vm13, %v3222_v26, %v3245_v0  ;;  %v3583_v39 = vld [vmem:[%s6392_s13 + $0x8] sm:$0xff] }
 0x510   : > { %v3251_v1 = vadd.f32 %v3236_v37, %v3229_v38  ;;  %v3250_v11 = vsel %vm3248_vm10, %v3249_v2, %v3247_v45 }
 0x512   : > { %v3252_v50 = vadd.f32 %v3251_v1, %v3243_v63 }
 0x514   : > { %v3253_v41 = vadd.f32 %v3252_v50, %v3250_v11 }
 0x516   : > { %3254 = vadd.xlane.f32.xlu0 %v3253_v41 }
 0x58b   : > { %v4607_v19 = vpop.f32.mrf.mxu1 }
 0x58c   : > { %v3575_v47 = vpop.f32.mrf.mxu0 }
 0x58d   : > { %v4608_v25 = vpop.f32.mrf.mxu1 }
 0x58e   : > { %v4751_v21 = vpop.f32.mrf.mxu0  ;;  %v4609_v28 = vadd.f32 %v4608_v25, %v4607_v19 }
 0x58f   : > { %v4610_v24 = vpop.f32.mrf.mxu1  ;;  %v4482_v21 = vld [vmem:[#allocation2] ss:$0 sm:$0xff] }
 0x590   : > { %v3578_v52 = vpop.f32.mrf.mxu0  ;;  %v3535_v31 = vadd.f32 %v4609_v28, %v4418_v34 }
 0x591   : > { %v4611_v16 = vpop.f32.mrf.mxu1 }
 0x592   : > { %v4752_v26 = vpop.f32.mrf.mxu0  ;;  %v4612_v30 = vadd.f32 %v4611_v16, %v4610_v24  ;;  %v3576_v35 = vadd.f32 %v3575_v47, %v3535_v31 }
 0x594   : > { %v3538_v32 = vadd.f32 %v4612_v30, %v4418_v34 }
 0x596   : > { %v3579_v29 = vadd.f32 %v3578_v52, %v3538_v32 }
 0x59f   : > { %v3255_v20 = vpop.xlane.xlu0 %3254 }
 0x5a0   : > { %v3257_v0 = vmul.f32 0.001953125, %v3255_v20 }
 0x5a2   : > { %v3584_v38 = vmul.f32 %v3582_v57, %v3257_v0  ;;  %v3585_v37 = vmul.f32 %v3583_v39, %v3257_v0 }
 0x5a4   : > { %v3586_v40 = vadd.f32 %v3584_v38, %v3576_v35  ;;  %v3587_v45 = vadd.f32 %v3585_v37, %v3579_v29 }
 0x5a6   : > { %vm3588_vm0 = vcmp.ge.f32.partialorder %v3586_v40, 0.0  ;;  %vm3589_vm1 = vcmp.ge.f32.partialorder %v3587_v45, 0.0  ;;  %v3590_v1 = vmul.f32 0.2, %v3586_v40  ;;  %v3591_v63 = vmul.f32 0.2, %v3587_v45 }
 0x5a8   : > { %v3592_v2 = vsel %vm3588_vm0, %v3586_v40, %v3590_v1  ;;  %v3593_v50 = vsel %vm3589_vm1, %v3587_v45, %v3591_v63 }
 0x5a9   : > { %v3594_v11 = vmul.f32 1.4142135, %v3592_v2  ;;  %v3595_v41 = vmul.f32 1.4142135, %v3593_v50 }
 0x5ab   : > { %v3602_v15 = vrot.slane %v3594_v11, %v6168_v36  ;;  %v3609_v46 = vrot.slane %v3595_v41, %v6168_v36  ;;  %v5067_v36 = vld [vmem:[%s6395_s16 + $0x30] sm:$0xff]  }
 0x5ad   : > { %v3612_v58 = vcombine.low %v3602_v15, %v3609_v46  ;;  %v3613_v33 = vcombine.high %v3602_v15, %v3609_v46 }
 0x5af   : > { %v3620_v44 = vrot.slane %v3612_v58, %v6171_v14  ;;  %v3627_v17 = vrot.slane %v3613_v33, %v6171_v14  ;;  %v5068_v14 = vld [vmem:[%s6395_s16 + $0x28] sm:$0xff]  }
 0x5b1   : > { %v3628_v51 = vcombine.high %v3620_v44, %v3620_v44  ;;  %v3629_v56 = vcombine.high %v3627_v17, %v3627_v17  ;;  %v3634_v61 = vpack.c.bf16 %v3620_v44, %v3620_v44  ;;  %v3636_v62 = vpack.c.bf16 %v3627_v17, %v3627_v17 }
 0x5b3   : > { %v3635_v23 = vpack.c.bf16 %v3628_v51, %v3628_v51  ;;  %v3637_v53 = vpack.c.bf16 %v3629_v56, %v3629_v56 }
 0x5b5   : > { %3933 = vmatprep.mubr.bf16.mxu1 %v3635_v23  ;;  %3973 = vmatprep.mubr.bf16.mxu0 %v3637_v53 }
 0x5b6   : > { %3934 = vmatmul.mubr.bf16.vlgmr.msra.gmra.mxu1 %v3634_v61  ;;  %3974 = vmatmul.mubr.bf16.vlgmr.msra.gmra.mxu0 %v3636_v62 }
 0x5b7   : > { %4754 = vmatpush3.bf16.msra.mxu1 %v5066_v55  ;;  %4769 = vmatprep.mubr.msk.bf16.mxu1 %vm5158_vm7, %v5157_v48 }
 0x5b8   : > { %4755 = vmatprep.subr.bf16.mxu1 %v5157_v48 }
 0x5bb   : > { %4756 = vmatpush3.bf16.msra.mxu1 %v5067_v36 }
 0x5bc   : > { %4757 = vmatprep.subr.bf16.mxu1 %v5157_v48 }
 0x5bf   : > { %4758 = vmatpush3.bf16.msra.mxu1 %v5068_v14 }
 0x5c0   : > { %4759 = vmatprep.subr.bf16.mxu1 %v5157_v48 }
 0x5c3   : > { %4760 = vmatpush3.bf16.msra.mxu1 %v5069_v3 }
 0x5c4   : > { %4761 = vmatprep.subr.bf16.mxu1 %v5157_v48 }
 0x5c7   : > { %4762 = vmatpush3.bf16.msra.mxu1 %v5070_v49 }
 0x5c8   : > { %4763 = vmatprep.subr.bf16.mxu1 %v5157_v48 }
 0x5cb   : > { %4764 = vmatpush3.bf16.msra.mxu1 %v5071_v54 }
 0x5cc   : > { %4765 = vmatprep.subr.bf16.mxu1 %v5157_v48 }
 0x5cf   : > { %4766 = vmatpush3.bf16.msra.mxu1 %v5072_v60 }
 0x5d0   : > { %4767 = vmatprep.subr.bf16.mxu1 %v5157_v48 }
 0x5d3   : > { %4768 = vmatpush3.bf16.msra.mxu1 %v5073_v59 }
 0x676   : > { %v4638_v5 = vpop.f32.mrf.mxu1  ;;  %v4660_v7 = vpop.f32.mrf.mxu0 }
 0x678   : > { %v4639_v9 = vpop.f32.mrf.mxu1  ;;  %v4661_v6 = vpop.f32.mrf.mxu0 }
 0x679   : > { %v4640_v22 = vadd.f32 %v4639_v9, %v4638_v5  ;;  %v4662_v4 = vadd.f32 %v4661_v6, %v4660_v7 }
 0x67a   : > { %v4641_v42 = vpop.f32.mrf.mxu1  ;;  %v4663_v13 = vpop.f32.mrf.mxu0 }
 0x67b   : > { %v3936_v12 = vadd.f32 %v4640_v22, %v4449_v8 }
 0x67c   : > { %v4642_v10 = vpop.f32.mrf.mxu1  ;;  %v4664_v43 = vpop.f32.mrf.mxu0 }
 0x67d   : > { %v3976_v27 = vadd.f32 %v4662_v4, %v3936_v12 }
 0x67f   : > { %vm3981_vm7 = vcmp.ge.f32.partialorder %v3976_v27, 0.0  ;;  %v3982_v48 = vmul.f32 0.2, %v3976_v27 }
 0x681   : > { %v3983_v18 = vsel %vm3981_vm7, %v3976_v27, %v3982_v48 }
 0x682   : > { %v3984_v19 = vmul.f32 1.4142135, %v3983_v18 }
 0x684   : > { %v3985_v47 = vpack.c.bf16 %v3984_v19, %v3984_v19 }
 0x686   : > { %4770 = vmatmul.mubr.bf16.vlgmr.msra.gmra.mxu1 %v3985_v47 }
 0x746   : > { %v4091_v25 = vpop.f32.mrf.mxu1 }
 0x747   : > { %v4092_v52 = vadd.f32 %v4482_v21, %v4091_v25 }
 0x748   : > { %v4771_v26 = vpop.f32.mrf.mxu1 }
 0x749   : > { %4098 = vst.msk [vmem:[%s605_s20] sm:$0xf] %vm4097_vm6, %v4092_v52 }
 0x74a   : > { %v4094_v24 = vpop.f32.mrf.mxu1 }
 0x74c   : > { %v4772_v16 = vpop.f32.mrf.mxu1 }
 0x74d PF: > { %s32_s29 = sadd.s32 1, %s5148_s29  }
 0x74e   : > { %p29_p2 = scmp.ge.s32.totalorder %s32_s29, 4  }
 0x750   :  { %31 = sbr.rel (!%p29_p2) target bundleno = 6 (0x6), region = 131 }
 0x755   :  { %4118 = vsyncpa [#allocation4], 1 }
 0x756   :  { %4120 = vsyncpa [#allocation4 + $0x1], 1 }
 0x757   :  { %4121 = vsyncpa [#allocation6], 1 }

</bundles_post_ra>
